<compile_context>
chip_gen: v5e
topology: v5e:2x2
jax: 0.10.0
libtpu: 0.0.40
codegen_flags: <defaults>
</compile_context>

<pallas_src>
import functools
import numpy as np
import jax
import jax.numpy as jnp
from jax.experimental import pallas as pl
from jax.experimental.pallas import tpu as pltpu

# ---------------- problem sizes (small, consistent with the module) ----------------
EMBED_DIM = 32      # embedding_dim (LSTM input size)
HIDDEN = 64         # LSTM hidden size
HIDDEN2 = 2         # per-head RNN hidden size
NUM_HEADS = 13
RNN_OUT = NUM_HEADS * HIDDEN2   # 26
BATCH = 2
SEQ = 8

H_PAD = 128         # LSTM hidden padded so each gate occupies one full 128-lane vreg
R_PAD = 128         # fused heads output padded to one full vreg (lane-dense store)

LABELS = ['abdominal', 'advanced-cad', 'alcohol-abuse', 'asp-for-mi', 'creatinine',
          'dietsupp-2mos', 'drug-abuse', 'english', 'hba1c', 'keto-1yr',
          'major-diabetes', 'makes-decisions', 'mi-6mos']


# ------------------------------- Pallas kernel --------------------------------------
def _lstm_rnn_kernel(x_ref,          # (T*Bp, E)        time-major flattened input
                     wih_l_ref,      # (E, 4*H_PAD)     LSTM input->gates (padded)
                     whh_l_ref,      # (H_PAD, 4*H_PAD) LSTM hidden->gates (padded)
                     b_l_ref,        # (1, 4*H_PAD)     LSTM combined bias (padded)
                     wih_r_ref,      # (H_PAD, R_PAD)   stacked RNN input weights (padded)
                     whh_r_ref,      # (R_PAD, R_PAD)   block-diag RNN recurrent weights (padded)
                     b_r_ref,        # (1, R_PAD)       stacked RNN combined bias (padded)
                     len_ref,        # (Bp, 1) int32    sequence lengths (0 for pad rows)
                     out_ref,        # (Bp, R_PAD)      sigmoid(last-valid-step RNN state)
                     gates_ref,      # VMEM scratch (T*Bp, 4*H_PAD)
                     h_all_ref,      # VMEM scratch (T*Bp, H_PAD)
                     z_ref,          # VMEM scratch (T*Bp, R_PAD)
                     *, seq_len, b_pad):
    # ---- hoisted input->gates projection for ALL timesteps (one matmul) ----
    gates_ref[...] = (jnp.dot(x_ref[...], wih_l_ref[...],
                              preferred_element_type=jnp.float32) + b_l_ref[...])

    # ---- LSTM recurrence (fully unrolled; PyTorch gate order i, f, g, o) ----
    h = jnp.zeros((b_pad, H_PAD), jnp.float32)
    c = jnp.zeros((b_pad, H_PAD), jnp.float32)
    for t in range(seq_len):
        g = (gates_ref[t * b_pad:(t + 1) * b_pad, :]
             + jnp.dot(h, whh_l_ref[...], preferred_element_type=jnp.float32))
        # each gate slice is exactly one 128-lane vreg (no cross-lane relayout)
        i_g = jax.nn.sigmoid(g[:, 0 * H_PAD:1 * H_PAD])
        f_g = jax.nn.sigmoid(g[:, 1 * H_PAD:2 * H_PAD])
        g_g = jnp.tanh(g[:, 2 * H_PAD:3 * H_PAD])
        o_g = jax.nn.sigmoid(g[:, 3 * H_PAD:4 * H_PAD])
        c = f_g * c + i_g * g_g
        h = o_g * jnp.tanh(c)
        h_all_ref[t * b_pad:(t + 1) * b_pad, :] = h

    # ---- hoisted head input projection for ALL timesteps (one matmul) ----
    z_ref[...] = (jnp.dot(h_all_ref[...], wih_r_ref[...],
                          preferred_element_type=jnp.float32) + b_r_ref[...])

    # ---- 13 fused tanh-RNN heads: tiny block-diagonal recurrence ----
    lengths = len_ref[...]                            # (Bp, 1) int32, loaded once
    hr = jnp.zeros((b_pad, R_PAD), jnp.float32)
    out = jnp.zeros((b_pad, R_PAD), jnp.float32)
    for t in range(seq_len):
        hr = jnp.tanh(z_ref[t * b_pad:(t + 1) * b_pad, :]
                      + jnp.dot(hr, whh_r_ref[...],
                                preferred_element_type=jnp.float32))
        # capture RAW state at the last valid timestep of each sequence
        out = jnp.where(lengths == (t + 1), hr, out)

    # sigmoid applied once, outside the serial chain
    out_ref[...] = jax.nn.sigmoid(out)


@jax.jit
def lstm_multihead_forward(x_btE, lengths, padded_params):
    """x_btE: (B, T, E) float32 (batch_first). lengths: (B,) int32.
       Returns (B, 26) = 13 heads x 2 (sigmoid of last-valid-step head output)."""
    B, T, E = x_btE.shape
    b_pad = max(8, -(-B // 8) * 8)                    # pad batch to a sublane multiple

    x_pad = jnp.zeros((b_pad, T, E), x_btE.dtype).at[:B].set(x_btE)
    len_pad = (jnp.zeros((b_pad, 1), jnp.int32)
               .at[:B, 0].set(lengths.astype(jnp.int32)))   # pad rows get length 0
    # time-major flatten: row index = t * b_pad + b
    x_flat = jnp.transpose(x_pad, (1, 0, 2)).reshape(T * b_pad, E)

    kernel = functools.partial(_lstm_rnn_kernel, seq_len=T, b_pad=b_pad)
    out = pl.pallas_call(
        kernel,
        out_shape=jax.ShapeDtypeStruct((b_pad, R_PAD), jnp.float32),
        scratch_shapes=[
            pltpu.VMEM((T * b_pad, 4 * H_PAD), jnp.float32),  # all-timestep LSTM gate preacts
            pltpu.VMEM((T * b_pad, H_PAD), jnp.float32),      # all LSTM hidden states
            pltpu.VMEM((T * b_pad, R_PAD), jnp.float32),      # all head input projections
        ],
    )(x_flat, *padded_params, len_pad)
    return out[:B, :RNN_OUT]


# ------------------------------ parameter construction ------------------------------
def init_params(key):
    ks = jax.random.split(key, 10)
    scale_l = 1.0 / np.sqrt(HIDDEN)
    scale_r = 1.0 / np.sqrt(HIDDEN2)

    # LSTM weights (stored transposed so the kernel does x @ W); gate order i,f,g,o
    wih_l = jax.random.uniform(ks[0], (EMBED_DIM, 4 * HIDDEN), jnp.float32, -scale_l, scale_l)
    whh_l = jax.random.uniform(ks[1], (HIDDEN, 4 * HIDDEN), jnp.float32, -scale_l, scale_l)
    b_ih_l = jax.random.uniform(ks[2], (4 * HIDDEN,), jnp.float32, -scale_l, scale_l)
    b_hh_l = jax.random.uniform(ks[3], (4 * HIDDEN,), jnp.float32, -scale_l, scale_l)
    b_l = (b_ih_l + b_hh_l).reshape(1, 4 * HIDDEN)

    # 13 RNN heads: W_ih (2,64) -> stacked (64, 26); W_hh (2,2) -> block-diag (26, 26)
    wih_r_heads = jax.random.uniform(ks[4], (NUM_HEADS, HIDDEN2, HIDDEN), jnp.float32, -scale_r, scale_r)
    whh_r_heads = jax.random.uniform(ks[5], (NUM_HEADS, HIDDEN2, HIDDEN2), jnp.float32, -scale_r, scale_r)
    b_ih_r = jax.random.uniform(ks[6], (NUM_HEADS, HIDDEN2), jnp.float32, -scale_r, scale_r)
    b_hh_r = jax.random.uniform(ks[7], (NUM_HEADS, HIDDEN2), jnp.float32, -scale_r, scale_r)

    wih_r = jnp.transpose(wih_r_heads, (2, 0, 1)).reshape(HIDDEN, RNN_OUT)  # (64, 26)

    whh_bd = jnp.zeros((RNN_OUT, RNN_OUT), jnp.float32)
    for k in range(NUM_HEADS):
        # block k implements h_prev_k @ W_hh_k^T
        whh_bd = whh_bd.at[k * 2:(k + 1) * 2, k * 2:(k + 1) * 2].set(whh_r_heads[k].T)

    b_r = (b_ih_r + b_hh_r).reshape(1, RNN_OUT)
    return (wih_l, whh_l, b_l, wih_r, whh_bd, b_r)


def pad_params(params):
    """Zero-pad weights so each LSTM gate is a full 128-lane vreg and the fused
       head dimension is 128 lanes. Padded lanes provably stay exactly zero."""
    wih_l, whh_l, b_l, wih_r, whh_bd, b_r = params
    H4P = 4 * H_PAD
    wih_l_p = jnp.zeros((EMBED_DIM, H4P), jnp.float32)
    whh_l_p = jnp.zeros((H_PAD, H4P), jnp.float32)
    b_l_p = jnp.zeros((1, H4P), jnp.float32)
    for k in range(4):  # i, f, g, o
        wih_l_p = wih_l_p.at[:, k * H_PAD:k * H_PAD + HIDDEN].set(wih_l[:, k * HIDDEN:(k + 1) * HIDDEN])
        whh_l_p = whh_l_p.at[:HIDDEN, k * H_PAD:k * H_PAD + HIDDEN].set(whh_l[:, k * HIDDEN:(k + 1) * HIDDEN])
        b_l_p = b_l_p.at[:, k * H_PAD:k * H_PAD + HIDDEN].set(b_l[:, k * HIDDEN:(k + 1) * HIDDEN])

    wih_r_p = jnp.zeros((H_PAD, R_PAD), jnp.float32).at[:HIDDEN, :RNN_OUT].set(wih_r)
    whh_r_p = jnp.zeros((R_PAD, R_PAD), jnp.float32).at[:RNN_OUT, :RNN_OUT].set(whh_bd)
    b_r_p = jnp.zeros((1, R_PAD), jnp.float32).at[:, :RNN_OUT].set(b_r)
    return (wih_l_p, whh_l_p, b_l_p, wih_r_p, whh_r_p, b_r_p)


# ------------------------------ pure-JAX reference -----------------------------------
def ref_forward(x_btE, lengths, params):
    wih_l, whh_l, b_l, wih_r, whh_bd, b_r = params
    B, T, E = x_btE.shape
    h = jnp.zeros((B, HIDDEN)); c = jnp.zeros((B, HIDDEN)); hr = jnp.zeros((B, RNN_OUT))
    out = jnp.zeros((B, RNN_OUT))
    for t in range(T):
        gates = x_btE[:, t] @ wih_l + h @ whh_l + b_l
        i = jax.nn.sigmoid(gates[:, :HIDDEN])
        f = jax.nn.sigmoid(gates[:, HIDDEN:2 * HIDDEN])
        g = jnp.tanh(gates[:, 2 * HIDDEN:3 * HIDDEN])
        o = jax.nn.sigmoid(gates[:, 3 * HIDDEN:])
        c = f * c + i * g
        h = o * jnp.tanh(c)
        hr = jnp.tanh(h @ wih_r + hr @ whh_bd + b_r)
        mask = (lengths == (t + 1)).reshape(B, 1)
        out = jnp.where(mask, jax.nn.sigmoid(hr), out)
    return out


# ------------------------------------ main -------------------------------------------
if __name__ == "__main__":
    key = jax.random.PRNGKey(0)
    k_x, k_p = jax.random.split(key)

    x = jax.random.normal(k_x, (BATCH, SEQ, EMBED_DIM), jnp.float32)
    lengths = jnp.array([SEQ, 5], dtype=jnp.int32)   # valid lengths per batch element
    params = init_params(k_p)
    padded_params = pad_params(params)

    out = lstm_multihead_forward(x, lengths, padded_params)
    out = jax.block_until_ready(out)

    # sanity check against the pure-JAX reference
    ref = ref_forward(x, lengths, params)
    np.testing.assert_allclose(np.asarray(out), np.asarray(ref), atol=1e-5, rtol=1e-5)

    # assemble the final dict exactly like the torch module: 13 keys of (B, 2) sigmoid outputs
    final_dict = {name: out[:, 2 * i:2 * i + 2] for i, name in enumerate(LABELS)}
    assert all(v.shape == (BATCH, HIDDEN2) for v in final_dict.values())

    print("KERNEL_OK")
</pallas_src>

<mosaic_0001>
module attributes {stable_mosaic.version = 11 : i64} {
  func.func @_lstm_rnn_kernel(%arg0: memref<64x32xf32, #tpu.memory_space<vmem>>, %arg1: memref<32x512xf32, #tpu.memory_space<vmem>>, %arg2: memref<128x512xf32, #tpu.memory_space<vmem>>, %arg3: memref<1x512xf32, #tpu.memory_space<vmem>>, %arg4: memref<128x128xf32, #tpu.memory_space<vmem>>, %arg5: memref<128x128xf32, #tpu.memory_space<vmem>>, %arg6: memref<1x128xf32, #tpu.memory_space<vmem>>, %arg7: memref<8x1xi32, #tpu.memory_space<vmem>>, %arg8: memref<8x128xf32, #tpu.memory_space<vmem>>, %arg9: memref<64x512xf32, #tpu.memory_space<vmem>>, %arg10: memref<64x128xf32, #tpu.memory_space<vmem>>, %arg11: memref<64x128xf32, #tpu.memory_space<vmem>>) attributes {dimension_semantics = [], scalar_prefetch = 0 : i64, scratch_operands = 3 : i64, tpu.core_type = #tpu.core_type<tc>} {
    %c0 = arith.constant 0 : index
    %c0_0 = arith.constant 0 : index
    %0 = vector.load %arg0[%c0, %c0_0] : memref<64x32xf32, #tpu.memory_space<vmem>>, vector<64x32xf32>
    %c0_1 = arith.constant 0 : index
    %c0_2 = arith.constant 0 : index
    %1 = vector.load %arg1[%c0_1, %c0_2] : memref<32x512xf32, #tpu.memory_space<vmem>>, vector<32x512xf32>
    %cst = arith.constant dense<0.000000e+00> : vector<64x512xf32>
    %2 = tpu.matmul %0, %1, %cst {dimension_numbers = #tpu.dot_dimension_numbers<[1], [0], [0], [1], [0, 0, 1, 1], [], []>} : vector<64x32xf32>, vector<32x512xf32>, vector<64x512xf32> -> vector<64x512xf32>
    %c0_3 = arith.constant 0 : index
    %c0_4 = arith.constant 0 : index
    %3 = vector.load %arg3[%c0_3, %c0_4] : memref<1x512xf32, #tpu.memory_space<vmem>>, vector<1x512xf32>
    %4 = vector.broadcast %3 : vector<1x512xf32> to vector<64x512xf32>
    %5 = arith.addf %2, %4 : vector<64x512xf32>
    %c0_5 = arith.constant 0 : index
    %c0_6 = arith.constant 0 : index
    %6 = vector.load %arg9[%c0_5, %c0_6] : memref<64x512xf32, #tpu.memory_space<vmem>>, vector<64x512xf32>
    tpu.vector_store %arg9[%c0_5, %c0_6], %5 {strides = array<i32>} : memref<64x512xf32, #tpu.memory_space<vmem>>, vector<64x512xf32>,
    %cst_7 = arith.constant 0.000000e+00 : f32
    %7 = vector.broadcast %cst_7 : f32 to vector<8x128xf32>
    %cst_8 = arith.constant 0.000000e+00 : f32
    %8 = vector.broadcast %cst_8 : f32 to vector<8x128xf32>
    %c0_9 = arith.constant 0 : index
    %c0_10 = arith.constant 0 : index
    %9 = vector.load %arg9[%c0_9, %c0_10] : memref<64x512xf32, #tpu.memory_space<vmem>>, vector<8x512xf32>
    %c0_11 = arith.constant 0 : index
    %c0_12 = arith.constant 0 : index
    %10 = vector.load %arg2[%c0_11, %c0_12] : memref<128x512xf32, #tpu.memory_space<vmem>>, vector<128x512xf32>
    %cst_13 = arith.constant dense<0.000000e+00> : vector<8x512xf32>
    %11 = tpu.matmul %7, %10, %cst_13 {dimension_numbers = #tpu.dot_dimension_numbers<[1], [0], [0], [1], [0, 0, 1, 1], [], []>} : vector<8x128xf32>, vector<128x512xf32>, vector<8x512xf32> -> vector<8x512xf32>
    %12 = arith.addf %9, %11 : vector<8x512xf32>
    %13 = vector.extract_strided_slice %12 {offsets = [0, 0], sizes = [8, 128], strides = [1, 1]} : vector<8x512xf32> to vector<8x128xf32>
    %14 = arith.negf %13 : vector<8x128xf32>
    %15 = math.exp %14 : vector<8x128xf32>
    %cst_14 = arith.constant 1.000000e+00 : f32
    %16 = vector.broadcast %cst_14 : f32 to vector<8x128xf32>
    %17 = arith.addf %16, %15 : vector<8x128xf32>
    %18 = arith.divf %16, %17 : vector<8x128xf32>
    %19 = vector.extract_strided_slice %12 {offsets = [0, 128], sizes = [8, 128], strides = [1, 1]} : vector<8x512xf32> to vector<8x128xf32>
    %20 = arith.negf %19 : vector<8x128xf32>
    %21 = math.exp %20 : vector<8x128xf32>
    %cst_15 = arith.constant 1.000000e+00 : f32
    %22 = vector.broadcast %cst_15 : f32 to vector<8x128xf32>
    %23 = arith.addf %22, %21 : vector<8x128xf32>
    %24 = arith.divf %22, %23 : vector<8x128xf32>
    %25 = vector.extract_strided_slice %12 {offsets = [0, 256], sizes = [8, 128], strides = [1, 1]} : vector<8x512xf32> to vector<8x128xf32>
    %26 = math.tanh %25 : vector<8x128xf32>
    %27 = vector.extract_strided_slice %12 {offsets = [0, 384], sizes = [8, 128], strides = [1, 1]} : vector<8x512xf32> to vector<8x128xf32>
    %28 = arith.negf %27 : vector<8x128xf32>
    %29 = math.exp %28 : vector<8x128xf32>
    %cst_16 = arith.constant 1.000000e+00 : f32
    %30 = vector.broadcast %cst_16 : f32 to vector<8x128xf32>
    %31 = arith.addf %30, %29 : vector<8x128xf32>
    %32 = arith.divf %30, %31 : vector<8x128xf32>
    %33 = arith.mulf %24, %8 : vector<8x128xf32>
    %34 = arith.mulf %18, %26 : vector<8x128xf32>
    %35 = arith.addf %33, %34 : vector<8x128xf32>
    %36 = math.tanh %35 : vector<8x128xf32>
    %37 = arith.mulf %32, %36 : vector<8x128xf32>
    %c0_17 = arith.constant 0 : index
    %c0_18 = arith.constant 0 : index
    %38 = vector.load %arg10[%c0_17, %c0_18] : memref<64x128xf32, #tpu.memory_space<vmem>>, vector<8x128xf32>
    tpu.vector_store %arg10[%c0_17, %c0_18], %37 {strides = array<i32>} : memref<64x128xf32, #tpu.memory_space<vmem>>, vector<8x128xf32>,
    %c8 = arith.constant 8 : index
    %c0_19 = arith.constant 0 : index
    %39 = vector.load %arg9[%c8, %c0_19] : memref<64x512xf32, #tpu.memory_space<vmem>>, vector<8x512xf32>
    %c0_20 = arith.constant 0 : index
    %c0_21 = arith.constant 0 : index
    %40 = vector.load %arg2[%c0_20, %c0_21] : memref<128x512xf32, #tpu.memory_space<vmem>>, vector<128x512xf32>
    %cst_22 = arith.constant dense<0.000000e+00> : vector<8x512xf32>
    %41 = tpu.matmul %37, %40, %cst_22 {dimension_numbers = #tpu.dot_dimension_numbers<[1], [0], [0], [1], [0, 0, 1, 1], [], []>} : vector<8x128xf32>, vector<128x512xf32>, vector<8x512xf32> -> vector<8x512xf32>
    %42 = arith.addf %39, %41 : vector<8x512xf32>
    %43 = vector.extract_strided_slice %42 {offsets = [0, 0], sizes = [8, 128], strides = [1, 1]} : vector<8x512xf32> to vector<8x128xf32>
    %44 = arith.negf %43 : vector<8x128xf32>
    %45 = math.exp %44 : vector<8x128xf32>
    %cst_23 = arith.constant 1.000000e+00 : f32
    %46 = vector.broadcast %cst_23 : f32 to vector<8x128xf32>
    %47 = arith.addf %46, %45 : vector<8x128xf32>
    %48 = arith.divf %46, %47 : vector<8x128xf32>
    %49 = vector.extract_strided_slice %42 {offsets = [0, 128], sizes = [8, 128], strides = [1, 1]} : vector<8x512xf32> to vector<8x128xf32>
    %50 = arith.negf %49 : vector<8x128xf32>
    %51 = math.exp %50 : vector<8x128xf32>
    %cst_24 = arith.constant 1.000000e+00 : f32
    %52 = vector.broadcast %cst_24 : f32 to vector<8x128xf32>
    %53 = arith.addf %52, %51 : vector<8x128xf32>
    %54 = arith.divf %52, %53 : vector<8x128xf32>
    %55 = vector.extract_strided_slice %42 {offsets = [0, 256], sizes = [8, 128], strides = [1, 1]} : vector<8x512xf32> to vector<8x128xf32>
    %56 = math.tanh %55 : vector<8x128xf32>
    %57 = vector.extract_strided_slice %42 {offsets = [0, 384], sizes = [8, 128], strides = [1, 1]} : vector<8x512xf32> to vector<8x128xf32>
    %58 = arith.negf %57 : vector<8x128xf32>
    %59 = math.exp %58 : vector<8x128xf32>
    %cst_25 = arith.constant 1.000000e+00 : f32
    %60 = vector.broadcast %cst_25 : f32 to vector<8x128xf32>
    %61 = arith.addf %60, %59 : vector<8x128xf32>
    %62 = arith.divf %60, %61 : vector<8x128xf32>
    %63 = arith.mulf %54, %35 : vector<8x128xf32>
    %64 = arith.mulf %48, %56 : vector<8x128xf32>
    %65 = arith.addf %63, %64 : vector<8x128xf32>
    %66 = math.tanh %65 : vector<8x128xf32>
    %67 = arith.mulf %62, %66 : vector<8x128xf32>
    %c8_26 = arith.constant 8 : index
    %c0_27 = arith.constant 0 : index
    %68 = vector.load %arg10[%c8_26, %c0_27] : memref<64x128xf32, #tpu.memory_space<vmem>>, vector<8x128xf32>
    tpu.vector_store %arg10[%c8_26, %c0_27], %67 {strides = array<i32>} : memref<64x128xf32, #tpu.memory_space<vmem>>, vector<8x128xf32>,
    %c16 = arith.constant 16 : index
    %c0_28 = arith.constant 0 : index
    %69 = vector.load %arg9[%c16, %c0_28] : memref<64x512xf32, #tpu.memory_space<vmem>>, vector<8x512xf32>
    %c0_29 = arith.constant 0 : index
    %c0_30 = arith.constant 0 : index
    %70 = vector.load %arg2[%c0_29, %c0_30] : memref<128x512xf32, #tpu.memory_space<vmem>>, vector<128x512xf32>
    %cst_31 = arith.constant dense<0.000000e+00> : vector<8x512xf32>
    %71 = tpu.matmul %67, %70, %cst_31 {dimension_numbers = #tpu.dot_dimension_numbers<[1], [0], [0], [1], [0, 0, 1, 1], [], []>} : vector<8x128xf32>, vector<128x512xf32>, vector<8x512xf32> -> vector<8x512xf32>
    %72 = arith.addf %69, %71 : vector<8x512xf32>
    %73 = vector.extract_strided_slice %72 {offsets = [0, 0], sizes = [8, 128], strides = [1, 1]} : vector<8x512xf32> to vector<8x128xf32>
    %74 = arith.negf %73 : vector<8x128xf32>
    %75 = math.exp %74 : vector<8x128xf32>
    %cst_32 = arith.constant 1.000000e+00 : f32
    %76 = vector.broadcast %cst_32 : f32 to vector<8x128xf32>
    %77 = arith.addf %76, %75 : vector<8x128xf32>
    %78 = arith.divf %76, %77 : vector<8x128xf32>
    %79 = vector.extract_strided_slice %72 {offsets = [0, 128], sizes = [8, 128], strides = [1, 1]} : vector<8x512xf32> to vector<8x128xf32>
    %80 = arith.negf %79 : vector<8x128xf32>
    %81 = math.exp %80 : vector<8x128xf32>
    %cst_33 = arith.constant 1.000000e+00 : f32
    %82 = vector.broadcast %cst_33 : f32 to vector<8x128xf32>
    %83 = arith.addf %82, %81 : vector<8x128xf32>
    %84 = arith.divf %82, %83 : vector<8x128xf32>
    %85 = vector.extract_strided_slice %72 {offsets = [0, 256], sizes = [8, 128], strides = [1, 1]} : vector<8x512xf32> to vector<8x128xf32>
    %86 = math.tanh %85 : vector<8x128xf32>
    %87 = vector.extract_strided_slice %72 {offsets = [0, 384], sizes = [8, 128], strides = [1, 1]} : vector<8x512xf32> to vector<8x128xf32>
    %88 = arith.negf %87 : vector<8x128xf32>
    %89 = math.exp %88 : vector<8x128xf32>
    %cst_34 = arith.constant 1.000000e+00 : f32
    %90 = vector.broadcast %cst_34 : f32 to vector<8x128xf32>
    %91 = arith.addf %90, %89 : vector<8x128xf32>
    %92 = arith.divf %90, %91 : vector<8x128xf32>
    %93 = arith.mulf %84, %65 : vector<8x128xf32>
    %94 = arith.mulf %78, %86 : vector<8x128xf32>
    %95 = arith.addf %93, %94 : vector<8x128xf32>
    %96 = math.tanh %95 : vector<8x128xf32>
    %97 = arith.mulf %92, %96 : vector<8x128xf32>
    %c16_35 = arith.constant 16 : index
    %c0_36 = arith.constant 0 : index
    %98 = vector.load %arg10[%c16_35, %c0_36] : memref<64x128xf32, #tpu.memory_space<vmem>>, vector<8x128xf32>
    tpu.vector_store %arg10[%c16_35, %c0_36], %97 {strides = array<i32>} : memref<64x128xf32, #tpu.memory_space<vmem>>, vector<8x128xf32>,
    %c24 = arith.constant 24 : index
    %c0_37 = arith.constant 0 : index
    %99 = vector.load %arg9[%c24, %c0_37] : memref<64x512xf32, #tpu.memory_space<vmem>>, vector<8x512xf32>
    %c0_38 = arith.constant 0 : index
    %c0_39 = arith.constant 0 : index
    %100 = vector.load %arg2[%c0_38, %c0_39] : memref<128x512xf32, #tpu.memory_space<vmem>>, vector<128x512xf32>
    %cst_40 = arith.constant dense<0.000000e+00> : vector<8x512xf32>
    %101 = tpu.matmul %97, %100, %cst_40 {dimension_numbers = #tpu.dot_dimension_numbers<[1], [0], [0], [1], [0, 0, 1, 1], [], []>} : vector<8x128xf32>, vector<128x512xf32>, vector<8x512xf32> -> vector<8x512xf32>
    %102 = arith.addf %99, %101 : vector<8x512xf32>
    %103 = vector.extract_strided_slice %102 {offsets = [0, 0], sizes = [8, 128], strides = [1, 1]} : vector<8x512xf32> to vector<8x128xf32>
    %104 = arith.negf %103 : vector<8x128xf32>
    %105 = math.exp %104 : vector<8x128xf32>
    %cst_41 = arith.constant 1.000000e+00 : f32
    %106 = vector.broadcast %cst_41 : f32 to vector<8x128xf32>
    %107 = arith.addf %106, %105 : vector<8x128xf32>
    %108 = arith.divf %106, %107 : vector<8x128xf32>
    %109 = vector.extract_strided_slice %102 {offsets = [0, 128], sizes = [8, 128], strides = [1, 1]} : vector<8x512xf32> to vector<8x128xf32>
    %110 = arith.negf %109 : vector<8x128xf32>
    %111 = math.exp %110 : vector<8x128xf32>
    %cst_42 = arith.constant 1.000000e+00 : f32
    %112 = vector.broadcast %cst_42 : f32 to vector<8x128xf32>
    %113 = arith.addf %112, %111 : vector<8x128xf32>
    %114 = arith.divf %112, %113 : vector<8x128xf32>
    %115 = vector.extract_strided_slice %102 {offsets = [0, 256], sizes = [8, 128], strides = [1, 1]} : vector<8x512xf32> to vector<8x128xf32>
    %116 = math.tanh %115 : vector<8x128xf32>
    %117 = vector.extract_strided_slice %102 {offsets = [0, 384], sizes = [8, 128], strides = [1, 1]} : vector<8x512xf32> to vector<8x128xf32>
    %118 = arith.negf %117 : vector<8x128xf32>
    %119 = math.exp %118 : vector<8x128xf32>
    %cst_43 = arith.constant 1.000000e+00 : f32
    %120 = vector.broadcast %cst_43 : f32 to vector<8x128xf32>
    %121 = arith.addf %120, %119 : vector<8x128xf32>
    %122 = arith.divf %120, %121 : vector<8x128xf32>
    %123 = arith.mulf %114, %95 : vector<8x128xf32>
    %124 = arith.mulf %108, %116 : vector<8x128xf32>
    %125 = arith.addf %123, %124 : vector<8x128xf32>
    %126 = math.tanh %125 : vector<8x128xf32>
    %127 = arith.mulf %122, %126 : vector<8x128xf32>
    %c24_44 = arith.constant 24 : index
    %c0_45 = arith.constant 0 : index
    %128 = vector.load %arg10[%c24_44, %c0_45] : memref<64x128xf32, #tpu.memory_space<vmem>>, vector<8x128xf32>
    tpu.vector_store %arg10[%c24_44, %c0_45], %127 {strides = array<i32>} : memref<64x128xf32, #tpu.memory_space<vmem>>, vector<8x128xf32>,
    %c32 = arith.constant 32 : index
    %c0_46 = arith.constant 0 : index
    %129 = vector.load %arg9[%c32, %c0_46] : memref<64x512xf32, #tpu.memory_space<vmem>>, vector<8x512xf32>
    %c0_47 = arith.constant 0 : index
    %c0_48 = arith.constant 0 : index
    %130 = vector.load %arg2[%c0_47, %c0_48] : memref<128x512xf32, #tpu.memory_space<vmem>>, vector<128x512xf32>
    %cst_49 = arith.constant dense<0.000000e+00> : vector<8x512xf32>
    %131 = tpu.matmul %127, %130, %cst_49 {dimension_numbers = #tpu.dot_dimension_numbers<[1], [0], [0], [1], [0, 0, 1, 1], [], []>} : vector<8x128xf32>, vector<128x512xf32>, vector<8x512xf32> -> vector<8x512xf32>
    %132 = arith.addf %129, %131 : vector<8x512xf32>
    %133 = vector.extract_strided_slice %132 {offsets = [0, 0], sizes = [8, 128], strides = [1, 1]} : vector<8x512xf32> to vector<8x128xf32>
    %134 = arith.negf %133 : vector<8x128xf32>
    %135 = math.exp %134 : vector<8x128xf32>
    %cst_50 = arith.constant 1.000000e+00 : f32
    %136 = vector.broadcast %cst_50 : f32 to vector<8x128xf32>
    %137 = arith.addf %136, %135 : vector<8x128xf32>
    %138 = arith.divf %136, %137 : vector<8x128xf32>
    %139 = vector.extract_strided_slice %132 {offsets = [0, 128], sizes = [8, 128], strides = [1, 1]} : vector<8x512xf32> to vector<8x128xf32>
    %140 = arith.negf %139 : vector<8x128xf32>
    %141 = math.exp %140 : vector<8x128xf32>
    %cst_51 = arith.constant 1.000000e+00 : f32
    %142 = vector.broadcast %cst_51 : f32 to vector<8x128xf32>
    %143 = arith.addf %142, %141 : vector<8x128xf32>
    %144 = arith.divf %142, %143 : vector<8x128xf32>
    %145 = vector.extract_strided_slice %132 {offsets = [0, 256], sizes = [8, 128], strides = [1, 1]} : vector<8x512xf32> to vector<8x128xf32>
    %146 = math.tanh %145 : vector<8x128xf32>
    %147 = vector.extract_strided_slice %132 {offsets = [0, 384], sizes = [8, 128], strides = [1, 1]} : vector<8x512xf32> to vector<8x128xf32>
    %148 = arith.negf %147 : vector<8x128xf32>
    %149 = math.exp %148 : vector<8x128xf32>
    %cst_52 = arith.constant 1.000000e+00 : f32
    %150 = vector.broadcast %cst_52 : f32 to vector<8x128xf32>
    %151 = arith.addf %150, %149 : vector<8x128xf32>
    %152 = arith.divf %150, %151 : vector<8x128xf32>
    %153 = arith.mulf %144, %125 : vector<8x128xf32>
    %154 = arith.mulf %138, %146 : vector<8x128xf32>
    %155 = arith.addf %153, %154 : vector<8x128xf32>
    %156 = math.tanh %155 : vector<8x128xf32>
    %157 = arith.mulf %152, %156 : vector<8x128xf32>
    %c32_53 = arith.constant 32 : index
    %c0_54 = arith.constant 0 : index
    %158 = vector.load %arg10[%c32_53, %c0_54] : memref<64x128xf32, #tpu.memory_space<vmem>>, vector<8x128xf32>
    tpu.vector_store %arg10[%c32_53, %c0_54], %157 {strides = array<i32>} : memref<64x128xf32, #tpu.memory_space<vmem>>, vector<8x128xf32>,
    %c40 = arith.constant 40 : index
    %c0_55 = arith.constant 0 : index
    %159 = vector.load %arg9[%c40, %c0_55] : memref<64x512xf32, #tpu.memory_space<vmem>>, vector<8x512xf32>
    %c0_56 = arith.constant 0 : index
    %c0_57 = arith.constant 0 : index
    %160 = vector.load %arg2[%c0_56, %c0_57] : memref<128x512xf32, #tpu.memory_space<vmem>>, vector<128x512xf32>
    %cst_58 = arith.constant dense<0.000000e+00> : vector<8x512xf32>
    %161 = tpu.matmul %157, %160, %cst_58 {dimension_numbers = #tpu.dot_dimension_numbers<[1], [0], [0], [1], [0, 0, 1, 1], [], []>} : vector<8x128xf32>, vector<128x512xf32>, vector<8x512xf32> -> vector<8x512xf32>
    %162 = arith.addf %159, %161 : vector<8x512xf32>
    %163 = vector.extract_strided_slice %162 {offsets = [0, 0], sizes = [8, 128], strides = [1, 1]} : vector<8x512xf32> to vector<8x128xf32>
    %164 = arith.negf %163 : vector<8x128xf32>
    %165 = math.exp %164 : vector<8x128xf32>
    %cst_59 = arith.constant 1.000000e+00 : f32
    %166 = vector.broadcast %cst_59 : f32 to vector<8x128xf32>
    %167 = arith.addf %166, %165 : vector<8x128xf32>
    %168 = arith.divf %166, %167 : vector<8x128xf32>
    %169 = vector.extract_strided_slice %162 {offsets = [0, 128], sizes = [8, 128], strides = [1, 1]} : vector<8x512xf32> to vector<8x128xf32>
    %170 = arith.negf %169 : vector<8x128xf32>
    %171 = math.exp %170 : vector<8x128xf32>
    %cst_60 = arith.constant 1.000000e+00 : f32
    %172 = vector.broadcast %cst_60 : f32 to vector<8x128xf32>
    %173 = arith.addf %172, %171 : vector<8x128xf32>
    %174 = arith.divf %172, %173 : vector<8x128xf32>
    %175 = vector.extract_strided_slice %162 {offsets = [0, 256], sizes = [8, 128], strides = [1, 1]} : vector<8x512xf32> to vector<8x128xf32>
    %176 = math.tanh %175 : vector<8x128xf32>
    %177 = vector.extract_strided_slice %162 {offsets = [0, 384], sizes = [8, 128], strides = [1, 1]} : vector<8x512xf32> to vector<8x128xf32>
    %178 = arith.negf %177 : vector<8x128xf32>
    %179 = math.exp %178 : vector<8x128xf32>
    %cst_61 = arith.constant 1.000000e+00 : f32
    %180 = vector.broadcast %cst_61 : f32 to vector<8x128xf32>
    %181 = arith.addf %180, %179 : vector<8x128xf32>
    %182 = arith.divf %180, %181 : vector<8x128xf32>
    %183 = arith.mulf %174, %155 : vector<8x128xf32>
    %184 = arith.mulf %168, %176 : vector<8x128xf32>
    %185 = arith.addf %183, %184 : vector<8x128xf32>
    %186 = math.tanh %185 : vector<8x128xf32>
    %187 = arith.mulf %182, %186 : vector<8x128xf32>
    %c40_62 = arith.constant 40 : index
    %c0_63 = arith.constant 0 : index
    %188 = vector.load %arg10[%c40_62, %c0_63] : memref<64x128xf32, #tpu.memory_space<vmem>>, vector<8x128xf32>
    tpu.vector_store %arg10[%c40_62, %c0_63], %187 {strides = array<i32>} : memref<64x128xf32, #tpu.memory_space<vmem>>, vector<8x128xf32>,
    %c48 = arith.constant 48 : index
    %c0_64 = arith.constant 0 : index
    %189 = vector.load %arg9[%c48, %c0_64] : memref<64x512xf32, #tpu.memory_space<vmem>>, vector<8x512xf32>
    %c0_65 = arith.constant 0 : index
    %c0_66 = arith.constant 0 : index
    %190 = vector.load %arg2[%c0_65, %c0_66] : memref<128x512xf32, #tpu.memory_space<vmem>>, vector<128x512xf32>
    %cst_67 = arith.constant dense<0.000000e+00> : vector<8x512xf32>
    %191 = tpu.matmul %187, %190, %cst_67 {dimension_numbers = #tpu.dot_dimension_numbers<[1], [0], [0], [1], [0, 0, 1, 1], [], []>} : vector<8x128xf32>, vector<128x512xf32>, vector<8x512xf32> -> vector<8x512xf32>
    %192 = arith.addf %189, %191 : vector<8x512xf32>
    %193 = vector.extract_strided_slice %192 {offsets = [0, 0], sizes = [8, 128], strides = [1, 1]} : vector<8x512xf32> to vector<8x128xf32>
    %194 = arith.negf %193 : vector<8x128xf32>
    %195 = math.exp %194 : vector<8x128xf32>
    %cst_68 = arith.constant 1.000000e+00 : f32
    %196 = vector.broadcast %cst_68 : f32 to vector<8x128xf32>
    %197 = arith.addf %196, %195 : vector<8x128xf32>
    %198 = arith.divf %196, %197 : vector<8x128xf32>
    %199 = vector.extract_strided_slice %192 {offsets = [0, 128], sizes = [8, 128], strides = [1, 1]} : vector<8x512xf32> to vector<8x128xf32>
    %200 = arith.negf %199 : vector<8x128xf32>
    %201 = math.exp %200 : vector<8x128xf32>
    %cst_69 = arith.constant 1.000000e+00 : f32
    %202 = vector.broadcast %cst_69 : f32 to vector<8x128xf32>
    %203 = arith.addf %202, %201 : vector<8x128xf32>
    %204 = arith.divf %202, %203 : vector<8x128xf32>
    %205 = vector.extract_strided_slice %192 {offsets = [0, 256], sizes = [8, 128], strides = [1, 1]} : vector<8x512xf32> to vector<8x128xf32>
    %206 = math.tanh %205 : vector<8x128xf32>
    %207 = vector.extract_strided_slice %192 {offsets = [0, 384], sizes = [8, 128], strides = [1, 1]} : vector<8x512xf32> to vector<8x128xf32>
    %208 = arith.negf %207 : vector<8x128xf32>
    %209 = math.exp %208 : vector<8x128xf32>
    %cst_70 = arith.constant 1.000000e+00 : f32
    %210 = vector.broadcast %cst_70 : f32 to vector<8x128xf32>
    %211 = arith.addf %210, %209 : vector<8x128xf32>
    %212 = arith.divf %210, %211 : vector<8x128xf32>
    %213 = arith.mulf %204, %185 : vector<8x128xf32>
    %214 = arith.mulf %198, %206 : vector<8x128xf32>
    %215 = arith.addf %213, %214 : vector<8x128xf32>
    %216 = math.tanh %215 : vector<8x128xf32>
    %217 = arith.mulf %212, %216 : vector<8x128xf32>
    %c48_71 = arith.constant 48 : index
    %c0_72 = arith.constant 0 : index
    %218 = vector.load %arg10[%c48_71, %c0_72] : memref<64x128xf32, #tpu.memory_space<vmem>>, vector<8x128xf32>
    tpu.vector_store %arg10[%c48_71, %c0_72], %217 {strides = array<i32>} : memref<64x128xf32, #tpu.memory_space<vmem>>, vector<8x128xf32>,
    %c56 = arith.constant 56 : index
    %c0_73 = arith.constant 0 : index
    %219 = vector.load %arg9[%c56, %c0_73] : memref<64x512xf32, #tpu.memory_space<vmem>>, vector<8x512xf32>
    %c0_74 = arith.constant 0 : index
    %c0_75 = arith.constant 0 : index
    %220 = vector.load %arg2[%c0_74, %c0_75] : memref<128x512xf32, #tpu.memory_space<vmem>>, vector<128x512xf32>
    %cst_76 = arith.constant dense<0.000000e+00> : vector<8x512xf32>
    %221 = tpu.matmul %217, %220, %cst_76 {dimension_numbers = #tpu.dot_dimension_numbers<[1], [0], [0], [1], [0, 0, 1, 1], [], []>} : vector<8x128xf32>, vector<128x512xf32>, vector<8x512xf32> -> vector<8x512xf32>
    %222 = arith.addf %219, %221 : vector<8x512xf32>
    %223 = vector.extract_strided_slice %222 {offsets = [0, 0], sizes = [8, 128], strides = [1, 1]} : vector<8x512xf32> to vector<8x128xf32>
    %224 = arith.negf %223 : vector<8x128xf32>
    %225 = math.exp %224 : vector<8x128xf32>
    %cst_77 = arith.constant 1.000000e+00 : f32
    %226 = vector.broadcast %cst_77 : f32 to vector<8x128xf32>
    %227 = arith.addf %226, %225 : vector<8x128xf32>
    %228 = arith.divf %226, %227 : vector<8x128xf32>
    %229 = vector.extract_strided_slice %222 {offsets = [0, 128], sizes = [8, 128], strides = [1, 1]} : vector<8x512xf32> to vector<8x128xf32>
    %230 = arith.negf %229 : vector<8x128xf32>
    %231 = math.exp %230 : vector<8x128xf32>
    %cst_78 = arith.constant 1.000000e+00 : f32
    %232 = vector.broadcast %cst_78 : f32 to vector<8x128xf32>
    %233 = arith.addf %232, %231 : vector<8x128xf32>
    %234 = arith.divf %232, %233 : vector<8x128xf32>
    %235 = vector.extract_strided_slice %222 {offsets = [0, 256], sizes = [8, 128], strides = [1, 1]} : vector<8x512xf32> to vector<8x128xf32>
    %236 = math.tanh %235 : vector<8x128xf32>
    %237 = vector.extract_strided_slice %222 {offsets = [0, 384], sizes = [8, 128], strides = [1, 1]} : vector<8x512xf32> to vector<8x128xf32>
    %238 = arith.negf %237 : vector<8x128xf32>
    %239 = math.exp %238 : vector<8x128xf32>
    %cst_79 = arith.constant 1.000000e+00 : f32
    %240 = vector.broadcast %cst_79 : f32 to vector<8x128xf32>
    %241 = arith.addf %240, %239 : vector<8x128xf32>
    %242 = arith.divf %240, %241 : vector<8x128xf32>
    %243 = arith.mulf %234, %215 : vector<8x128xf32>
    %244 = arith.mulf %228, %236 : vector<8x128xf32>
    %245 = arith.addf %243, %244 : vector<8x128xf32>
    %246 = math.tanh %245 : vector<8x128xf32>
    %247 = arith.mulf %242, %246 : vector<8x128xf32>
    %c56_80 = arith.constant 56 : index
    %c0_81 = arith.constant 0 : index
    %248 = vector.load %arg10[%c56_80, %c0_81] : memref<64x128xf32, #tpu.memory_space<vmem>>, vector<8x128xf32>
    tpu.vector_store %arg10[%c56_80, %c0_81], %247 {strides = array<i32>} : memref<64x128xf32, #tpu.memory_space<vmem>>, vector<8x128xf32>,
    %c0_82 = arith.constant 0 : index
    %c0_83 = arith.constant 0 : index
    %249 = vector.load %arg10[%c0_82, %c0_83] : memref<64x128xf32, #tpu.memory_space<vmem>>, vector<64x128xf32>
    %c0_84 = arith.constant 0 : index
    %c0_85 = arith.constant 0 : index
    %250 = vector.load %arg4[%c0_84, %c0_85] : memref<128x128xf32, #tpu.memory_space<vmem>>, vector<128x128xf32>
    %cst_86 = arith.constant dense<0.000000e+00> : vector<64x128xf32>
    %251 = tpu.matmul %249, %250, %cst_86 {dimension_numbers = #tpu.dot_dimension_numbers<[1], [0], [0], [1], [0, 0, 1, 1], [], []>} : vector<64x128xf32>, vector<128x128xf32>, vector<64x128xf32> -> vector<64x128xf32>
    %c0_87 = arith.constant 0 : index
    %c0_88 = arith.constant 0 : index
    %252 = vector.load %arg6[%c0_87, %c0_88] : memref<1x128xf32, #tpu.memory_space<vmem>>, vector<1x128xf32>
    %253 = vector.broadcast %252 : vector<1x128xf32> to vector<64x128xf32>
    %254 = arith.addf %251, %253 : vector<64x128xf32>
    %c0_89 = arith.constant 0 : index
    %c0_90 = arith.constant 0 : index
    %255 = vector.load %arg11[%c0_89, %c0_90] : memref<64x128xf32, #tpu.memory_space<vmem>>, vector<64x128xf32>
    tpu.vector_store %arg11[%c0_89, %c0_90], %254 {strides = array<i32>} : memref<64x128xf32, #tpu.memory_space<vmem>>, vector<64x128xf32>,
    %c0_91 = arith.constant 0 : index
    %c0_92 = arith.constant 0 : index
    %256 = vector.load %arg7[%c0_91, %c0_92] : memref<8x1xi32, #tpu.memory_space<vmem>>, vector<8x1xi32>
    %cst_93 = arith.constant 0.000000e+00 : f32
    %257 = vector.broadcast %cst_93 : f32 to vector<8x128xf32>
    %cst_94 = arith.constant 0.000000e+00 : f32
    %258 = vector.broadcast %cst_94 : f32 to vector<8x128xf32>
    %c0_95 = arith.constant 0 : index
    %c0_96 = arith.constant 0 : index
    %259 = vector.load %arg11[%c0_95, %c0_96] : memref<64x128xf32, #tpu.memory_space<vmem>>, vector<8x128xf32>
    %c0_97 = arith.constant 0 : index
    %c0_98 = arith.constant 0 : index
    %260 = vector.load %arg5[%c0_97, %c0_98] : memref<128x128xf32, #tpu.memory_space<vmem>>, vector<128x128xf32>
    %cst_99 = arith.constant dense<0.000000e+00> : vector<8x128xf32>
    %261 = tpu.matmul %257, %260, %cst_99 {dimension_numbers = #tpu.dot_dimension_numbers<[1], [0], [0], [1], [0, 0, 1, 1], [], []>} : vector<8x128xf32>, vector<128x128xf32>, vector<8x128xf32> -> vector<8x128xf32>
    %262 = arith.addf %259, %261 : vector<8x128xf32>
    %263 = math.tanh %262 : vector<8x128xf32>
    %c1_i32 = arith.constant 1 : i32
    %264 = vector.broadcast %c1_i32 : i32 to vector<8x1xi32>
    %265 = arith.cmpi eq, %256, %264 : vector<8x1xi32>
    %266 = vector.shape_cast %265 : vector<8x1xi1> to vector<8x1xi1>
    %267 = vector.broadcast %266 : vector<8x1xi1> to vector<8x128xi1>
    %268 = arith.select %267, %263, %258 : vector<8x128xi1>, vector<8x128xf32>
    %c8_100 = arith.constant 8 : index
    %c0_101 = arith.constant 0 : index
    %269 = vector.load %arg11[%c8_100, %c0_101] : memref<64x128xf32, #tpu.memory_space<vmem>>, vector<8x128xf32>
    %c0_102 = arith.constant 0 : index
    %c0_103 = arith.constant 0 : index
    %270 = vector.load %arg5[%c0_102, %c0_103] : memref<128x128xf32, #tpu.memory_space<vmem>>, vector<128x128xf32>
    %cst_104 = arith.constant dense<0.000000e+00> : vector<8x128xf32>
    %271 = tpu.matmul %263, %270, %cst_104 {dimension_numbers = #tpu.dot_dimension_numbers<[1], [0], [0], [1], [0, 0, 1, 1], [], []>} : vector<8x128xf32>, vector<128x128xf32>, vector<8x128xf32> -> vector<8x128xf32>
    %272 = arith.addf %269, %271 : vector<8x128xf32>
    %273 = math.tanh %272 : vector<8x128xf32>
    %c2_i32 = arith.constant 2 : i32
    %274 = vector.broadcast %c2_i32 : i32 to vector<8x1xi32>
    %275 = arith.cmpi eq, %256, %274 : vector<8x1xi32>
    %276 = vector.shape_cast %275 : vector<8x1xi1> to vector<8x1xi1>
    %277 = vector.broadcast %276 : vector<8x1xi1> to vector<8x128xi1>
    %278 = arith.select %277, %273, %268 : vector<8x128xi1>, vector<8x128xf32>
    %c16_105 = arith.constant 16 : index
    %c0_106 = arith.constant 0 : index
    %279 = vector.load %arg11[%c16_105, %c0_106] : memref<64x128xf32, #tpu.memory_space<vmem>>, vector<8x128xf32>
    %c0_107 = arith.constant 0 : index
    %c0_108 = arith.constant 0 : index
    %280 = vector.load %arg5[%c0_107, %c0_108] : memref<128x128xf32, #tpu.memory_space<vmem>>, vector<128x128xf32>
    %cst_109 = arith.constant dense<0.000000e+00> : vector<8x128xf32>
    %281 = tpu.matmul %273, %280, %cst_109 {dimension_numbers = #tpu.dot_dimension_numbers<[1], [0], [0], [1], [0, 0, 1, 1], [], []>} : vector<8x128xf32>, vector<128x128xf32>, vector<8x128xf32> -> vector<8x128xf32>
    %282 = arith.addf %279, %281 : vector<8x128xf32>
    %283 = math.tanh %282 : vector<8x128xf32>
    %c3_i32 = arith.constant 3 : i32
    %284 = vector.broadcast %c3_i32 : i32 to vector<8x1xi32>
    %285 = arith.cmpi eq, %256, %284 : vector<8x1xi32>
    %286 = vector.shape_cast %285 : vector<8x1xi1> to vector<8x1xi1>
    %287 = vector.broadcast %286 : vector<8x1xi1> to vector<8x128xi1>
    %288 = arith.select %287, %283, %278 : vector<8x128xi1>, vector<8x128xf32>
    %c24_110 = arith.constant 24 : index
    %c0_111 = arith.constant 0 : index
    %289 = vector.load %arg11[%c24_110, %c0_111] : memref<64x128xf32, #tpu.memory_space<vmem>>, vector<8x128xf32>
    %c0_112 = arith.constant 0 : index
    %c0_113 = arith.constant 0 : index
    %290 = vector.load %arg5[%c0_112, %c0_113] : memref<128x128xf32, #tpu.memory_space<vmem>>, vector<128x128xf32>
    %cst_114 = arith.constant dense<0.000000e+00> : vector<8x128xf32>
    %291 = tpu.matmul %283, %290, %cst_114 {dimension_numbers = #tpu.dot_dimension_numbers<[1], [0], [0], [1], [0, 0, 1, 1], [], []>} : vector<8x128xf32>, vector<128x128xf32>, vector<8x128xf32> -> vector<8x128xf32>
    %292 = arith.addf %289, %291 : vector<8x128xf32>
    %293 = math.tanh %292 : vector<8x128xf32>
    %c4_i32 = arith.constant 4 : i32
    %294 = vector.broadcast %c4_i32 : i32 to vector<8x1xi32>
    %295 = arith.cmpi eq, %256, %294 : vector<8x1xi32>
    %296 = vector.shape_cast %295 : vector<8x1xi1> to vector<8x1xi1>
    %297 = vector.broadcast %296 : vector<8x1xi1> to vector<8x128xi1>
    %298 = arith.select %297, %293, %288 : vector<8x128xi1>, vector<8x128xf32>
    %c32_115 = arith.constant 32 : index
    %c0_116 = arith.constant 0 : index
    %299 = vector.load %arg11[%c32_115, %c0_116] : memref<64x128xf32, #tpu.memory_space<vmem>>, vector<8x128xf32>
    %c0_117 = arith.constant 0 : index
    %c0_118 = arith.constant 0 : index
    %300 = vector.load %arg5[%c0_117, %c0_118] : memref<128x128xf32, #tpu.memory_space<vmem>>, vector<128x128xf32>
    %cst_119 = arith.constant dense<0.000000e+00> : vector<8x128xf32>
    %301 = tpu.matmul %293, %300, %cst_119 {dimension_numbers = #tpu.dot_dimension_numbers<[1], [0], [0], [1], [0, 0, 1, 1], [], []>} : vector<8x128xf32>, vector<128x128xf32>, vector<8x128xf32> -> vector<8x128xf32>
    %302 = arith.addf %299, %301 : vector<8x128xf32>
    %303 = math.tanh %302 : vector<8x128xf32>
    %c5_i32 = arith.constant 5 : i32
    %304 = vector.broadcast %c5_i32 : i32 to vector<8x1xi32>
    %305 = arith.cmpi eq, %256, %304 : vector<8x1xi32>
    %306 = vector.shape_cast %305 : vector<8x1xi1> to vector<8x1xi1>
    %307 = vector.broadcast %306 : vector<8x1xi1> to vector<8x128xi1>
    %308 = arith.select %307, %303, %298 : vector<8x128xi1>, vector<8x128xf32>
    %c40_120 = arith.constant 40 : index
    %c0_121 = arith.constant 0 : index
    %309 = vector.load %arg11[%c40_120, %c0_121] : memref<64x128xf32, #tpu.memory_space<vmem>>, vector<8x128xf32>
    %c0_122 = arith.constant 0 : index
    %c0_123 = arith.constant 0 : index
    %310 = vector.load %arg5[%c0_122, %c0_123] : memref<128x128xf32, #tpu.memory_space<vmem>>, vector<128x128xf32>
    %cst_124 = arith.constant dense<0.000000e+00> : vector<8x128xf32>
    %311 = tpu.matmul %303, %310, %cst_124 {dimension_numbers = #tpu.dot_dimension_numbers<[1], [0], [0], [1], [0, 0, 1, 1], [], []>} : vector<8x128xf32>, vector<128x128xf32>, vector<8x128xf32> -> vector<8x128xf32>
    %312 = arith.addf %309, %311 : vector<8x128xf32>
    %313 = math.tanh %312 : vector<8x128xf32>
    %c6_i32 = arith.constant 6 : i32
    %314 = vector.broadcast %c6_i32 : i32 to vector<8x1xi32>
    %315 = arith.cmpi eq, %256, %314 : vector<8x1xi32>
    %316 = vector.shape_cast %315 : vector<8x1xi1> to vector<8x1xi1>
    %317 = vector.broadcast %316 : vector<8x1xi1> to vector<8x128xi1>
    %318 = arith.select %317, %313, %308 : vector<8x128xi1>, vector<8x128xf32>
    %c48_125 = arith.constant 48 : index
    %c0_126 = arith.constant 0 : index
    %319 = vector.load %arg11[%c48_125, %c0_126] : memref<64x128xf32, #tpu.memory_space<vmem>>, vector<8x128xf32>
    %c0_127 = arith.constant 0 : index
    %c0_128 = arith.constant 0 : index
    %320 = vector.load %arg5[%c0_127, %c0_128] : memref<128x128xf32, #tpu.memory_space<vmem>>, vector<128x128xf32>
    %cst_129 = arith.constant dense<0.000000e+00> : vector<8x128xf32>
    %321 = tpu.matmul %313, %320, %cst_129 {dimension_numbers = #tpu.dot_dimension_numbers<[1], [0], [0], [1], [0, 0, 1, 1], [], []>} : vector<8x128xf32>, vector<128x128xf32>, vector<8x128xf32> -> vector<8x128xf32>
    %322 = arith.addf %319, %321 : vector<8x128xf32>
    %323 = math.tanh %322 : vector<8x128xf32>
    %c7_i32 = arith.constant 7 : i32
    %324 = vector.broadcast %c7_i32 : i32 to vector<8x1xi32>
    %325 = arith.cmpi eq, %256, %324 : vector<8x1xi32>
    %326 = vector.shape_cast %325 : vector<8x1xi1> to vector<8x1xi1>
    %327 = vector.broadcast %326 : vector<8x1xi1> to vector<8x128xi1>
    %328 = arith.select %327, %323, %318 : vector<8x128xi1>, vector<8x128xf32>
    %c56_130 = arith.constant 56 : index
    %c0_131 = arith.constant 0 : index
    %329 = vector.load %arg11[%c56_130, %c0_131] : memref<64x128xf32, #tpu.memory_space<vmem>>, vector<8x128xf32>
    %c0_132 = arith.constant 0 : index
    %c0_133 = arith.constant 0 : index
    %330 = vector.load %arg5[%c0_132, %c0_133] : memref<128x128xf32, #tpu.memory_space<vmem>>, vector<128x128xf32>
    %cst_134 = arith.constant dense<0.000000e+00> : vector<8x128xf32>
    %331 = tpu.matmul %323, %330, %cst_134 {dimension_numbers = #tpu.dot_dimension_numbers<[1], [0], [0], [1], [0, 0, 1, 1], [], []>} : vector<8x128xf32>, vector<128x128xf32>, vector<8x128xf32> -> vector<8x128xf32>
    %332 = arith.addf %329, %331 : vector<8x128xf32>
    %333 = math.tanh %332 : vector<8x128xf32>
    %c8_i32 = arith.constant 8 : i32
    %334 = vector.broadcast %c8_i32 : i32 to vector<8x1xi32>
    %335 = arith.cmpi eq, %256, %334 : vector<8x1xi32>
    %336 = vector.shape_cast %335 : vector<8x1xi1> to vector<8x1xi1>
    %337 = vector.broadcast %336 : vector<8x1xi1> to vector<8x128xi1>
    %338 = arith.select %337, %333, %328 : vector<8x128xi1>, vector<8x128xf32>
    %339 = arith.negf %338 : vector<8x128xf32>
    %340 = math.exp %339 : vector<8x128xf32>
    %cst_135 = arith.constant 1.000000e+00 : f32
    %341 = vector.broadcast %cst_135 : f32 to vector<8x128xf32>
    %342 = arith.addf %341, %340 : vector<8x128xf32>
    %343 = arith.divf %341, %342 : vector<8x128xf32>
    %c0_136 = arith.constant 0 : index
    %c0_137 = arith.constant 0 : index
    %344 = vector.load %arg8[%c0_136, %c0_137] : memref<8x128xf32, #tpu.memory_space<vmem>>, vector<8x128xf32>
    tpu.vector_store %arg8[%c0_136, %c0_137], %343 {strides = array<i32>} : memref<8x128xf32, #tpu.memory_space<vmem>>, vector<8x128xf32>,
    return
  }
}

</mosaic_0001>

<bundles_post_ra>
// kernel: lstm_multihead_forward.1
= control target key start
LH: loop header
LB: loop body
LE: loop exit
PB: predicated region body
PF: predicated region fallthrough
CT: control target
= control target key end

     0   :  { %13 = vsyncpa [#allocation6], 0  ;;  %s4296_s0 = inlined_call_operand.vmem [shape: f32[64,32], index: 0, kind: input, shape index: {}]   ;;  %s4297_s1 = inlined_call_operand.vmem [shape: f32[32,512], index: 1, kind: input, shape index: {}]   ;;  %s4298_s2 = inlined_call_operand.hbm [shape: f32[128,512], index: 2, kind: input, shape index: {}]   ;;  %s4299_s3 = inlined_call_operand.vmem [shape: f32[1,512], index: 3, kind: input, shape index: {}]   ;;  %s4300_s4 = inlined_call_operand.hbm [shape: f32[128,128], index: 4, kind: input, shape index: {}]   ;;  %s4301_s5 = inlined_call_operand.hbm [shape: f32[128,128], index: 5, kind: input, shape index: {}]   ;;  %s4302_s6 = inlined_call_operand.vmem [shape: f32[1,128], index: 6, kind: input, shape index: {}]   ;;  %s4303_s7 = inlined_call_operand.vmem [shape: s32[8,1], index: 7, kind: input, shape index: {}]   ;;  %s4304_s8 = inlined_call_operand.vmem [shape: f32[8,128], index: 8, kind: output, shape index: {}]  }
   0x1   :  { %14 = vsyncpa [#allocation8], 0  ;;  %s38_s29 = sshll.u32 %s4300_s4, 4  ;;  %s2721_s30 = smov [#allocation7]   ;;  %s39_s29 = int_to_ptr.hbm [resolvable:$true] %s38_s29 }
   0x2   :  { %s40_s9 = sshll.u32 %s2721_s30, 4  ;;  %s23_s12 = sshll.u32 %s4298_s2, 4  ;;  %s41_s9 = int_to_ptr.vmem [resolvable:$true] %s40_s9  ;;  %s24_s12 = int_to_ptr.hbm [resolvable:$true] %s23_s12 }
   0x3   :  { %s2722_s13 = smov 128   ;;  %s2723_s14 = smov 8  }
   0x4   :  { %46 = dma.hbm_to_vmem [thread:$0]  %s39_s29, 2048, %s41_s9, [#allocation8], %s2722_s13, %s2722_s13, %s2723_s14  }
   0x5   :  { %s2724_s15 = smov [#allocation5]   ;;  %s2725_s17 = smov 512  }
   0x6   :  { %s25_s16 = sshll.u32 %s2724_s15, 4  ;;  %s2726_s18 = smov 32   ;;  %s26_s16 = int_to_ptr.vmem [resolvable:$true] %s25_s16 }
   0x7   :  { %31 = dma.hbm_to_vmem [thread:$0]  %s24_s12, 8192, %s26_s16, [#allocation6], %s2725_s17, %s2725_s17, %s2726_s18  }
   0x8   :  { %s51_s20 = sshll.u32 %s4301_s5, 4  ;;  %s2727_s21 = smov [#allocation9]   ;;  %s52_s20 = int_to_ptr.hbm [resolvable:$true] %s51_s20 }
   0x9   :  { %s53_s22 = sshll.u32 %s2727_s21, 4  ;;  %s54_s22 = int_to_ptr.vmem [resolvable:$true] %s53_s22 }
   0xa   :  { %59 = dma.hbm_to_vmem [thread:$0]  %s52_s20, 2048, %s54_s22, [#allocation8], %s2722_s13, %s2722_s13, %s2723_s14  }
   0xb   :  { %2717 = dma.done.wait [#allocation6], 8192  }
   0xc   :  { %2718 = vsyncadd [#allocation6], 4294959104 }
   0xd   :  { %2719 = dma.done.wait [#allocation8], 4096  }
   0xe   :  { %2720 = vsyncadd [#allocation8], 4294963200  ;;  %v96_v0 = vld [vmem:[%s4297_s1 + $0x60] sm:$0xff]  ;;  %v97_v1 = vld [vmem:[%s4297_s1 + $0x68] sm:$0xff]  ;;  %vm110_vm0 = vcmask 261120  }
   0xf   :  { %v92_v2 = vld [vmem:[%s4297_s1 + $0x40] sm:$0xff]  ;;  %147 = vmatpush.msra.mxu0 %v96_v0  ;;  %2476 = vmatpush.msra.mxu2 %v96_v0  ;;  %v93_v3 = vld [vmem:[%s4297_s1 + $0x48] sm:$0xff]  ;;  %v2816_v9 = vld [vmem:[%s4296_s0 + $0x30] sm:$0xff] }
  0x10   :  { %188 = vmatpush.msra.mxu1 %v97_v1  ;;  %2480 = vmatpush.msra.mxu3 %v97_v1  ;;  %v88_v4 = vld [vmem:[%s4297_s1 + $0x20] sm:$0xff]  ;;  %v89_v5 = vld [vmem:[%s4297_s1 + $0x28] sm:$0xff]  ;;  %v99_v10 = vld [vmem:[%s4297_s1 + $0x78] sm:$0xff] }
  0x11   :  { %148 = vmatpush.msra.mxu0 %v92_v2  ;;  %2477 = vmatpush.msra.mxu2 %v92_v2  ;;  %v84_v6 = vld [vmem:[%s4297_s1] sm:$0xff]  ;;  %v85_v7 = vld [vmem:[%s4297_s1 + $0x8] sm:$0xff]  ;;  %v98_v11 = vld [vmem:[%s4297_s1 + $0x70] sm:$0xff] }
  0x12   :  { %189 = vmatpush.msra.mxu1 %v93_v3  ;;  %2481 = vmatpush.msra.mxu3 %v93_v3  ;;  %v2811_v8 = vld [vmem:[%s4296_s0] sm:$0xff]  ;;  %v2830_v13 = vld [vmem:[#allocation5 + $0x1e8] sm:$0xff]  ;;  %v95_v14 = vld [vmem:[%s4297_s1 + $0x58] sm:$0xff] }
  0x13   :  { %149 = vmatpush.msra.mxu0 %v88_v4  ;;  %2478 = vmatpush.msra.mxu2 %v88_v4  ;;  %v2828_v12 = vld [vmem:[#allocation5 + $0x1e0] sm:$0xff]  ;;  %v94_v15 = vld [vmem:[%s4297_s1 + $0x50] sm:$0xff]  ;;  %v2844_v17 = vld [vmem:[#allocation5 + $0x1c8] sm:$0xff] }
  0x14   :  { %190 = vmatpush.msra.mxu1 %v89_v5  ;;  %2482 = vmatpush.msra.mxu3 %v89_v5  ;;  %4352 = vst [vmem:[#allocation12_spill] sm:$0xff] %v2828_v12  ;;  %v2842_v16 = vld [vmem:[#allocation5 + $0x1c0] sm:$0xff]  ;;  %v91_v18 = vld [vmem:[%s4297_s1 + $0x38] sm:$0xff]  ;;  %v90_v19 = vld [vmem:[%s4297_s1 + $0x30] sm:$0xff] }
  0x15   :  { %150 = vmatpush.msra.mxu0 %v84_v6  ;;  %2479 = vmatpush.msra.mxu2 %v84_v6  ;;  %4353 = vst [vmem:[#allocation13_spill] sm:$0xff] %v2842_v16  ;;  %v2854_v20 = vld [vmem:[#allocation5 + $0x1a0] sm:$0xff]  ;;  %v2856_v21 = vld [vmem:[#allocation5 + $0x1a8] sm:$0xff]  ;;  %v2866_v23 = vld [vmem:[%s4296_s0 + $0x38] sm:$0xff] }
  0x16   :  { %191 = vmatpush.msra.mxu1 %v85_v7  ;;  %2483 = vmatpush.msra.mxu3 %v85_v7  ;;  %v2861_v22 = vld [vmem:[%s4296_s0 + $0x8] sm:$0xff]  ;;  %v87_v24 = vld [vmem:[%s4297_s1 + $0x18] sm:$0xff]  ;;  %v86_v25 = vld [vmem:[%s4297_s1 + $0x10] sm:$0xff] }
  0x17   :  { %2419 = vmatmul.msk.f32.vlgmr.msra.gmra.mxu0 %vm110_vm0, %v2811_v8  ;;  %2425 = vmatmul.msk.f32.vlgmr.msra.gmra.mxu2 %vm110_vm0, %v2816_v9  ;;  %v2882_v26 = vld [vmem:[#allocation5 + $0x1f8] sm:$0xff]  ;;  %v2884_v27 = vld [vmem:[#allocation5 + $0x180] sm:$0xff]  ;;  %v2890_v28 = vld [vmem:[#allocation5 + $0x188] sm:$0xff] }
  0x18   :  { %2427 = vmatmul.msk.f32.vlgmr.msra.gmra.mxu1 %vm110_vm0, %v2811_v8  ;;  %2433 = vmatmul.msk.f32.vlgmr.msra.gmra.mxu3 %vm110_vm0, %v2816_v9  ;;  %v2892_v29 = vld [vmem:[#allocation5 + $0x1f0] sm:$0xff]  ;;  %v2894_v30 = vld [vmem:[#allocation5 + $0x1d8] sm:$0xff]  ;;  %v2896_v31 = vld [vmem:[#allocation5 + $0x160] sm:$0xff] }
  0x19   :  { %270 = vmatpush.msrb.mxu3 %v99_v10  ;;  %229 = vmatpush.msrb.mxu2 %v98_v11  ;;  %v2900_v32 = vld [vmem:[#allocation5 + $0x168] sm:$0xff]  ;;  %v2902_v33 = vld [vmem:[#allocation5 + $0x1d0] sm:$0xff]  ;;  %v2905_v34 = vld [vmem:[#allocation5 + $0x1b8] sm:$0xff] }
  0x1a   :  { %399 = vmatpush.msrb.mxu0 %v2828_v12  ;;  %419 = vmatpush.msrb.mxu1 %v2830_v13  ;;  %v2908_v35 = vld [vmem:[#allocation5 + $0x140] sm:$0xff]  ;;  %v2913_v36 = vld [vmem:[%s4296_s0 + $0x10] sm:$0xff]  ;;  %v2921_v37 = vld [vmem:[#allocation5 + $0x148] sm:$0xff] }
  0x1b   :  { %271 = vmatpush.msrb.mxu3 %v95_v14  ;;  %230 = vmatpush.msrb.mxu2 %v94_v15  ;;  %v2923_v38 = vld [vmem:[#allocation5 + $0x198] sm:$0xff]  ;;  %v2929_v39 = vld [vmem:[#allocation5 + $0x120] sm:$0xff]  ;;  %v2931_v40 = vld [vmem:[#allocation5 + $0x1b0] sm:$0xff] }
  0x1c   :  { %400 = vmatpush.msrb.mxu0 %v2842_v16  ;;  %420 = vmatpush.msrb.mxu1 %v2844_v17  ;;  %v2937_v41 = vld [vmem:[#allocation5 + $0x128] sm:$0xff]  ;;  %v2939_v42 = vld [vmem:[#allocation5 + $0x178] sm:$0xff]  ;;  %v2943_v43 = vld [vmem:[#allocation5 + $0x100] sm:$0xff] }
  0x1d   :  { %272 = vmatpush.msrb.mxu3 %v91_v18  ;;  %231 = vmatpush.msrb.mxu2 %v90_v19  ;;  %v2945_v44 = vld [vmem:[#allocation5 + $0x190] sm:$0xff]  ;;  %v2948_v45 = vld [vmem:[#allocation5 + $0x108] sm:$0xff]  ;;  %v2951_v46 = vld [vmem:[#allocation5 + $0x158] sm:$0xff] }
  0x1e   :  { %401 = vmatpush.msrb.mxu0 %v2854_v20  ;;  %421 = vmatpush.msrb.mxu1 %v2856_v21  ;;  %v2955_v47 = vld [vmem:[#allocation5 + $0xe0] sm:$0xff]  ;;  %v2957_v48 = vld [vmem:[#allocation5 + $0x170] sm:$0xff]  ;;  %v2962_v49 = vld [vmem:[%s4296_s0 + $0x18] sm:$0xff] }
  0x1f   :  { %2420 = vmatmul.msk.f32.gmra.mxu0 %vm110_vm0, %v2861_v22  ;;  %2426 = vmatmul.msk.f32.gmra.mxu2 %vm110_vm0, %v2866_v23  ;;  %v2969_v50 = vld [vmem:[#allocation5 + $0xe8] sm:$0xff]  ;;  %v2971_v51 = vld [vmem:[#allocation5 + $0xc0] sm:$0xff]  ;;  %v2978_v52 = vld [vmem:[#allocation5 + $0x138] sm:$0xff] }
  0x20   :  { %2428 = vmatmul.msk.f32.gmra.mxu1 %vm110_vm0, %v2861_v22  ;;  %2434 = vmatmul.msk.f32.gmra.mxu3 %vm110_vm0, %v2866_v23  ;;  %v2980_v53 = vld [vmem:[#allocation5 + $0x150] sm:$0xff]  ;;  %v2986_v54 = vld [vmem:[#allocation5 + $0xc8] sm:$0xff]  ;;  %v2988_v55 = vld [vmem:[#allocation5 + $0xa0] sm:$0xff] }
  0x21   :  { %273 = vmatpush.msrb.mxu3 %v87_v24  ;;  %232 = vmatpush.msrb.mxu2 %v86_v25  ;;  %v2992_v56 = vld [vmem:[#allocation5 + $0x118] sm:$0xff]  ;;  %v2994_v57 = vld [vmem:[#allocation5 + $0x130] sm:$0xff]  ;;  %v2996_v58 = vld [vmem:[#allocation5 + $0xa8] sm:$0xff] }
  0x22   :  { %402 = vmatpush.msrb.mxu0 %v2884_v27  ;;  %422 = vmatpush.msrb.mxu1 %v2890_v28  ;;  %v2998_v59 = vld [vmem:[#allocation5 + $0x80] sm:$0xff]  ;;  %v3004_v60 = vld [vmem:[#allocation5 + $0xf8] sm:$0xff]  ;;  %v3006_v61 = vld [vmem:[#allocation5 + $0x110] sm:$0xff] }
  0x23   :  { %459 = vmatpush.msra.mxu3 %v2882_v26  ;;  %439 = vmatpush.msra.mxu2 %v2892_v29  ;;  %v3011_v62 = vld [vmem:[%s4296_s0 + $0x20] sm:$0xff]  ;;  %v3017_v63 = vld [vmem:[#allocation5 + $0x88] sm:$0xff]  ;;  %v3027_v1 = vld [vmem:[#allocation5 + $0xd8] sm:$0xff] }
  0x24   :  { %403 = vmatpush.msrb.mxu0 %v2896_v31  ;;  %423 = vmatpush.msrb.mxu1 %v2900_v32  ;;  %v3019_v0 = vld [vmem:[#allocation5 + $0x60] sm:$0xff]  ;;  %v3029_v2 = vld [vmem:[#allocation5 + $0xf0] sm:$0xff]  ;;  %v3035_v3 = vld [vmem:[#allocation5 + $0x68] sm:$0xff] }
  0x25   :  { %460 = vmatpush.msra.mxu3 %v2894_v30  ;;  %440 = vmatpush.msra.mxu2 %v2902_v33  ;;  %v3037_v4 = vld [vmem:[#allocation5 + $0x40] sm:$0xff]  ;;  %v3041_v5 = vld [vmem:[#allocation5 + $0xb8] sm:$0xff]  ;;  %v3043_v6 = vld [vmem:[#allocation5 + $0xd0] sm:$0xff] }
  0x26   :  { %404 = vmatpush.msrb.mxu0 %v2908_v35  ;;  %424 = vmatpush.msrb.mxu1 %v2921_v37  ;;  %v3045_v7 = vld [vmem:[#allocation5 + $0x48] sm:$0xff]  ;;  %v3053_v10 = vld [vmem:[#allocation5 + $0x98] sm:$0xff]  ;;  %v3055_v11 = vld [vmem:[#allocation5 + $0xb0] sm:$0xff] }
  0x27   :  { %461 = vmatpush.msra.mxu3 %v2905_v34  ;;  %2421 = vmatmul.msk.f32.gmra.mxu0 %vm110_vm0, %v2913_v36  ;;  %4354 = vst [vmem:[#allocation14_spill] sm:$0xff] %v3045_v7  ;;  %v81_v14 = vld [vmem:[%s4296_s0 + $0x28] sm:$0xff]  ;;  %v3066_v18 = vld [vmem:[#allocation5] sm:$0xff]  ;;  %v3073_v19 = vld [vmem:[#allocation5 + $0x78] sm:$0xff] }
  0x28   :  { %2435 = vmatmul.msk.f32.vlgmr.msrb.gmra.mxu2 %vm110_vm0, %v2811_v8  ;;  %2429 = vmatmul.msk.f32.gmra.mxu1 %vm110_vm0, %v2913_v36  ;;  %v3064_v15 = vld [vmem:[#allocation5 + $0x28] sm:$0xff]  ;;  %v3084_v25 = vld [vmem:[#allocation5 + $0x58] sm:$0xff] }
  0x29   :  { %2443 = vmatmul.msk.f32.vlgmr.msrb.gmra.mxu3 %vm110_vm0, %v2811_v8  ;;  %405 = vmatpush.msrb.mxu0 %v2929_v39  ;;  %v3047_v8 = vld [vmem:[#allocation5 + $0x20] sm:$0xff]  ;;  %v3080_v24 = vld [vmem:[#allocation5 + $0x8] sm:$0xff] }
  0x2a   :  { %462 = vmatpush.msra.mxu3 %v2923_v38  ;;  %441 = vmatpush.msra.mxu2 %v2931_v40  ;;  %4355 = vst [vmem:[#allocation15_spill] sm:$0xff] %v3047_v8 }
  0x2b   :  { %425 = vmatpush.msrb.mxu1 %v2937_v41  ;;  %406 = vmatpush.msrb.mxu0 %v2943_v43  ;;  %4356 = vst [vmem:[#allocation16_spill] sm:$0xff] %v3080_v24 }
  0x2c   :  { %463 = vmatpush.msra.mxu3 %v2939_v42  ;;  %442 = vmatpush.msra.mxu2 %v2945_v44 }
  0x2d   :  { %426 = vmatpush.msrb.mxu1 %v2948_v45  ;;  %407 = vmatpush.msrb.mxu0 %v2955_v47 }
  0x2e   :  { %464 = vmatpush.msra.mxu3 %v2951_v46  ;;  %443 = vmatpush.msra.mxu2 %v2957_v48 }
  0x2f   :  { %2422 = vmatmul.msk.f32.gmra.mxu0 %vm110_vm0, %v2962_v49  ;;  %427 = vmatpush.msrb.mxu1 %v2969_v50 }
  0x30   :  { %2436 = vmatmul.msk.f32.gmra.mxu2 %vm110_vm0, %v2861_v22  ;;  %2430 = vmatmul.msk.f32.gmra.mxu1 %vm110_vm0, %v2962_v49 }
  0x31   :  { %2444 = vmatmul.msk.f32.gmra.mxu3 %vm110_vm0, %v2861_v22  ;;  %408 = vmatpush.msrb.mxu0 %v2971_v51  ;;  %v3075_v22 = vld [vmem:[#allocation5 + $0x90] sm:$0xff] }
  0x32   :  { %465 = vmatpush.msra.mxu3 %v2978_v52  ;;  %444 = vmatpush.msra.mxu2 %v2980_v53 }
  0x33   :  { %428 = vmatpush.msrb.mxu1 %v2986_v54  ;;  %409 = vmatpush.msrb.mxu0 %v2988_v55 }
  0x34   :  { %466 = vmatpush.msra.mxu3 %v2992_v56  ;;  %445 = vmatpush.msra.mxu2 %v2994_v57 }
  0x35   :  { %429 = vmatpush.msrb.mxu1 %v2996_v58  ;;  %410 = vmatpush.msrb.mxu0 %v2998_v59 }
  0x36   :  { %467 = vmatpush.msra.mxu3 %v3004_v60  ;;  %446 = vmatpush.msra.mxu2 %v3006_v61 }
  0x37   :  { %2423 = vmatmul.msk.f32.gmra.mxu0 %vm110_vm0, %v3011_v62  ;;  %430 = vmatpush.msrb.mxu1 %v3017_v63 }
  0x38   :  { %2437 = vmatmul.msk.f32.gmra.mxu2 %vm110_vm0, %v2913_v36  ;;  %2431 = vmatmul.msk.f32.gmra.mxu1 %vm110_vm0, %v3011_v62 }
  0x39   :  { %2445 = vmatmul.msk.f32.gmra.mxu3 %vm110_vm0, %v2913_v36  ;;  %411 = vmatpush.msrb.mxu0 %v3019_v0  ;;  %v3086_v36 = vld [vmem:[#allocation5 + $0x70] sm:$0xff] }
  0x3a   :  { %468 = vmatpush.msra.mxu3 %v3027_v1  ;;  %447 = vmatpush.msra.mxu2 %v3029_v2 }
  0x3b   :  { %431 = vmatpush.msrb.mxu1 %v3035_v3  ;;  %412 = vmatpush.msrb.mxu0 %v3037_v4 }
  0x3c   :  { %469 = vmatpush.msra.mxu3 %v3041_v5  ;;  %448 = vmatpush.msra.mxu2 %v3043_v6 }
  0x3d   :  { %432 = vmatpush.msrb.mxu1 %v3045_v7  ;;  %413 = vmatpush.msrb.mxu0 %v3047_v8  ;;  %v3091_v8 = vld [vmem:[#allocation5 + $0x38] sm:$0xff]  ;;  %v3093_v7 = vld [vmem:[#allocation5 + $0x50] sm:$0xff] }
  0x3e   :  { %470 = vmatpush.msra.mxu3 %v3053_v10  ;;  %449 = vmatpush.msra.mxu2 %v3055_v11 }
  0x3f   :  { %2424 = vmatmul.msk.f32.gmra.mxu0 %vm110_vm0, %v81_v14  ;;  %433 = vmatpush.msrb.mxu1 %v3064_v15 }
  0x40   :  { %2438 = vmatmul.msk.f32.gmra.mxu2 %vm110_vm0, %v2962_v49  ;;  %2432 = vmatmul.msk.f32.gmra.mxu1 %vm110_vm0, %v81_v14 }
  0x41   :  { %2446 = vmatmul.msk.f32.gmra.mxu3 %vm110_vm0, %v2962_v49  ;;  %414 = vmatpush.msrb.mxu0 %v3066_v18  ;;  %v3102_v49 = vld [vmem:[#allocation5 + $0x18] sm:$0xff] }
  0x42   :  { %471 = vmatpush.msra.mxu3 %v3073_v19  ;;  %450 = vmatpush.msra.mxu2 %v3075_v22 }
  0x43   :  { %434 = vmatpush.msrb.mxu1 %v3080_v24  ;;  %615 = vmatpush.msra.mxu0 %v2828_v12  ;;  %v3104_v24 = vld [vmem:[#allocation5 + $0x30] sm:$0xff]  ;;  %v4313_v12 = vmov 0.0  }
  0x44   :  { %472 = vmatpush.msra.mxu3 %v3084_v25  ;;  %451 = vmatpush.msra.mxu2 %v3086_v36 }
  0x45   :  { %635 = vmatpush.msra.mxu1 %v2830_v13  ;;  %616 = vmatpush.msra.mxu0 %v2842_v16  ;;  %v3112_v16 = vld [vmem:[#allocation5 + $0x10] sm:$0xff] }
  0x46   :  { %473 = vmatpush.msra.mxu3 %v3091_v8  ;;  %452 = vmatpush.msra.mxu2 %v3093_v7 }
  0x47   :  { %415 = vmatmul.f32.vlgmr.msrb.gmra.mxu0 %v4313_v12  ;;  %636 = vmatpush.msra.mxu1 %v2844_v17 }
  0x48   :  { %2439 = vmatmul.msk.f32.gmra.mxu2 %vm110_vm0, %v3011_v62  ;;  %435 = vmatmul.f32.vlgmr.msrb.gmra.mxu1 %v4313_v12 }
  0x49   :  { %2447 = vmatmul.msk.f32.gmra.mxu3 %vm110_vm0, %v3011_v62  ;;  %453 = vmatpush.msra.mxu2 %v3104_v24  ;;  %v4359_v62 = vld [vmem:[#allocation16_spill] sm:$0xff] }
  0x4a   :  { %474 = vmatpush.msra.mxu3 %v3102_v49  ;;  %617 = vmatpush.msra.mxu0 %v2854_v20 }
  0x4b   :  { %454 = vmatpush.msra.mxu2 %v3112_v16  ;;  %637 = vmatpush.msra.mxu1 %v2856_v21 }
  0x4c   :  { %675 = vmatpush.msrb.mxu3 %v2882_v26  ;;  %618 = vmatpush.msra.mxu0 %v2884_v27 }
  0x4d   :  { %655 = vmatpush.msrb.mxu2 %v2892_v29  ;;  %638 = vmatpush.msra.mxu1 %v2890_v28 }
  0x4e   :  { %676 = vmatpush.msrb.mxu3 %v2894_v30  ;;  %619 = vmatpush.msra.mxu0 %v2896_v31 }
  0x4f   :  { %656 = vmatpush.msrb.mxu2 %v2902_v33  ;;  %639 = vmatpush.msra.mxu1 %v2900_v32 }
  0x50   :  { %677 = vmatpush.msrb.mxu3 %v2905_v34  ;;  %2440 = vmatmul.msk.f32.gmra.mxu2 %vm110_vm0, %v81_v14 }
  0x51   :  { %2448 = vmatmul.msk.f32.gmra.mxu3 %vm110_vm0, %v81_v14  ;;  %657 = vmatpush.msrb.mxu2 %v2931_v40  ;;  %v4360_v14 = vld [vmem:[#allocation12_spill] sm:$0xff] }
  0x52   :  { %678 = vmatpush.msrb.mxu3 %v2923_v38  ;;  %620 = vmatpush.msra.mxu0 %v2908_v35 }
  0x53   :  { %658 = vmatpush.msrb.mxu2 %v2945_v44  ;;  %640 = vmatpush.msra.mxu1 %v2921_v37 }
  0x54   :  { %679 = vmatpush.msrb.mxu3 %v2939_v42  ;;  %621 = vmatpush.msra.mxu0 %v2929_v39 }
  0x55   :  { %659 = vmatpush.msrb.mxu2 %v2957_v48  ;;  %641 = vmatpush.msra.mxu1 %v2937_v41 }
  0x56   :  { %680 = vmatpush.msrb.mxu3 %v2951_v46  ;;  %622 = vmatpush.msra.mxu0 %v2943_v43 }
  0x57   :  { %660 = vmatpush.msrb.mxu2 %v2980_v53  ;;  %642 = vmatpush.msra.mxu1 %v2948_v45 }
  0x58   :  { %2441 = vmatmul.msk.f32.gmra.mxu2 %vm110_vm0, %v2816_v9  ;;  %681 = vmatpush.msrb.mxu3 %v2978_v52 }
  0x59   :  { %2449 = vmatmul.msk.f32.gmra.mxu3 %vm110_vm0, %v2816_v9  ;;  %661 = vmatpush.msrb.mxu2 %v2994_v57  ;;  %v4357_v9 = vld [vmem:[#allocation14_spill] sm:$0xff] }
  0x5a   :  { %682 = vmatpush.msrb.mxu3 %v2992_v56  ;;  %623 = vmatpush.msra.mxu0 %v2955_v47 }
  0x5b   :  { %662 = vmatpush.msrb.mxu2 %v3006_v61  ;;  %643 = vmatpush.msra.mxu1 %v2969_v50 }
  0x5c   :  { %683 = vmatpush.msrb.mxu3 %v3004_v60  ;;  %624 = vmatpush.msra.mxu0 %v2971_v51 }
  0x5d   :  { %663 = vmatpush.msrb.mxu2 %v3029_v2  ;;  %644 = vmatpush.msra.mxu1 %v2986_v54 }
  0x5e   :  { %684 = vmatpush.msrb.mxu3 %v3027_v1  ;;  %625 = vmatpush.msra.mxu0 %v2988_v55 }
  0x5f   :  { %664 = vmatpush.msrb.mxu2 %v3043_v6  ;;  %645 = vmatpush.msra.mxu1 %v2996_v58 }
  0x60   :  { %2442 = vmatmul.msk.f32.gmra.mxu2 %vm110_vm0, %v2866_v23  ;;  %685 = vmatpush.msrb.mxu3 %v3041_v5 }
  0x61   :  { %2450 = vmatmul.msk.f32.gmra.mxu3 %vm110_vm0, %v2866_v23  ;;  %665 = vmatpush.msrb.mxu2 %v3055_v11  ;;  %v4358_v23 = vld [vmem:[#allocation15_spill] sm:$0xff] }
  0x62   :  { %626 = vmatpush.msra.mxu0 %v2998_v59  ;;  %646 = vmatpush.msra.mxu1 %v3017_v63 }
  0x63   :  { %666 = vmatpush.msrb.mxu2 %v3075_v22  ;;  %686 = vmatpush.msrb.mxu3 %v3053_v10 }
  0x64   :  { %627 = vmatpush.msra.mxu0 %v3019_v0  ;;  %647 = vmatpush.msra.mxu1 %v3035_v3 }
  0x65   :  { %667 = vmatpush.msrb.mxu2 %v3086_v36  ;;  %687 = vmatpush.msrb.mxu3 %v3073_v19 }
  0x66   :  { %628 = vmatpush.msra.mxu0 %v3037_v4  ;;  %648 = vmatpush.msra.mxu1 %v4357_v9 }
  0x67   :  { %688 = vmatpush.msrb.mxu3 %v3084_v25  ;;  %668 = vmatpush.msrb.mxu2 %v3093_v7 }
  0x68   :  { %455 = vmatmul.f32.vlgmr.msra.gmra.mxu2 %v4313_v12  ;;  %629 = vmatpush.msra.mxu0 %v4358_v23 }
  0x69   :  { %475 = vmatmul.f32.vlgmr.msra.gmra.mxu3 %v4313_v12  ;;  %649 = vmatpush.msra.mxu1 %v3064_v15  ;;  %v4361_v12 = vld [vmem:[#allocation13_spill] sm:$0xff] }
  0x6a   :  { %669 = vmatpush.msrb.mxu2 %v3104_v24  ;;  %689 = vmatpush.msrb.mxu3 %v3091_v8 }
  0x6b   :  { %630 = vmatpush.msra.mxu0 %v3066_v18  ;;  %650 = vmatpush.msra.mxu1 %v4359_v62 }
  0x6c   :  { %670 = vmatpush.msrb.mxu2 %v3112_v16  ;;  %690 = vmatpush.msrb.mxu3 %v3102_v49 }
  0x6d   :  { %831 = vmatpush.msrb.mxu0 %v4360_v14  ;;  %851 = vmatpush.msrb.mxu1 %v2830_v13  ;;  %v100_v13 = vld [vmem:[%s4299_s3] sm:$0xf] }
  0x6e   :  { %871 = vmatpush.msra.mxu2 %v2892_v29  ;;  %891 = vmatpush.msra.mxu3 %v2882_v26 }
  0x6f   :  { %832 = vmatpush.msrb.mxu0 %v4361_v12  ;;  %852 = vmatpush.msrb.mxu1 %v2844_v17 }
  0x70   :  { %872 = vmatpush.msra.mxu2 %v2902_v33  ;;  %892 = vmatpush.msra.mxu3 %v2894_v30 }
  0x71   :  { %833 = vmatpush.msrb.mxu0 %v2854_v20  ;;  %853 = vmatpush.msrb.mxu1 %v2856_v21  ;;  %v102_v20 = vperm.slane %v100_v13, 0  ;;  %v103_v21 = vperm.slane %v100_v13, 1 }
  0x72   :  { %873 = vmatpush.msra.mxu2 %v2931_v40  ;;  %893 = vmatpush.msra.mxu3 %v2905_v34 }
  0x73   :  { %834 = vmatpush.msrb.mxu0 %v2884_v27  ;;  %854 = vmatpush.msrb.mxu1 %v2890_v28 }
  0x74   :  { %874 = vmatpush.msra.mxu2 %v2945_v44  ;;  %894 = vmatpush.msra.mxu3 %v2923_v38 }
  0x75   :  { %835 = vmatpush.msrb.mxu0 %v2896_v31  ;;  %855 = vmatpush.msrb.mxu1 %v2900_v32 }
  0x76   :  { %875 = vmatpush.msra.mxu2 %v2957_v48  ;;  %895 = vmatpush.msra.mxu3 %v2939_v42  ;;  %v3281_v48 = vperm.slane %v100_v13, 2 }
  0x77   :  { %836 = vmatpush.msrb.mxu0 %v2908_v35  ;;  %856 = vmatpush.msrb.mxu1 %v2921_v37 }
  0x78   :  { %876 = vmatpush.msra.mxu2 %v2980_v53  ;;  %896 = vmatpush.msra.mxu3 %v2951_v46 }
  0x79   :  { %837 = vmatpush.msrb.mxu0 %v2929_v39  ;;  %857 = vmatpush.msrb.mxu1 %v2937_v41 }
  0x7a   :  { %877 = vmatpush.msra.mxu2 %v2994_v57  ;;  %897 = vmatpush.msra.mxu3 %v2978_v52 }
  0x7b   :  { %838 = vmatpush.msrb.mxu0 %v2943_v43  ;;  %858 = vmatpush.msrb.mxu1 %v2948_v45 }
  0x7c   :  { %878 = vmatpush.msra.mxu2 %v3006_v61  ;;  %898 = vmatpush.msra.mxu3 %v2992_v56 }
  0x7d   :  { %839 = vmatpush.msrb.mxu0 %v2955_v47  ;;  %859 = vmatpush.msrb.mxu1 %v2969_v50  ;;  %v105_v50 = vperm.slane %v100_v13, 3 }
  0x7e   :  { %879 = vmatpush.msra.mxu2 %v3029_v2  ;;  %899 = vmatpush.msra.mxu3 %v3004_v60 }
  0x7f   :  { %840 = vmatpush.msrb.mxu0 %v2971_v51  ;;  %860 = vmatpush.msrb.mxu1 %v2986_v54 }
  0x80   :  { %880 = vmatpush.msra.mxu2 %v3043_v6  ;;  %900 = vmatpush.msra.mxu3 %v3027_v1 }
  0x81   :  { %841 = vmatpush.msrb.mxu0 %v2988_v55  ;;  %861 = vmatpush.msrb.mxu1 %v2996_v58 }
  0x82   :  { %881 = vmatpush.msra.mxu2 %v3055_v11  ;;  %901 = vmatpush.msra.mxu3 %v3041_v5 }
  0x83   :  { %842 = vmatpush.msrb.mxu0 %v2998_v59  ;;  %862 = vmatpush.msrb.mxu1 %v3017_v63 }
  0x84   :  { %882 = vmatpush.msra.mxu2 %v3075_v22  ;;  %902 = vmatpush.msra.mxu3 %v3053_v10 }
  0x85   :  { %843 = vmatpush.msrb.mxu0 %v3019_v0  ;;  %863 = vmatpush.msrb.mxu1 %v3035_v3 }
  0x86   :  { %883 = vmatpush.msra.mxu2 %v3086_v36  ;;  %903 = vmatpush.msra.mxu3 %v3073_v19 }
  0x87   :  { %844 = vmatpush.msrb.mxu0 %v3037_v4  ;;  %864 = vmatpush.msrb.mxu1 %v4357_v9 }
  0x88   :  { %884 = vmatpush.msra.mxu2 %v3093_v7  ;;  %904 = vmatpush.msra.mxu3 %v3084_v25 }
  0x89   :  { %845 = vmatpush.msrb.mxu0 %v4358_v23  ;;  %865 = vmatpush.msrb.mxu1 %v3064_v15 }
  0x8a   :  { %885 = vmatpush.msra.mxu2 %v3104_v24  ;;  %905 = vmatpush.msra.mxu3 %v3091_v8 }
  0x8b   :  { %846 = vmatpush.msrb.mxu0 %v3066_v18  ;;  %866 = vmatpush.msrb.mxu1 %v4359_v62 }
  0x8c   :  { %886 = vmatpush.msra.mxu2 %v3112_v16  ;;  %906 = vmatpush.msra.mxu3 %v3102_v49 }
  0x94   :  { %v152_v12 = vpop.f32.mrf.mxu0 }
  0x95   :  { %v193_v17 = vpop.f32.mrf.mxu1  ;;  %v153_v10 = vadd.f32 %v152_v12, %v102_v20 }
  0x96   :  { %v194_v15 = vadd.f32 %v193_v17, %v103_v21 }
  0x9a   :  { %v170_v26 = vpop.f32.mrf.mxu2 }
  0x9b   :  { %v3257_v27 = vadd.f32 %v170_v26, %v102_v20  ;;  %v211_v28 = vpop.f32.mrf.mxu3 }
  0x9c   :  { %v3259_v29 = vadd.f32 %v211_v28, %v103_v21  ;;  %v155_v30 = vpop.f32.mrf.mxu0 }
  0x9d   :  { %4362 = vst [vmem:[#allocation14_spill] sm:$0xff] %v3257_v27  ;;  %v3261_v31 = vadd.f32 %v155_v30, %v102_v20  ;;  %v196_v16 = vpop.f32.mrf.mxu1  ;;  %v3478_v27 = vld [vmem:[#allocation5 + $0xb0] sm:$0xff] }
  0x9e   :  { %4363 = vst [vmem:[#allocation15_spill] sm:$0xff] %v3259_v29  ;;  %v3263_v32 = vadd.f32 %v196_v16, %v103_v21  ;;  %v3476_v29 = vld [vmem:[#allocation5 + $0xa8] sm:$0xff] }
  0xa2   :  { %v173_v33 = vpop.f32.mrf.mxu2 }
  0xa3   :  { %v3265_v34 = vadd.f32 %v173_v33, %v102_v20  ;;  %v214_v35 = vpop.f32.mrf.mxu3 }
  0xa4   :  { %v3267_v37 = vadd.f32 %v214_v35, %v103_v21  ;;  %v158_v38 = vpop.f32.mrf.mxu0 }
  0xa5   :  { %4364 = vst [vmem:[#allocation16_spill] sm:$0xff] %v3265_v34  ;;  %v3269_v39 = vadd.f32 %v158_v38, %v102_v20  ;;  %v199_v40 = vpop.f32.mrf.mxu1  ;;  %v3464_v34 = vld [vmem:[#allocation5 + $0xd0] sm:$0xff] }
  0xa6   :  { %4365 = vst [vmem:[#allocation12_spill] sm:$0xff] %v3267_v37  ;;  %v3271_v41 = vadd.f32 %v199_v40, %v103_v21  ;;  %v3462_v37 = vld [vmem:[#allocation5 + $0xc8] sm:$0xff] }
  0xab   :  { %v3273_v42 = vpop.f32.mrf.mxu2 }
  0xac   :  { %v3275_v43 = vpop.f32.mrf.mxu3  ;;  %v161_v44 = vpop.f32.mrf.mxu0 }
  0xad   :  { %v3277_v45 = vadd.f32 %v161_v44, %v102_v20  ;;  %v202_v46 = vpop.f32.mrf.mxu1 }
  0xae   :  { %v3279_v47 = vadd.f32 %v202_v46, %v103_v21 }
  0xaf   :  { %4366 = vst [vmem:[#allocation13_spill] sm:$0xff] %v3277_v45  ;;  %v3525_v45 = vld [vmem:[#allocation5 + $0x30] sm:$0xff] }
  0xb0   :  { %4367 = vst [vmem:[#allocation17_spill] sm:$0xff] %v3279_v47  ;;  %v3521_v47 = vld [vmem:[#allocation5 + $0x28] sm:$0xff] }
  0xb3   :  { %v237_v51 = vpop.f32.mrf.mxu2 }
  0xb4   :  { %v3284_v52 = vadd.f32 %v237_v51, %v3281_v48  ;;  %v278_v53 = vpop.f32.mrf.mxu3  ;;  %v164_v55 = vpop.f32.mrf.mxu0 }
  0xb5   :  { %v3286_v54 = vadd.f32 %v278_v53, %v105_v50  ;;  %v3288_v56 = vadd.f32 %v164_v55, %v102_v20  ;;  %v205_v57 = vpop.f32.mrf.mxu1  ;;  %v276_v55 = vadd.f32 %v3275_v43, %v105_v50 }
  0xb6   :  { %v3290_v58 = vadd.f32 %v205_v57, %v103_v21 }
  0xb7   :  { %4368 = vst [vmem:[#allocation18_spill] sm:$0xff] %v3288_v56  ;;  %v3512_v56 = vld [vmem:[#allocation5 + $0x50] sm:$0xff] }
  0xb8   :  { %4369 = vst [vmem:[#allocation19_spill] sm:$0xff] %v3290_v58  ;;  %v3510_v58 = vld [vmem:[#allocation5 + $0x48] sm:$0xff] }
  0xb9   :  { %4403 = vst [vmem:[#allocation53_spill] sm:$0xff] %v3510_v58 }
  0xbb   :  { %v240_v59 = vpop.f32.mrf.mxu2 }
  0xbc   :  { %v3293_v60 = vadd.f32 %v240_v59, %v3281_v48  ;;  %v281_v61 = vpop.f32.mrf.mxu3  ;;  %v167_v0 = vpop.f32.mrf.mxu0 }
  0xbd   :  { %v3295_v63 = vadd.f32 %v281_v61, %v105_v50  ;;  %v3297_v1 = vadd.f32 %v167_v0, %v102_v20  ;;  %v208_v2 = vpop.f32.mrf.mxu1 }
  0xbe   :  { %v3299_v3 = vadd.f32 %v208_v2, %v103_v21  ;;  %v235_v2 = vadd.f32 %v3273_v42, %v3281_v48 }
  0xbf   :  { %4370 = vst [vmem:[#allocation20_spill] sm:$0xff] %v3297_v1  ;;  %v3502_v1 = vld [vmem:[#allocation5 + $0x70] sm:$0xff] }
  0xc0   :  { %4371 = vst [vmem:[#allocation21_spill] sm:$0xff] %v3299_v3  ;;  %v3498_v3 = vld [vmem:[#allocation5 + $0x68] sm:$0xff] }
  0xc1   :  { %4399 = vst [vmem:[#allocation49_spill] sm:$0xff] %v3498_v3 }
  0xc2   :  { %4400 = vst [vmem:[#allocation50_spill] sm:$0xff] %v3502_v1 }
  0xc3   :  { %v243_v4 = vpop.f32.mrf.mxu2 }
  0xc4   :  { %v3302_v5 = vadd.f32 %v243_v4, %v3281_v48  ;;  %v284_v6 = vpop.f32.mrf.mxu3  ;;  %v416_v8 = vpop.f32.mrf.mxu0 }
  0xc5   :  { %v3304_v7 = vadd.f32 %v284_v6, %v105_v50  ;;  %v436_v11 = vpop.f32.mrf.mxu1  ;;  %v479_v18 = vadd.f32 %v416_v8, %v153_v10 }
  0xc6   :  { %4372 = vst [vmem:[#allocation22_spill] sm:$0xff] %v3302_v5  ;;  %v480_v19 = vadd.f32 %v436_v11, %v194_v15 }
  0xc7   :  { %4373 = vst [vmem:[#allocation23_spill] sm:$0xff] %v3304_v7  ;;  %v2451_v36 = vmul.f32 -1.442695, %v479_v18  ;;  %v3519_v7 = vld [vmem:[#allocation5 + $0x20] sm:$0xff] }
  0xc8   :  { %v2452_v9 = vmul.f32 -1.442695, %v480_v19 }
  0xc9   :  { %2497 = vpow2.f32 %v2451_v36 }
  0xca   :  { %2499 = vpow2.f32 %v2452_v9 }
  0xcb   :  { %v246_v22 = vpop.f32.mrf.mxu2 }
  0xcc   :  { %v3307_v24 = vadd.f32 %v246_v22, %v3281_v48  ;;  %v287_v25 = vpop.f32.mrf.mxu3 }
  0xcd   :  { %v3309_v49 = vadd.f32 %v287_v25, %v105_v50 }
  0xce   :  { %4374 = vst [vmem:[#allocation24_spill] sm:$0xff] %v3307_v24  ;;  %v3504_v24 = vld [vmem:[#allocation5 + $0x78] sm:$0xff] }
  0xcf   :  { %4375 = vst [vmem:[#allocation25_spill] sm:$0xff] %v3309_v49  ;;  %v2498_v13 = vpop.eup %2497 }
  0xd0   :  { %v2500_v17 = vpop.eup %2499  ;;  %v486_v20 = vadd.f32 1.0, %v2498_v13  ;;  %4401 = vst [vmem:[#allocation51_spill] sm:$0xff] %v3504_v24 }
  0xd1   :  { %v505_v21 = vadd.f32 1.0, %v2500_v17 }
  0xd2   :  { %2501 = vrcp.f32 %v486_v20  ;;  %vm492_vm3 = vweird.f32 %v486_v20  ;;  %v498_v43 = vand.u32 2147483648, %v486_v20 }
  0xd3   :  { %v249_v23 = vpop.f32.mrf.mxu2  ;;  %2503 = vrcp.f32 %v505_v21  ;;  %v517_v19 = vand.u32 2147483648, %v505_v21  ;;  %vm511_vm4 = vweird.f32 %v505_v21  ;;  %v515_v22 = vand.u32 2147483647, %v505_v21 }
  0xd4   :  { %v3312_v62 = vadd.f32 %v249_v23, %v3281_v48  ;;  %v290_v14 = vpop.f32.mrf.mxu3 }
  0xd5   :  { %v3314_v12 = vadd.f32 %v290_v14, %v105_v50  ;;  %v518_v23 = vor.u32 1.1754944e-38, %v517_v19  ;;  %v499_v14 = vor.u32 1.1754944e-38, %v498_v43  ;;  %vm516_vm8 = vcmp.eq.f32.partialorder %v515_v22, 8.507059e+37 }
  0xd6   :  { %4376 = vst [vmem:[#allocation26_spill] sm:$0xff] %v3312_v62 }
  0xd7   :  { %4377 = vst [vmem:[#allocation27_spill] sm:$0xff] %v3314_v12  ;;  %v3490_v12 = vld [vmem:[#allocation5 + $0x90] sm:$0xff] }
  0xd8   :  { %v2502_v35 = vpop.eup %2501 }
  0xd9   :  { %v2504_v44 = vpop.eup %2503  ;;  %v488_v51 = vmul.f32 %v2502_v35, %v486_v20  ;;  %vm493_vm1 = vweird.f32 %v2502_v35 }
  0xda   :  { %v507_v53 = vmul.f32 %v2504_v44, %v505_v21  ;;  %vm512_vm2 = vweird.f32 %v2504_v44  ;;  %vm494_vm5 = vmor %vm492_vm3, %vm493_vm1 }
  0xdb   :  { %v252_v26 = vpop.f32.mrf.mxu2  ;;  %v489_v57 = vsub.f32 1.0, %v488_v51  ;;  %vm513_vm6 = vmor %vm511_vm4, %vm512_vm2 }
  0xdc   :  { %v3317_v28 = vadd.f32 %v252_v26, %v3281_v48  ;;  %v293_v30 = vpop.f32.mrf.mxu3  ;;  %v508_v59 = vsub.f32 1.0, %v507_v53 }
  0xdd   :  { %v3319_v16 = vadd.f32 %v293_v30, %v105_v50  ;;  %v490_v11 = vmul.f32 %v2502_v35, %v489_v57 }
  0xde   :  { %4378 = vst [vmem:[#allocation28_spill] sm:$0xff] %v3317_v28  ;;  %v509_v10 = vmul.f32 %v2504_v44, %v508_v59  ;;  %v3470_v28 = vld [vmem:[#allocation5 + $0xd8] sm:$0xff] }
  0xdf   :  { %4379 = vst [vmem:[#allocation29_spill] sm:$0xff] %v3319_v16  ;;  %v491_v15 = vadd.f32 %v2502_v35, %v490_v11  ;;  %v3474_v16 = vld [vmem:[#allocation5 + $0xa0] sm:$0xff] }
  0xe0   :  { %v510_v18 = vadd.f32 %v2504_v44, %v509_v10 }
  0xe1   :  { %v495_v42 = vsel %vm494_vm5, %v2502_v35, %v491_v15 }
  0xe3   :  { %v255_v33 = vpop.f32.mrf.mxu2 }
  0xe4   :  { %v3322_v38 = vadd.f32 %v255_v33, %v3281_v48  ;;  %v296_v40 = vpop.f32.mrf.mxu3  ;;  %v514_v48 = vsel %vm513_vm6, %v2504_v44, %v510_v18 }
  0xe5   :  { %v3324_v46 = vadd.f32 %v296_v40, %v105_v50  ;;  %v496_v50 = vand.u32 2147483647, %v486_v20  ;;  %v519_v17 = vsel %vm516_vm8, %v518_v23, %v514_v48 }
  0xe6   :  { %4380 = vst [vmem:[#allocation30_spill] sm:$0xff] %v3322_v38  ;;  %v541_v30 = vmul.f32 0.0, %v519_v17 }
  0xe7   :  { %4381 = vst [vmem:[#allocation31_spill] sm:$0xff] %v3324_v46  ;;  %vm497_vm7 = vcmp.eq.f32.partialorder %v496_v50, 8.507059e+37  ;;  %v3460_v46 = vld [vmem:[#allocation5 + $0xc0] sm:$0xff] }
  0xe8   :  { %v500_v13 = vsel %vm497_vm7, %v499_v14, %v495_v42 }
  0xeb   :  { %v456_v61 = vpop.f32.mrf.mxu2 }
  0xec   :  { %v476_v0 = vpop.f32.mrf.mxu3  ;;  %v481_v6 = vadd.f32 %v456_v61, %v235_v2 }
  0xed   :  { %v482_v4 = vadd.f32 %v476_v0, %v276_v55 }
  0xef   :  { %v2453_v8 = vmul.f32 -1.442695, %v482_v4 }
  0xf1   :  { %2505 = vpow2.f32 %v2453_v8 }
  0xf2   :  { %2507 = vtanh.f32 %v481_v6 }
  0xf7   :  { %v2506_v25 = vpop.eup %2505 }
  0xf8   :  { %v525_v36 = vadd.f32 1.0, %v2506_v25  ;;  %v2508_v9 = vpop.eup %2507 }
  0xf9   :  { %v542_v26 = vmul.f32 %v2508_v9, %v500_v13 }
  0xfa   :  { %2509 = vrcp.f32 %v525_v36  ;;  %v537_v35 = vand.u32 2147483648, %v525_v36  ;;  %v535_v51 = vand.u32 2147483647, %v525_v36  ;;  %vm531_vm10 = vweird.f32 %v525_v36 }
  0xfb   :  { %v3329_v40 = vadd.f32 %v542_v26, %v541_v30 }
  0xfc   :  { %v538_v55 = vor.u32 1.1754944e-38, %v537_v35  ;;  %vm536_vm12 = vcmp.eq.f32.partialorder %v535_v51, 8.507059e+37 }
  0xfd   :  { %2511 = vtanh.f32 %v3329_v40 }
 0x100   :  { %v2510_v33 = vpop.eup %2509 }
 0x101   :  { %v527_v20 = vmul.f32 %v2510_v33, %v525_v36  ;;  %vm532_vm9 = vweird.f32 %v2510_v33 }
 0x102   :  { %vm533_vm11 = vmor %vm531_vm10, %vm532_vm9 }
 0x103   :  { %v528_v21 = vsub.f32 1.0, %v527_v20  ;;  %v2512_v59 = vpop.eup %2511 }
 0x105   :  { %v529_v44 = vmul.f32 %v2510_v33, %v528_v21 }
 0x107   :  { %v530_v53 = vadd.f32 %v2510_v33, %v529_v44 }
 0x109   :  { %v534_v57 = vsel %vm533_vm11, %v2510_v33, %v530_v53 }
 0x10a   :  { %v539_v61 = vsel %vm536_vm12, %v538_v55, %v534_v57 }
 0x10b   :  { %v3332_v0 = vmul.f32 %v2512_v59, %v539_v61 }
 0x10d   :  { %4382 = vst [vmem:[#allocation32_spill] sm:$0xff] %v3332_v0  ;;  %631 = vmatmul.f32.vlgmr.msra.gmra.mxu0 %v3332_v0  ;;  %651 = vmatmul.f32.vlgmr.msra.gmra.mxu1 %v3332_v0 }
 0x10e   :  { %671 = vmatmul.f32.vlgmr.msrb.gmra.mxu2 %v3332_v0  ;;  %691 = vmatmul.f32.vlgmr.msrb.gmra.mxu3 %v3332_v0 }
 0x18a   :  { %v632_v2 = vpop.f32.mrf.mxu0  ;;  %v652_v4 = vpop.f32.mrf.mxu1 }
 0x18b   :  { %v695_v6 = vadd.f32 %v632_v2, %v3261_v31  ;;  %v696_v8 = vadd.f32 %v652_v4, %v3263_v32 }
 0x18d   :  { %v2454_v10 = vmul.f32 -1.442695, %v695_v6  ;;  %v2455_v11 = vmul.f32 -1.442695, %v696_v8 }
 0x18f   :  { %2513 = vpow2.f32 %v2454_v10 }
 0x190   :  { %2515 = vpow2.f32 %v2455_v11 }
 0x191   :  { %v692_v15 = vpop.f32.mrf.mxu3  ;;  %v672_v42 = vpop.f32.mrf.mxu2 }
 0x192   :  { %v698_v18 = vadd.f32 %v692_v15, %v3286_v54  ;;  %v697_v32 = vadd.f32 %v672_v42, %v3284_v52 }
 0x194   :  { %v2456_v19 = vmul.f32 -1.442695, %v698_v18 }
 0x195   :  { %v2514_v43 = vpop.eup %2513 }
 0x196   :  { %v2516_v50 = vpop.eup %2515  ;;  %v702_v22 = vadd.f32 1.0, %v2514_v43  ;;  %2517 = vpow2.f32 %v2456_v19 }
 0x197   :  { %v721_v25 = vadd.f32 1.0, %v2516_v50 }
 0x198   :  { %2519 = vrcp.f32 %v702_v22  ;;  %v714_v17 = vand.u32 2147483648, %v702_v22  ;;  %v712_v33 = vand.u32 2147483647, %v702_v22  ;;  %vm708_vm15 = vweird.f32 %v702_v22 }
 0x199   :  { %2521 = vrcp.f32 %v721_v25  ;;  %v733_v26 = vand.u32 2147483648, %v721_v25  ;;  %v731_v21 = vand.u32 2147483647, %v721_v25  ;;  %vm727_vm0 = vweird.f32 %v721_v25 }
 0x19a   :  { %v715_v52 = vor.u32 1.1754944e-38, %v714_v17  ;;  %vm713_vm3 = vcmp.eq.f32.partialorder %v712_v33, 8.507059e+37  ;;  %v3378_v17 = vld [vmem:[#allocation5 + $0x1a8] sm:$0xff]  ;;  %v3388_v33 = vld [vmem:[#allocation5 + $0x180] sm:$0xff] }
 0x19b   :  { %v734_v55 = vor.u32 1.1754944e-38, %v733_v26  ;;  %vm732_vm4 = vcmp.eq.f32.partialorder %v731_v21, 8.507059e+37  ;;  %v3380_v26 = vld [vmem:[#allocation5 + $0x1b0] sm:$0xff]  ;;  %4389 = vst [vmem:[#allocation39_spill] sm:$0xff] %v3388_v33 }
 0x19c   :  { %v2518_v48 = vpop.eup %2517  ;;  %v3392_v21 = vld [vmem:[#allocation5 + $0x190] sm:$0xff] }
 0x19d   :  { %v741_v31 = vadd.f32 1.0, %v2518_v48  ;;  %4391 = vst [vmem:[#allocation41_spill] sm:$0xff] %v3392_v21 }
 0x19e   :  { %v2520_v36 = vpop.eup %2519 }
 0x19f   :  { %v2522_v9 = vpop.eup %2521  ;;  %v704_v23 = vmul.f32 %v2520_v36, %v702_v22  ;;  %2523 = vrcp.f32 %v741_v31  ;;  %vm709_vm13 = vweird.f32 %v2520_v36  ;;  %v753_v19 = vand.u32 2147483648, %v741_v31 }
 0x1a0   :  { %v723_v14 = vmul.f32 %v2522_v9, %v721_v25  ;;  %2525 = vtanh.f32 %v697_v32  ;;  %vm728_vm14 = vweird.f32 %v2522_v9  ;;  %vm710_vm1 = vmor %vm708_vm15, %vm709_vm13  ;;  %vm747_vm6 = vweird.f32 %v741_v31  ;;  %v3360_v32 = vld [vmem:[#allocation5 + $0x1f8] sm:$0xff] }
 0x1a1   :  { %v705_v13 = vsub.f32 1.0, %v704_v23  ;;  %vm729_vm2 = vmor %vm727_vm0, %vm728_vm14  ;;  %v751_v43 = vand.u32 2147483647, %v741_v31  ;;  %v754_v22 = vor.u32 1.1754944e-38, %v753_v19  ;;  %1107 = vmatpush.msrb.mxu3 %v3360_v32  ;;  %v3366_v23 = vld [vmem:[#allocation5 + $0x1c8] sm:$0xff]  ;;  %v3444_v19 = vld [vmem:[#allocation5 + $0x118] sm:$0xff] }
 0x1a2   :  { %v724_v54 = vsub.f32 1.0, %v723_v14  ;;  %4387 = vst [vmem:[#allocation37_spill] sm:$0xff] %v3366_v23  ;;  %v3368_v14 = vld [vmem:[#allocation5 + $0x1d0] sm:$0xff] }
 0x1a3   :  { %v706_v30 = vmul.f32 %v2520_v36, %v705_v13  ;;  %vm752_vm8 = vcmp.eq.f32.partialorder %v751_v43, 8.507059e+37  ;;  %v3372_v13 = vld [vmem:[#allocation5 + $0x1d8] sm:$0xff]  ;;  %v3448_v43 = vld [vmem:[#allocation5 + $0xe0] sm:$0xff] }
 0x1a4   :  { %v725_v20 = vmul.f32 %v2522_v9, %v724_v54  ;;  %1108 = vmatpush.msrb.mxu3 %v3372_v13  ;;  %v3376_v54 = vld [vmem:[#allocation5 + $0x1a0] sm:$0xff] }
 0x1a5   :  { %v2524_v35 = vpop.eup %2523  ;;  %v707_v44 = vadd.f32 %v2520_v36, %v706_v30  ;;  %v3384_v30 = vld [vmem:[#allocation5 + $0x1b8] sm:$0xff] }
 0x1a6   :  { %v726_v51 = vadd.f32 %v2522_v9, %v725_v20  ;;  %v743_v53 = vmul.f32 %v2524_v35, %v741_v31  ;;  %v2526_v59 = vpop.eup %2525  ;;  %vm748_vm5 = vweird.f32 %v2524_v35  ;;  %v3356_v31 = vld [vmem:[#allocation5 + $0x1f0] sm:$0xff]  ;;  %4388 = vst [vmem:[#allocation38_spill] sm:$0xff] %v3384_v30  ;;  %1109 = vmatpush.msrb.mxu3 %v3384_v30  ;;  %v3390_v20 = vld [vmem:[#allocation5 + $0x188] sm:$0xff] }
 0x1a7   :  { %v711_v57 = vsel %vm710_vm1, %v2520_v36, %v707_v44  ;;  %vm749_vm7 = vmor %vm747_vm6, %vm748_vm5  ;;  %v3354_v36 = vld [vmem:[#allocation5 + $0x1e8] sm:$0xff]  ;;  %4385 = vst [vmem:[#allocation35_spill] sm:$0xff] %v3356_v31  ;;  %1087 = vmatpush.msrb.mxu2 %v3356_v31  ;;  %v3400_v44 = vld [vmem:[#allocation5 + $0x160] sm:$0xff] }
 0x1a8   :  { %v716_v61 = vsel %vm713_vm3, %v715_v52, %v711_v57  ;;  %v730_v2 = vsel %vm729_vm2, %v2522_v9, %v726_v51  ;;  %v744_v4 = vsub.f32 1.0, %v743_v53  ;;  %4384 = vst [vmem:[#allocation34_spill] sm:$0xff] %v3354_v36  ;;  %1067 = vmatpush.msra.mxu1 %v3354_v36  ;;  %v3364_v9 = vld [vmem:[#allocation5 + $0x1c0] sm:$0xff]  ;;  %v3402_v52 = vld [vmem:[#allocation5 + $0x168] sm:$0xff]  ;;  %v3404_v51 = vld [vmem:[#allocation5 + $0x170] sm:$0xff] }
 0x1a9   :  { %v735_v6 = vsel %vm732_vm4, %v734_v55, %v730_v2  ;;  %v758_v8 = vmul.f32 %v2526_v59, %v716_v61  ;;  %4386 = vst [vmem:[#allocation36_spill] sm:$0xff] %v3364_v9  ;;  %1088 = vmatpush.msrb.mxu2 %v3368_v14  ;;  %v3408_v53 = vld [vmem:[#allocation5 + $0x178] sm:$0xff]  ;;  %v3412_v55 = vld [vmem:[#allocation5 + $0x140] sm:$0xff]  ;;  %v3414_v57 = vld [vmem:[#allocation5 + $0x148] sm:$0xff] }
 0x1aa   :  { %v757_v10 = vmul.f32 %v735_v6, %v3329_v40  ;;  %v745_v11 = vmul.f32 %v2524_v35, %v744_v4  ;;  %v3352_v40 = vld [vmem:[#allocation5 + $0x1e0] sm:$0xff]  ;;  %1068 = vmatpush.msra.mxu1 %v3366_v23  ;;  %4390 = vst [vmem:[#allocation40_spill] sm:$0xff] %v3390_v20  ;;  %v3416_v59 = vld [vmem:[#allocation5 + $0x150] sm:$0xff]  ;;  %v3420_v61 = vld [vmem:[#allocation5 + $0x158] sm:$0xff] }
 0x1ab   :  { %1047 = vmatpush.msra.mxu0 %v3352_v40  ;;  %1089 = vmatpush.msrb.mxu2 %v3380_v26  ;;  %4392 = vst [vmem:[#allocation42_spill] sm:$0xff] %v3408_v53  ;;  %v3424_v2 = vld [vmem:[#allocation5 + $0x120] sm:$0xff]  ;;  %v3426_v4 = vld [vmem:[#allocation5 + $0x128] sm:$0xff]  ;;  %v3428_v6 = vld [vmem:[#allocation5 + $0x130] sm:$0xff] }
 0x1ac   :  { %v3343_v15 = vadd.f32 %v758_v8, %v757_v10  ;;  %v746_v18 = vadd.f32 %v2524_v35, %v745_v11  ;;  %1069 = vmatpush.msra.mxu1 %v3378_v17  ;;  %4393 = vst [vmem:[#allocation43_spill] sm:$0xff] %v3416_v59  ;;  %v3432_v8 = vld [vmem:[#allocation5 + $0x138] sm:$0xff]  ;;  %v3436_v10 = vld [vmem:[#allocation5 + $0x100] sm:$0xff]  ;;  %v3438_v11 = vld [vmem:[#allocation5 + $0x108] sm:$0xff] }
 0x1ad   :  { %1048 = vmatpush.msra.mxu0 %v3364_v9  ;;  %1090 = vmatpush.msrb.mxu2 %v3392_v21  ;;  %4394 = vst [vmem:[#allocation44_spill] sm:$0xff] %v3426_v4 }
 0x1ae   :  { %2527 = vtanh.f32 %v3343_v15  ;;  %v750_v50 = vsel %vm749_vm7, %v2524_v35, %v746_v18  ;;  %1070 = vmatpush.msra.mxu1 %v3390_v20  ;;  %v3396_v35 = vld [vmem:[#allocation5 + $0x198] sm:$0xff]  ;;  %4395 = vst [vmem:[#allocation45_spill] sm:$0xff] %v3428_v6  ;;  %v3440_v18 = vld [vmem:[#allocation5 + $0x110] sm:$0xff] }
 0x1af   :  { %v755_v42 = vsel %vm752_vm8, %v754_v22, %v750_v50  ;;  %1049 = vmatpush.msra.mxu0 %v3376_v54  ;;  %1110 = vmatpush.msrb.mxu3 %v3396_v35  ;;  %4396 = vst [vmem:[#allocation46_spill] sm:$0xff] %v3432_v8  ;;  %v3450_v50 = vld [vmem:[#allocation5 + $0xe8] sm:$0xff]  ;;  %v3452_v22 = vld [vmem:[#allocation5 + $0xf0] sm:$0xff] }
 0x1b0   :  { %1071 = vmatpush.msra.mxu1 %v3402_v52  ;;  %1091 = vmatpush.msrb.mxu2 %v3404_v51 }
 0x1b1   :  { %1050 = vmatpush.msra.mxu0 %v3388_v33  ;;  %1111 = vmatpush.msrb.mxu3 %v3408_v53 }
 0x1b2   :  { %1072 = vmatpush.msra.mxu1 %v3414_v57  ;;  %1092 = vmatpush.msrb.mxu2 %v3416_v59 }
 0x1b3   :  { %1051 = vmatpush.msra.mxu0 %v3400_v44  ;;  %1112 = vmatpush.msrb.mxu3 %v3420_v61 }
 0x1b4   :  { %v2528_v25 = vpop.eup %2527  ;;  %1073 = vmatpush.msra.mxu1 %v3426_v4  ;;  %1093 = vmatpush.msrb.mxu2 %v3428_v6 }
 0x1b5   :  { %v3346_v48 = vmul.f32 %v2528_v25, %v755_v42  ;;  %1052 = vmatpush.msra.mxu0 %v3412_v55  ;;  %1113 = vmatpush.msrb.mxu3 %v3432_v8  ;;  %v3456_v25 = vld [vmem:[#allocation5 + $0xf8] sm:$0xff] }
 0x1b6   :  { %1074 = vmatpush.msra.mxu1 %v3438_v11  ;;  %1094 = vmatpush.msrb.mxu2 %v3440_v18 }
 0x1b7   :  { %4383 = vst [vmem:[#allocation33_spill] sm:$0xff] %v3346_v48  ;;  %847 = vmatmul.f32.vlgmr.msrb.gmra.mxu0 %v3346_v48  ;;  %867 = vmatmul.f32.vlgmr.msrb.gmra.mxu1 %v3346_v48 }
 0x1b8   :  { %887 = vmatmul.f32.vlgmr.msra.gmra.mxu2 %v3346_v48  ;;  %907 = vmatmul.f32.vlgmr.msra.gmra.mxu3 %v3346_v48 }
 0x1b9   :  { %1053 = vmatpush.msra.mxu0 %v3424_v2  ;;  %1114 = vmatpush.msrb.mxu3 %v3444_v19 }
 0x1ba   :  { %1075 = vmatpush.msra.mxu1 %v3450_v50  ;;  %1095 = vmatpush.msrb.mxu2 %v3452_v22 }
 0x1bb   :  { %1054 = vmatpush.msra.mxu0 %v3436_v10  ;;  %1115 = vmatpush.msrb.mxu3 %v3456_v25 }
 0x1bc   :  { %1076 = vmatpush.msra.mxu1 %v3462_v37  ;;  %1096 = vmatpush.msrb.mxu2 %v3464_v34 }
 0x1bd   :  { %1055 = vmatpush.msra.mxu0 %v3448_v43  ;;  %1116 = vmatpush.msrb.mxu3 %v3470_v28 }
 0x1be   :  { %1077 = vmatpush.msra.mxu1 %v3476_v29  ;;  %1097 = vmatpush.msrb.mxu2 %v3478_v27 }
 0x1bf   :  { %1056 = vmatpush.msra.mxu0 %v3460_v46 }
 0x1c0   :  { %1098 = vmatpush.msrb.mxu2 %v3490_v12 }
 0x1c1   :  { %1057 = vmatpush.msra.mxu0 %v3474_v16 }
 0x1c2   :  { %1099 = vmatpush.msrb.mxu2 %v3502_v1 }
 0x1c4   :  { %1100 = vmatpush.msrb.mxu2 %v3512_v56 }
 0x1c6   :  { %1101 = vmatpush.msrb.mxu2 %v3525_v45 }
 0x234   :  { %v848_v42 = vpop.f32.mrf.mxu0  ;;  %v868_v38 = vpop.f32.mrf.mxu1 }
 0x235   :  { %v911_v48 = vadd.f32 %v848_v42, %v3269_v39  ;;  %v912_v0 = vadd.f32 %v868_v38, %v3271_v41  ;;  %v3482_v41 = vld [vmem:[#allocation5 + $0xb8] sm:$0xff]  ;;  %v3486_v38 = vld [vmem:[#allocation5 + $0x80] sm:$0xff]  ;;  %v3488_v42 = vld [vmem:[#allocation5 + $0x88] sm:$0xff] }
 0x236   :  { %1117 = vmatpush.msrb.mxu3 %v3482_v41  ;;  %1058 = vmatpush.msra.mxu0 %v3486_v38 }
 0x237   :  { %v2457_v62 = vmul.f32 -1.442695, %v911_v48  ;;  %v2458_v39 = vmul.f32 -1.442695, %v912_v0  ;;  %1078 = vmatpush.msra.mxu1 %v3488_v42  ;;  %v3494_v0 = vld [vmem:[#allocation5 + $0x98] sm:$0xff]  ;;  %v3496_v48 = vld [vmem:[#allocation5 + $0x60] sm:$0xff] }
 0x238   :  { %4397 = vst [vmem:[#allocation47_spill] sm:$0xff] %v3494_v0  ;;  %1118 = vmatpush.msrb.mxu3 %v3494_v0  ;;  %1059 = vmatpush.msra.mxu0 %v3496_v48 }
 0x239   :  { %2529 = vpow2.f32 %v2457_v62  ;;  %4398 = vst [vmem:[#allocation48_spill] sm:$0xff] %v3496_v48  ;;  %v3506_v62 = vld [vmem:[#allocation5 + $0x40] sm:$0xff]  ;;  %1079 = vmatpush.msra.mxu1 %v3498_v3  ;;  %v3527_v3 = vld [vmem:[#allocation5 + $0x38] sm:$0xff] }
 0x23a   :  { %2531 = vpow2.f32 %v2458_v39  ;;  %4402 = vst [vmem:[#allocation52_spill] sm:$0xff] %v3506_v62  ;;  %v3514_v39 = vld [vmem:[#allocation5 + $0x58] sm:$0xff]  ;;  %1119 = vmatpush.msrb.mxu3 %v3504_v24  ;;  %1060 = vmatpush.msra.mxu0 %v3506_v62  ;;  %v3537_v62 = vld [vmem:[#allocation5 + $0x10] sm:$0xff] }
 0x23b   :  { %v908_v49 = vpop.f32.mrf.mxu3  ;;  %1080 = vmatpush.msra.mxu1 %v3510_v58  ;;  %v3539_v58 = vld [vmem:[#allocation5 + $0x18] sm:$0xff]  ;;  %1102 = vmatpush.msrb.mxu2 %v3537_v62 }
 0x23c   :  { %v914_v5 = vadd.f32 %v908_v49, %v3295_v63  ;;  %1120 = vmatpush.msrb.mxu3 %v3514_v39  ;;  %v3531_v63 = vld [vmem:[#allocation5] sm:$0xff]  ;;  %v3533_v49 = vld [vmem:[#allocation5 + $0x8] sm:$0xff]  ;;  %1061 = vmatpush.msra.mxu0 %v3519_v7 }
 0x23d   :  { %1081 = vmatpush.msra.mxu1 %v3521_v47  ;;  %1303 = vmatpush.msra.mxu2 %v3356_v31 }
 0x23e   :  { %v2459_v48 = vmul.f32 -1.442695, %v914_v5  ;;  %1121 = vmatpush.msrb.mxu3 %v3527_v3  ;;  %1062 = vmatpush.msra.mxu0 %v3531_v63 }
 0x23f   :  { %v2530_v24 = vpop.eup %2529  ;;  %1082 = vmatpush.msra.mxu1 %v3533_v49  ;;  %1304 = vmatpush.msra.mxu2 %v3368_v14 }
 0x240   :  { %v2532_v1 = vpop.eup %2531  ;;  %v3541_v0 = vadd.f32 1.0, %v2530_v24  ;;  %2533 = vpow2.f32 %v2459_v48  ;;  %1122 = vmatpush.msrb.mxu3 %v3539_v58  ;;  %1263 = vmatpush.msrb.mxu0 %v3352_v40 }
 0x241   :  { %v3545_v5 = vadd.f32 1.0, %v2532_v1  ;;  %1283 = vmatpush.msrb.mxu1 %v3354_v36  ;;  %v888_v1 = vpop.f32.mrf.mxu2  ;;  %1305 = vmatpush.msra.mxu2 %v3380_v26 }
 0x242   :  { %2535 = vrcp.f32 %v3541_v0  ;;  %1323 = vmatpush.msra.mxu3 %v3360_v32  ;;  %1264 = vmatpush.msrb.mxu0 %v3364_v9  ;;  %v913_v31 = vadd.f32 %v888_v1, %v3293_v60  ;;  %vm924_vm11 = vweird.f32 %v3541_v0 }
 0x243   :  { %2537 = vrcp.f32 %v3545_v5  ;;  %1284 = vmatpush.msrb.mxu1 %v3366_v23  ;;  %1306 = vmatpush.msra.mxu2 %v3392_v21  ;;  %v928_v21 = vand.u32 2147483647, %v3541_v0  ;;  %vm943_vm12 = vweird.f32 %v3545_v5 }
 0x244   :  { %1324 = vmatpush.msra.mxu3 %v3372_v13  ;;  %1265 = vmatpush.msrb.mxu0 %v3376_v54 }
 0x245   :  { %1285 = vmatpush.msrb.mxu1 %v3378_v17  ;;  %1307 = vmatpush.msra.mxu2 %v3404_v51  ;;  %vm929_vm15 = vcmp.eq.f32.partialorder %v928_v21, 8.507059e+37 }
 0x246   :  { %v2534_v24 = vpop.eup %2533  ;;  %1325 = vmatpush.msra.mxu3 %v3384_v30  ;;  %1266 = vmatpush.msrb.mxu0 %v3388_v33  ;;  %v930_v30 = vand.u32 2147483648, %v3541_v0 }
 0x247   :  { %v3561_v48 = vadd.f32 1.0, %v2534_v24  ;;  %1286 = vmatpush.msrb.mxu1 %v3390_v20  ;;  %v949_v20 = vand.u32 2147483648, %v3545_v5  ;;  %1308 = vmatpush.msra.mxu2 %v3416_v59 }
 0x248   :  { %v2536_v36 = vpop.eup %2535  ;;  %1326 = vmatpush.msra.mxu3 %v3396_v35  ;;  %1267 = vmatpush.msrb.mxu0 %v3400_v44 }
 0x249   :  { %v2538_v9 = vpop.eup %2537  ;;  %v920_v23 = vmul.f32 %v2536_v36, %v3541_v0  ;;  %2539 = vrcp.f32 %v3561_v48  ;;  %1287 = vmatpush.msrb.mxu1 %v3402_v52  ;;  %vm925_vm9 = vweird.f32 %v2536_v36  ;;  %1309 = vmatpush.msra.mxu2 %v3428_v6  ;;  %v969_v21 = vand.u32 2147483648, %v3561_v48 }
 0x24a   :  { %v939_v24 = vmul.f32 %v2538_v9, %v3545_v5  ;;  %2541 = vtanh.f32 %v913_v31  ;;  %1327 = vmatpush.msra.mxu3 %v3408_v53  ;;  %1268 = vmatpush.msrb.mxu0 %v3412_v55  ;;  %vm944_vm10 = vweird.f32 %v2538_v9  ;;  %vm926_vm13 = vmor %vm924_vm11, %vm925_vm9  ;;  %vm963_vm2 = vweird.f32 %v3561_v48 }
 0x24b   :  { %v921_v60 = vsub.f32 1.0, %v920_v23  ;;  %1288 = vmatpush.msrb.mxu1 %v3414_v57  ;;  %vm945_vm14 = vmor %vm943_vm12, %vm944_vm10  ;;  %1310 = vmatpush.msra.mxu2 %v3440_v18 }
 0x24c   :  { %v940_v1 = vsub.f32 1.0, %v939_v24  ;;  %v947_v24 = vand.u32 2147483647, %v3545_v5  ;;  %1328 = vmatpush.msra.mxu3 %v3420_v61  ;;  %1269 = vmatpush.msrb.mxu0 %v3424_v2 }
 0x24d   :  { %v922_v33 = vmul.f32 %v2536_v36, %v921_v60  ;;  %1289 = vmatpush.msrb.mxu1 %v3426_v4  ;;  %v931_v60 = vor.u32 1.1754944e-38, %v930_v30  ;;  %1311 = vmatpush.msra.mxu2 %v3452_v22 }
 0x24e   :  { %v941_v23 = vmul.f32 %v2538_v9, %v940_v1  ;;  %1329 = vmatpush.msra.mxu3 %v3432_v8  ;;  %1270 = vmatpush.msrb.mxu0 %v3436_v10  ;;  %vm948_vm0 = vcmp.eq.f32.partialorder %v947_v24, 8.507059e+37  ;;  %v970_v24 = vor.u32 1.1754944e-38, %v969_v21  ;;  %v4418_v21 = vld [vmem:[#allocation40_spill] sm:$0xff] }
 0x24f   :  { %v3587_v31 = vpop.eup %2539  ;;  %v923_v53 = vadd.f32 %v2536_v36, %v922_v33  ;;  %v950_v33 = vor.u32 1.1754944e-38, %v949_v20  ;;  %1290 = vmatpush.msrb.mxu1 %v3438_v11  ;;  %1312 = vmatpush.msra.mxu2 %v3464_v34 }
 0x250   :  { %v942_v1 = vadd.f32 %v2538_v9, %v941_v23  ;;  %v959_v59 = vmul.f32 %v3587_v31, %v3561_v48  ;;  %v2542_v5 = vpop.eup %2541  ;;  %1330 = vmatpush.msra.mxu3 %v3444_v19  ;;  %1271 = vmatpush.msrb.mxu0 %v3448_v43  ;;  %vm964_vm1 = vweird.f32 %v3587_v31 }
 0x251   :  { %v927_v0 = vsel %vm926_vm13, %v2536_v36, %v923_v53  ;;  %1291 = vmatpush.msrb.mxu1 %v3450_v50  ;;  %1313 = vmatpush.msra.mxu2 %v3478_v27  ;;  %v967_v53 = vand.u32 2147483647, %v3561_v48  ;;  %vm965_vm3 = vmor %vm963_vm2, %vm964_vm1  ;;  %v4409_v48 = vld [vmem:[#allocation52_spill] sm:$0xff] }
 0x252   :  { %v932_v4 = vsel %vm929_vm15, %v931_v60, %v927_v0  ;;  %v946_v30 = vsel %vm945_vm14, %v2538_v9, %v942_v1  ;;  %v960_v23 = vsub.f32 1.0, %v959_v59  ;;  %1331 = vmatpush.msra.mxu3 %v3456_v25  ;;  %1272 = vmatpush.msrb.mxu0 %v3460_v46  ;;  %v4404_v59 = vld [vmem:[#allocation47_spill] sm:$0xff]  ;;  %v4407_v60 = vld [vmem:[#allocation50_spill] sm:$0xff] }
 0x253   :  { %v951_v6 = vsel %vm948_vm0, %v950_v33, %v946_v30  ;;  %v974_v8 = vmul.f32 %v2542_v5, %v932_v4  ;;  %1292 = vmatpush.msrb.mxu1 %v3462_v37  ;;  %1314 = vmatpush.msra.mxu2 %v3490_v12  ;;  %v4408_v1 = vld [vmem:[#allocation51_spill] sm:$0xff]  ;;  %vm968_vm4 = vcmp.eq.f32.partialorder %v967_v53, 8.507059e+37  ;;  %v4410_v33 = vld [vmem:[#allocation53_spill] sm:$0xff]  ;;  %v4412_v30 = vld [vmem:[#allocation34_spill] sm:$0xff] }
 0x254   :  { %v973_v36 = vmul.f32 %v951_v6, %v3343_v15  ;;  %v961_v20 = vmul.f32 %v3587_v31, %v960_v23  ;;  %1332 = vmatpush.msra.mxu3 %v3470_v28  ;;  %1273 = vmatpush.msrb.mxu0 %v3474_v16  ;;  %v4405_v6 = vld [vmem:[#allocation48_spill] sm:$0xff]  ;;  %v4413_v23 = vld [vmem:[#allocation35_spill] sm:$0xff] }
 0x255   :  { %1293 = vmatpush.msrb.mxu1 %v3476_v29  ;;  %1315 = vmatpush.msra.mxu2 %v4407_v60 }
 0x256   :  { %v3611_v9 = vadd.f32 %v974_v8, %v973_v36  ;;  %v962_v15 = vadd.f32 %v3587_v31, %v961_v20  ;;  %1333 = vmatpush.msra.mxu3 %v3482_v41  ;;  %1274 = vmatpush.msrb.mxu0 %v3486_v38  ;;  %v4406_v8 = vld [vmem:[#allocation49_spill] sm:$0xff]  ;;  %v4414_v36 = vld [vmem:[#allocation36_spill] sm:$0xff] }
 0x257   :  { %1294 = vmatpush.msrb.mxu1 %v3488_v42  ;;  %1316 = vmatpush.msra.mxu2 %v3512_v56  ;;  %v4415_v20 = vld [vmem:[#allocation37_spill] sm:$0xff] }
 0x258   :  { %2543 = vtanh.f32 %v3611_v9  ;;  %1334 = vmatpush.msra.mxu3 %v4404_v59  ;;  %v966_v4 = vsel %vm965_vm3, %v3587_v31, %v962_v15  ;;  %1275 = vmatpush.msrb.mxu0 %v4405_v6  ;;  %v4417_v15 = vld [vmem:[#allocation39_spill] sm:$0xff] }
 0x259   :  { %1295 = vmatpush.msrb.mxu1 %v4406_v8  ;;  %v971_v5 = vsel %vm968_vm4, %v970_v24, %v966_v4  ;;  %1317 = vmatpush.msra.mxu2 %v3525_v45 }
 0x25a   :  { %1335 = vmatpush.msra.mxu3 %v4408_v1  ;;  %1276 = vmatpush.msrb.mxu0 %v4409_v48 }
 0x25b   :  { %1296 = vmatpush.msrb.mxu1 %v4410_v33  ;;  %1318 = vmatpush.msra.mxu2 %v3537_v62 }
 0x25c   :  { %1336 = vmatpush.msra.mxu3 %v3514_v39  ;;  %1277 = vmatpush.msrb.mxu0 %v3519_v7 }
 0x25d   :  { %1297 = vmatpush.msrb.mxu1 %v3521_v47 }
 0x25e   :  { %v2544_v0 = vpop.eup %2543  ;;  %1337 = vmatpush.msra.mxu3 %v3527_v3  ;;  %1278 = vmatpush.msrb.mxu0 %v3531_v63 }
 0x25f   :  { %v3638_v31 = vmul.f32 %v2544_v0, %v971_v5  ;;  %1298 = vmatpush.msrb.mxu1 %v3533_v49 }
 0x260   :  { %1338 = vmatpush.msra.mxu3 %v3539_v58 }
 0x261   :  { %4411 = vst [vmem:[#allocation47_spill] sm:$0xff] %v3638_v31  ;;  %1063 = vmatmul.f32.vlgmr.msra.gmra.mxu0 %v3638_v31  ;;  %1083 = vmatmul.f32.vlgmr.msra.gmra.mxu1 %v3638_v31 }
 0x262   :  { %1103 = vmatmul.f32.vlgmr.msrb.gmra.mxu2 %v3638_v31  ;;  %1123 = vmatmul.f32.vlgmr.msrb.gmra.mxu3 %v3638_v31  ;;  %v3919_v31 = vld [vmem:[#allocation5 + $0x38] sm:$0xff] }
 0x263   :  { %1479 = vmatpush.msra.mxu0 %v3352_v40  ;;  %1499 = vmatpush.msra.mxu1 %v4412_v30  ;;  %v4416_v40 = vld [vmem:[#allocation38_spill] sm:$0xff] }
 0x264   :  { %1519 = vmatpush.msrb.mxu2 %v4413_v23  ;;  %1539 = vmatpush.msrb.mxu3 %v3360_v32  ;;  %v4419_v32 = vld [vmem:[#allocation41_spill] sm:$0xff] }
 0x265   :  { %1480 = vmatpush.msra.mxu0 %v4414_v36  ;;  %1500 = vmatpush.msra.mxu1 %v4415_v20 }
 0x266   :  { %1520 = vmatpush.msrb.mxu2 %v3368_v14  ;;  %1540 = vmatpush.msrb.mxu3 %v3372_v13  ;;  %v4420_v14 = vld [vmem:[#allocation42_spill] sm:$0xff]  ;;  %v4421_v13 = vld [vmem:[#allocation43_spill] sm:$0xff] }
 0x267   :  { %1481 = vmatpush.msra.mxu0 %v3376_v54  ;;  %1501 = vmatpush.msra.mxu1 %v3378_v17  ;;  %v4422_v54 = vld [vmem:[#allocation44_spill] sm:$0xff]  ;;  %v4423_v17 = vld [vmem:[#allocation45_spill] sm:$0xff] }
 0x268   :  { %1521 = vmatpush.msrb.mxu2 %v3380_v26  ;;  %1541 = vmatpush.msrb.mxu3 %v4416_v40  ;;  %v4424_v26 = vld [vmem:[#allocation46_spill] sm:$0xff] }
 0x269   :  { %1482 = vmatpush.msra.mxu0 %v4417_v15  ;;  %1502 = vmatpush.msra.mxu1 %v4418_v21 }
 0x26a   :  { %1522 = vmatpush.msrb.mxu2 %v4419_v32  ;;  %1542 = vmatpush.msrb.mxu3 %v3396_v35 }
 0x26b   :  { %1483 = vmatpush.msra.mxu0 %v3400_v44  ;;  %1503 = vmatpush.msra.mxu1 %v3402_v52 }
 0x26c   :  { %1523 = vmatpush.msrb.mxu2 %v3404_v51  ;;  %1543 = vmatpush.msrb.mxu3 %v4420_v14 }
 0x26d   :  { %1484 = vmatpush.msra.mxu0 %v3412_v55  ;;  %1504 = vmatpush.msra.mxu1 %v3414_v57 }
 0x26e   :  { %1524 = vmatpush.msrb.mxu2 %v4421_v13  ;;  %1544 = vmatpush.msrb.mxu3 %v3420_v61  ;;  %v4428_v61 = vld [vmem:[#allocation22_spill] sm:$0xff] }
 0x26f   :  { %1485 = vmatpush.msra.mxu0 %v3424_v2  ;;  %1505 = vmatpush.msra.mxu1 %v4422_v54  ;;  %v4430_v13 = vld [vmem:[#allocation18_spill] sm:$0xff] }
 0x270   :  { %1525 = vmatpush.msrb.mxu2 %v4423_v17  ;;  %1545 = vmatpush.msrb.mxu3 %v4424_v26  ;;  %v4431_v17 = vld [vmem:[#allocation19_spill] sm:$0xff] }
 0x271   :  { %1486 = vmatpush.msra.mxu0 %v3436_v10  ;;  %1506 = vmatpush.msra.mxu1 %v3438_v11 }
 0x272   :  { %1526 = vmatpush.msrb.mxu2 %v3440_v18  ;;  %1546 = vmatpush.msrb.mxu3 %v3444_v19 }
 0x273   :  { %1487 = vmatpush.msra.mxu0 %v3448_v43  ;;  %1507 = vmatpush.msra.mxu1 %v3450_v50 }
 0x274   :  { %1527 = vmatpush.msrb.mxu2 %v3452_v22  ;;  %1547 = vmatpush.msrb.mxu3 %v3456_v25 }
 0x275   :  { %1488 = vmatpush.msra.mxu0 %v3460_v46  ;;  %1508 = vmatpush.msra.mxu1 %v3462_v37 }
 0x276   :  { %1528 = vmatpush.msrb.mxu2 %v3464_v34  ;;  %1548 = vmatpush.msrb.mxu3 %v3470_v28  ;;  %v4425_v34 = vld [vmem:[#allocation13_spill] sm:$0xff] }
 0x277   :  { %1489 = vmatpush.msra.mxu0 %v3474_v16  ;;  %1509 = vmatpush.msra.mxu1 %v3476_v29 }
 0x278   :  { %1529 = vmatpush.msrb.mxu2 %v3478_v27  ;;  %1549 = vmatpush.msrb.mxu3 %v3482_v41 }
 0x279   :  { %1490 = vmatpush.msra.mxu0 %v3486_v38  ;;  %1510 = vmatpush.msra.mxu1 %v3488_v42 }
 0x27a   :  { %1530 = vmatpush.msrb.mxu2 %v3490_v12  ;;  %1550 = vmatpush.msrb.mxu3 %v4404_v59 }
 0x27b   :  { %1491 = vmatpush.msra.mxu0 %v4405_v6  ;;  %1511 = vmatpush.msra.mxu1 %v4406_v8 }
 0x27c   :  { %1531 = vmatpush.msrb.mxu2 %v4407_v60  ;;  %1551 = vmatpush.msrb.mxu3 %v4408_v1 }
 0x27d   :  { %1492 = vmatpush.msra.mxu0 %v4409_v48  ;;  %1512 = vmatpush.msra.mxu1 %v4410_v33 }
 0x27e   :  { %1532 = vmatpush.msrb.mxu2 %v3512_v56  ;;  %1552 = vmatpush.msrb.mxu3 %v3514_v39  ;;  %v4426_v56 = vld [vmem:[#allocation17_spill] sm:$0xff] }
 0x27f   :  { %1493 = vmatpush.msra.mxu0 %v3519_v7  ;;  %1513 = vmatpush.msra.mxu1 %v3521_v47 }
 0x280   :  { %1533 = vmatpush.msrb.mxu2 %v3525_v45  ;;  %1553 = vmatpush.msrb.mxu3 %v3527_v3  ;;  %v4427_v3 = vld [vmem:[#allocation23_spill] sm:$0xff] }
 0x281   :  { %1494 = vmatpush.msra.mxu0 %v3531_v63  ;;  %1514 = vmatpush.msra.mxu1 %v3533_v49 }
 0x282   :  { %1534 = vmatpush.msrb.mxu2 %v3537_v62  ;;  %1554 = vmatpush.msrb.mxu3 %v3539_v58 }
 0x2de   :  { %v1064_v27 = vpop.f32.mrf.mxu0  ;;  %v1084_v29 = vpop.f32.mrf.mxu1 }
 0x2df   :  { %v1127_v37 = vadd.f32 %v1064_v27, %v4425_v34  ;;  %v1128_v7 = vadd.f32 %v1084_v29, %v4426_v56 }
 0x2e1   :  { %v2460_v12 = vmul.f32 -1.442695, %v1127_v37  ;;  %v2461_v47 = vmul.f32 -1.442695, %v1128_v7  ;;  %v4432_v37 = vld [vmem:[#allocation25_spill] sm:$0xff] }
 0x2e3   :  { %2545 = vpow2.f32 %v2460_v12 }
 0x2e4   :  { %2547 = vpow2.f32 %v2461_v47 }
 0x2e5   :  { %v1124_v45 = vpop.f32.mrf.mxu3  ;;  %v1104_v58 = vpop.f32.mrf.mxu2 }
 0x2e6   :  { %v1130_v28 = vadd.f32 %v1124_v45, %v4427_v3  ;;  %v1129_v2 = vadd.f32 %v1104_v58, %v4428_v61 }
 0x2e8   :  { %v2462_v16 = vmul.f32 -1.442695, %v1130_v28 }
 0x2e9   :  { %v2546_v46 = vpop.eup %2545 }
 0x2ea   :  { %v2548_v35 = vpop.eup %2547  ;;  %v1134_v44 = vadd.f32 1.0, %v2546_v46  ;;  %2549 = vpow2.f32 %v2462_v16 }
 0x2eb   :  { %v1153_v52 = vadd.f32 1.0, %v2548_v35 }
 0x2ec   :  { %2551 = vrcp.f32 %v1134_v44  ;;  %v1146_v50 = vand.u32 2147483648, %v1134_v44  ;;  %v1144_v41 = vand.u32 2147483647, %v1134_v44  ;;  %vm1140_vm7 = vweird.f32 %v1134_v44 }
 0x2ed   :  { %2553 = vrcp.f32 %v1153_v52  ;;  %v1165_v22 = vand.u32 2147483648, %v1153_v52  ;;  %v1163_v42 = vand.u32 2147483647, %v1153_v52  ;;  %vm1159_vm8 = vweird.f32 %v1153_v52 }
 0x2ee   :  { %v1147_v63 = vor.u32 1.1754944e-38, %v1146_v50  ;;  %vm1145_vm11 = vcmp.eq.f32.partialorder %v1144_v41, 8.507059e+37 }
 0x2ef   :  { %v1166_v59 = vor.u32 1.1754944e-38, %v1165_v22  ;;  %vm1164_vm12 = vcmp.eq.f32.partialorder %v1163_v42, 8.507059e+37 }
 0x2f0   :  { %v2550_v51 = vpop.eup %2549 }
 0x2f1   :  { %v1173_v55 = vadd.f32 1.0, %v2550_v51 }
 0x2f2   :  { %v2552_v57 = vpop.eup %2551 }
 0x2f3   :  { %v2554_v10 = vpop.eup %2553  ;;  %v1136_v11 = vmul.f32 %v2552_v57, %v1134_v44  ;;  %2555 = vrcp.f32 %v1173_v55  ;;  %vm1141_vm5 = vweird.f32 %v2552_v57  ;;  %v1185_v23 = vand.u32 2147483648, %v1173_v55  ;;  %v4433_v44 = vld [vmem:[#allocation24_spill] sm:$0xff] }
 0x2f4   :  { %v1155_v18 = vmul.f32 %v2554_v10, %v1153_v52  ;;  %2557 = vtanh.f32 %v1129_v2  ;;  %vm1160_vm6 = vweird.f32 %v2554_v10  ;;  %vm1142_vm9 = vmor %vm1140_vm7, %vm1141_vm5  ;;  %vm1179_vm14 = vweird.f32 %v1173_v55 }
 0x2f5   :  { %v1137_v19 = vsub.f32 1.0, %v1136_v11  ;;  %vm1161_vm10 = vmor %vm1159_vm8, %vm1160_vm6  ;;  %v1183_v36 = vand.u32 2147483647, %v1173_v55  ;;  %v1186_v40 = vor.u32 1.1754944e-38, %v1185_v23 }
 0x2f6   :  { %v1156_v43 = vsub.f32 1.0, %v1155_v18 }
 0x2f7   :  { %v1138_v25 = vmul.f32 %v2552_v57, %v1137_v19  ;;  %vm1184_vm0 = vcmp.eq.f32.partialorder %v1183_v36, 8.507059e+37 }
 0x2f8   :  { %v1157_v38 = vmul.f32 %v2554_v10, %v1156_v43 }
 0x2f9   :  { %v2556_v62 = vpop.eup %2555  ;;  %v1139_v39 = vadd.f32 %v2552_v57, %v1138_v25 }
 0x2fa   :  { %v1158_v49 = vadd.f32 %v2554_v10, %v1157_v38  ;;  %v1175_v53 = vmul.f32 %v2556_v62, %v1173_v55  ;;  %v2558_v6 = vpop.eup %2557  ;;  %vm1180_vm13 = vweird.f32 %v2556_v62 }
 0x2fb   :  { %v1143_v4 = vsel %vm1142_vm9, %v2552_v57, %v1139_v39  ;;  %vm1181_vm15 = vmor %vm1179_vm14, %vm1180_vm13 }
 0x2fc   :  { %v1148_v8 = vsel %vm1145_vm11, %v1147_v63, %v1143_v4  ;;  %v1162_v24 = vsel %vm1161_vm10, %v2554_v10, %v1158_v49  ;;  %v1176_v60 = vsub.f32 1.0, %v1175_v53 }
 0x2fd   :  { %v1167_v1 = vsel %vm1164_vm12, %v1166_v59, %v1162_v24  ;;  %v1190_v48 = vmul.f32 %v2558_v6, %v1148_v8 }
 0x2fe   :  { %v1189_v33 = vmul.f32 %v1167_v1, %v3611_v9  ;;  %v1177_v0 = vmul.f32 %v2556_v62, %v1176_v60 }
 0x300   :  { %v3721_v5 = vadd.f32 %v1190_v48, %v1189_v33  ;;  %v1178_v30 = vadd.f32 %v2556_v62, %v1177_v0 }
 0x302   :  { %2559 = vtanh.f32 %v3721_v5  ;;  %v1182_v20 = vsel %vm1181_vm15, %v2556_v62, %v1178_v30 }
 0x303   :  { %v1187_v21 = vsel %vm1184_vm0, %v1186_v40, %v1182_v20  ;;  %v3746_v20 = vld [vmem:[#allocation5 + $0x1e8] sm:$0xff]  ;;  %v3748_v40 = vld [vmem:[#allocation5 + $0x1f0] sm:$0xff] }
 0x308   :  { %v2560_v15 = vpop.eup %2559 }
 0x309   :  { %v3724_v32 = vmul.f32 %v2560_v15, %v1187_v21  ;;  %v3752_v15 = vld [vmem:[#allocation5 + $0x1f8] sm:$0xff]  ;;  %v3756_v21 = vld [vmem:[#allocation5 + $0x1c0] sm:$0xff] }
 0x30b   :  { %4429 = vst [vmem:[#allocation48_spill] sm:$0xff] %v3724_v32  ;;  %1279 = vmatmul.f32.vlgmr.msrb.gmra.mxu0 %v3724_v32  ;;  %1299 = vmatmul.f32.vlgmr.msrb.gmra.mxu1 %v3724_v32 }
 0x30c   :  { %1319 = vmatmul.f32.vlgmr.msra.gmra.mxu2 %v3724_v32  ;;  %1339 = vmatmul.f32.vlgmr.msra.gmra.mxu3 %v3724_v32  ;;  %v3917_v32 = vld [vmem:[#allocation5 + $0x30] sm:$0xff] }
 0x30d   :  { %1715 = vmatpush.msrb.mxu1 %v3746_v20  ;;  %1735 = vmatpush.msra.mxu2 %v3748_v40 }
 0x30e   :  { %1755 = vmatpush.msra.mxu3 %v3752_v15 }
 0x388   :  { %v1280_v9 = vpop.f32.mrf.mxu0  ;;  %v1300_v14 = vpop.f32.mrf.mxu1 }
 0x389   :  { %v1343_v54 = vadd.f32 %v1280_v9, %v4430_v13  ;;  %v1344_v26 = vadd.f32 %v1300_v14, %v4431_v17  ;;  %v3758_v9 = vld [vmem:[#allocation5 + $0x1c8] sm:$0xff]  ;;  %v3760_v14 = vld [vmem:[#allocation5 + $0x1d0] sm:$0xff]  ;;  %v3764_v13 = vld [vmem:[#allocation5 + $0x1d8] sm:$0xff] }
 0x38a   :  { %1716 = vmatpush.msrb.mxu1 %v3758_v9  ;;  %1736 = vmatpush.msra.mxu2 %v3760_v14  ;;  %v3770_v17 = vld [vmem:[#allocation5 + $0x1a8] sm:$0xff] }
 0x38b   :  { %v2463_v27 = vmul.f32 -1.442695, %v1343_v54  ;;  %v2464_v29 = vmul.f32 -1.442695, %v1344_v26  ;;  %1756 = vmatpush.msra.mxu3 %v3764_v13  ;;  %v3768_v54 = vld [vmem:[#allocation5 + $0x1a0] sm:$0xff]  ;;  %v3772_v26 = vld [vmem:[#allocation5 + $0x1b0] sm:$0xff] }
 0x38c   :  { %1717 = vmatpush.msrb.mxu1 %v3770_v17  ;;  %1737 = vmatpush.msra.mxu2 %v3772_v26 }
 0x38d   :  { %2561 = vpow2.f32 %v2463_v27  ;;  %v3776_v27 = vld [vmem:[#allocation5 + $0x1b8] sm:$0xff] }
 0x38e   :  { %2563 = vpow2.f32 %v2464_v29  ;;  %1757 = vmatpush.msra.mxu3 %v3776_v27  ;;  %v3780_v29 = vld [vmem:[#allocation5 + $0x180] sm:$0xff] }
 0x38f   :  { %v1340_v34 = vpop.f32.mrf.mxu3  ;;  %v1320_v28 = vpop.f32.mrf.mxu2 }
 0x390   :  { %v1346_v56 = vadd.f32 %v1340_v34, %v4432_v37  ;;  %v1345_v52 = vadd.f32 %v1320_v28, %v4433_v44  ;;  %v3782_v34 = vld [vmem:[#allocation5 + $0x188] sm:$0xff]  ;;  %v3784_v37 = vld [vmem:[#allocation5 + $0x190] sm:$0xff] }
 0x391   :  { %1718 = vmatpush.msrb.mxu1 %v3782_v34  ;;  %1738 = vmatpush.msra.mxu2 %v3784_v37  ;;  %v3806_v28 = vld [vmem:[#allocation5 + $0x148] sm:$0xff] }
 0x392   :  { %v2465_v7 = vmul.f32 -1.442695, %v1346_v56  ;;  %v3788_v56 = vld [vmem:[#allocation5 + $0x198] sm:$0xff]  ;;  %v3818_v44 = vld [vmem:[#allocation5 + $0x128] sm:$0xff] }
 0x393   :  { %v2562_v12 = vpop.eup %2561  ;;  %1758 = vmatpush.msra.mxu3 %v3788_v56 }
 0x394   :  { %v2564_v47 = vpop.eup %2563  ;;  %v1350_v45 = vadd.f32 1.0, %v2562_v12  ;;  %2565 = vpow2.f32 %v2465_v7  ;;  %v3792_v7 = vld [vmem:[#allocation5 + $0x160] sm:$0xff]  ;;  %v3794_v12 = vld [vmem:[#allocation5 + $0x168] sm:$0xff] }
 0x395   :  { %v1369_v3 = vadd.f32 1.0, %v2564_v47  ;;  %v3796_v47 = vld [vmem:[#allocation5 + $0x170] sm:$0xff]  ;;  %1719 = vmatpush.msrb.mxu1 %v3794_v12 }
 0x396   :  { %2567 = vrcp.f32 %v1350_v45  ;;  %v1362_v2 = vand.u32 2147483648, %v1350_v45  ;;  %v1360_v18 = vand.u32 2147483647, %v1350_v45  ;;  %vm1356_vm3 = vweird.f32 %v1350_v45  ;;  %1739 = vmatpush.msra.mxu2 %v3796_v47 }
 0x397   :  { %2569 = vrcp.f32 %v1369_v3  ;;  %v1381_v10 = vand.u32 2147483648, %v1369_v3  ;;  %v1379_v43 = vand.u32 2147483647, %v1369_v3  ;;  %vm1375_vm4 = vweird.f32 %v1369_v3  ;;  %1720 = vmatpush.msrb.mxu1 %v3806_v28 }
 0x398   :  { %v1363_v25 = vor.u32 1.1754944e-38, %v1362_v2  ;;  %vm1361_vm7 = vcmp.eq.f32.partialorder %v1360_v18, 8.507059e+37  ;;  %v3840_v2 = vld [vmem:[#allocation5 + $0xe0] sm:$0xff]  ;;  %v3848_v18 = vld [vmem:[#allocation5 + $0xf8] sm:$0xff] }
 0x399   :  { %v1382_v42 = vor.u32 1.1754944e-38, %v1381_v10  ;;  %vm1380_vm8 = vcmp.eq.f32.partialorder %v1379_v43, 8.507059e+37  ;;  %1721 = vmatpush.msrb.mxu1 %v3818_v44  ;;  %v3842_v10 = vld [vmem:[#allocation5 + $0xe8] sm:$0xff] }
 0x39a   :  { %v2566_v16 = vpop.eup %2565 }
 0x39b   :  { %v1389_v46 = vadd.f32 1.0, %v2566_v16  ;;  %v3808_v16 = vld [vmem:[#allocation5 + $0x150] sm:$0xff] }
 0x39c   :  { %v2568_v35 = vpop.eup %2567  ;;  %1740 = vmatpush.msra.mxu2 %v3808_v16 }
 0x39d   :  { %v2570_v58 = vpop.eup %2569  ;;  %v1352_v51 = vmul.f32 %v2568_v35, %v1350_v45  ;;  %2571 = vrcp.f32 %v1389_v46  ;;  %vm1357_vm1 = vweird.f32 %v2568_v35  ;;  %v1401_v1 = vand.u32 2147483648, %v1389_v46  ;;  %v3800_v45 = vld [vmem:[#allocation5 + $0x178] sm:$0xff] }
 0x39e   :  { %v1371_v55 = vmul.f32 %v2570_v58, %v1369_v3  ;;  %2573 = vtanh.f32 %v1345_v52  ;;  %vm1376_vm2 = vweird.f32 %v2570_v58  ;;  %vm1358_vm5 = vmor %vm1356_vm3, %vm1357_vm1  ;;  %vm1395_vm10 = vweird.f32 %v1389_v46  ;;  %1759 = vmatpush.msra.mxu3 %v3800_v45  ;;  %v3804_v3 = vld [vmem:[#allocation5 + $0x140] sm:$0xff]  ;;  %v3820_v52 = vld [vmem:[#allocation5 + $0x130] sm:$0xff] }
 0x39f   :  { %v1353_v57 = vsub.f32 1.0, %v1352_v51  ;;  %vm1377_vm6 = vmor %vm1375_vm4, %vm1376_vm2  ;;  %v1399_v48 = vand.u32 2147483647, %v1389_v46  ;;  %v1402_v0 = vor.u32 1.1754944e-38, %v1401_v1  ;;  %1741 = vmatpush.msra.mxu2 %v3820_v52  ;;  %v3828_v51 = vld [vmem:[#allocation5 + $0x100] sm:$0xff]  ;;  %v3882_v1 = vld [vmem:[#allocation5 + $0x90] sm:$0xff] }
 0x3a0   :  { %v1372_v61 = vsub.f32 1.0, %v1371_v55  ;;  %v3830_v55 = vld [vmem:[#allocation5 + $0x108] sm:$0xff] }
 0x3a1   :  { %v1354_v11 = vmul.f32 %v2568_v35, %v1353_v57  ;;  %vm1400_vm12 = vcmp.eq.f32.partialorder %v1399_v48, 8.507059e+37  ;;  %v3832_v57 = vld [vmem:[#allocation5 + $0x110] sm:$0xff]  ;;  %1722 = vmatpush.msrb.mxu1 %v3830_v55  ;;  %v3886_v48 = vld [vmem:[#allocation5 + $0x98] sm:$0xff] }
 0x3a2   :  { %v1373_v19 = vmul.f32 %v2570_v58, %v1372_v61  ;;  %v3836_v61 = vld [vmem:[#allocation5 + $0x118] sm:$0xff]  ;;  %1742 = vmatpush.msra.mxu2 %v3832_v57 }
 0x3a3   :  { %v2572_v50 = vpop.eup %2571  ;;  %v1355_v22 = vadd.f32 %v2568_v35, %v1354_v11  ;;  %v3844_v11 = vld [vmem:[#allocation5 + $0xf0] sm:$0xff]  ;;  %1723 = vmatpush.msrb.mxu1 %v3842_v10 }
 0x3a4   :  { %v1374_v41 = vadd.f32 %v2570_v58, %v1373_v19  ;;  %v1391_v38 = vmul.f32 %v2572_v50, %v1389_v46  ;;  %v2574_v39 = vpop.eup %2573  ;;  %vm1396_vm9 = vweird.f32 %v2572_v50  ;;  %v3812_v46 = vld [vmem:[#allocation5 + $0x158] sm:$0xff]  ;;  %1743 = vmatpush.msra.mxu2 %v3844_v11 }
 0x3a5   :  { %v1359_v62 = vsel %vm1358_vm5, %v2568_v35, %v1355_v22  ;;  %vm1397_vm11 = vmor %vm1395_vm10, %vm1396_vm9  ;;  %1760 = vmatpush.msra.mxu3 %v3812_v46  ;;  %v3816_v35 = vld [vmem:[#allocation5 + $0x120] sm:$0xff]  ;;  %v3854_v22 = vld [vmem:[#allocation5 + $0xc8] sm:$0xff] }
 0x3a6   :  { %v1364_v63 = vsel %vm1361_vm7, %v1363_v25, %v1359_v62  ;;  %v1378_v49 = vsel %vm1377_vm6, %v2570_v58, %v1374_v41  ;;  %v1392_v53 = vsub.f32 1.0, %v1391_v38  ;;  %v3824_v58 = vld [vmem:[#allocation5 + $0x138] sm:$0xff]  ;;  %v3856_v25 = vld [vmem:[#allocation5 + $0xd0] sm:$0xff]  ;;  %v4435_v41 = vld [vmem:[#allocation20_spill] sm:$0xff]  ;;  %1724 = vmatpush.msrb.mxu1 %v3854_v22 }
 0x3a7   :  { %v1383_v59 = vsel %vm1380_vm8, %v1382_v42, %v1378_v49  ;;  %v1406_v4 = vmul.f32 %v2574_v39, %v1364_v63  ;;  %1761 = vmatpush.msra.mxu3 %v3824_v58  ;;  %v4436_v42 = vld [vmem:[#allocation21_spill] sm:$0xff]  ;;  %v3862_v39 = vld [vmem:[#allocation5 + $0xd8] sm:$0xff]  ;;  %1744 = vmatpush.msra.mxu2 %v3856_v25  ;;  %v3866_v63 = vld [vmem:[#allocation5 + $0xa0] sm:$0xff] }
 0x3a8   :  { %v1405_v6 = vmul.f32 %v1383_v59, %v3721_v5  ;;  %v1393_v8 = vmul.f32 %v2572_v50, %v1392_v53  ;;  %v3744_v5 = vld [vmem:[#allocation5 + $0x1e0] sm:$0xff]  ;;  %v3868_v49 = vld [vmem:[#allocation5 + $0xa8] sm:$0xff]  ;;  %v3870_v53 = vld [vmem:[#allocation5 + $0xb0] sm:$0xff] }
 0x3a9   :  { %1695 = vmatpush.msrb.mxu0 %v3744_v5  ;;  %1762 = vmatpush.msra.mxu3 %v3836_v61 }
 0x3aa   :  { %v3735_v24 = vadd.f32 %v1406_v4, %v1405_v6  ;;  %v1394_v60 = vadd.f32 %v2572_v50, %v1393_v8  ;;  %1725 = vmatpush.msrb.mxu1 %v3868_v49  ;;  %v3874_v6 = vld [vmem:[#allocation5 + $0xb8] sm:$0xff]  ;;  %1745 = vmatpush.msra.mxu2 %v3870_v53  ;;  %v3878_v8 = vld [vmem:[#allocation5 + $0x80] sm:$0xff] }
 0x3ab   :  { %1696 = vmatpush.msrb.mxu0 %v3756_v21  ;;  %1763 = vmatpush.msra.mxu3 %v3848_v18 }
 0x3ac   :  { %2575 = vtanh.f32 %v3735_v24  ;;  %v1398_v33 = vsel %vm1397_vm11, %v2572_v50, %v1394_v60  ;;  %v3852_v50 = vld [vmem:[#allocation5 + $0xc0] sm:$0xff]  ;;  %v3880_v60 = vld [vmem:[#allocation5 + $0x88] sm:$0xff]  ;;  %1746 = vmatpush.msra.mxu2 %v3882_v1 }
 0x3ad   :  { %v1403_v23 = vsel %vm1400_vm12, %v1402_v0, %v1398_v33  ;;  %1697 = vmatpush.msrb.mxu0 %v3768_v54  ;;  %1764 = vmatpush.msra.mxu3 %v3862_v39  ;;  %v3888_v33 = vld [vmem:[#allocation5 + $0x60] sm:$0xff]  ;;  %v3890_v0 = vld [vmem:[#allocation5 + $0x68] sm:$0xff] }
 0x3ae   :  { %1726 = vmatpush.msrb.mxu1 %v3880_v60  ;;  %4437 = vst [vmem:[#allocation50_spill] sm:$0xff] %v3888_v33 }
 0x3af   :  { %1698 = vmatpush.msrb.mxu0 %v3780_v29  ;;  %1765 = vmatpush.msra.mxu3 %v3874_v6  ;;  %4438 = vst [vmem:[#allocation51_spill] sm:$0xff] %v3890_v0 }
 0x3b0   :  { %1727 = vmatpush.msrb.mxu1 %v3890_v0 }
 0x3b1   :  { %1699 = vmatpush.msrb.mxu0 %v3792_v7  ;;  %1766 = vmatpush.msra.mxu3 %v3886_v48 }
 0x3b2   :  { %v2576_v30 = vpop.eup %2575 }
 0x3b3   :  { %v3738_v36 = vmul.f32 %v2576_v30, %v1403_v23  ;;  %1700 = vmatpush.msrb.mxu0 %v3804_v3  ;;  %v3894_v30 = vld [vmem:[#allocation5 + $0x70] sm:$0xff]  ;;  %v3896_v23 = vld [vmem:[#allocation5 + $0x78] sm:$0xff] }
 0x3b4   :  { %4439 = vst [vmem:[#allocation52_spill] sm:$0xff] %v3894_v30  ;;  %1747 = vmatpush.msra.mxu2 %v3894_v30  ;;  %1767 = vmatpush.msra.mxu3 %v3896_v23 }
 0x3b5   :  { %4434 = vst [vmem:[#allocation49_spill] sm:$0xff] %v3738_v36  ;;  %1495 = vmatmul.f32.vlgmr.msra.gmra.mxu0 %v3738_v36  ;;  %1515 = vmatmul.f32.vlgmr.msra.gmra.mxu1 %v3738_v36 }
 0x3b6   :  { %1535 = vmatmul.f32.vlgmr.msrb.gmra.mxu2 %v3738_v36  ;;  %1555 = vmatmul.f32.vlgmr.msrb.gmra.mxu3 %v3738_v36  ;;  %4440 = vst [vmem:[#allocation53_spill] sm:$0xff] %v3896_v23  ;;  %v3913_v36 = vld [vmem:[#allocation5 + $0x28] sm:$0xff] }
 0x3b7   :  { %1701 = vmatpush.msrb.mxu0 %v3816_v35 }
 0x3b9   :  { %1702 = vmatpush.msrb.mxu0 %v3828_v51 }
 0x3bb   :  { %1703 = vmatpush.msrb.mxu0 %v3840_v2 }
 0x3bd   :  { %1704 = vmatpush.msrb.mxu0 %v3852_v50 }
 0x3bf   :  { %1705 = vmatpush.msrb.mxu0 %v3866_v63 }
 0x3c1   :  { %1706 = vmatpush.msrb.mxu0 %v3878_v8 }
 0x3c3   :  { %1707 = vmatpush.msrb.mxu0 %v3888_v33 }
 0x432   :  { %v1496_v19 = vpop.f32.mrf.mxu0  ;;  %v1516_v43 = vpop.f32.mrf.mxu1 }
 0x433   :  { %v1559_v38 = vadd.f32 %v1496_v19, %v4435_v41  ;;  %v1560_v62 = vadd.f32 %v1516_v43, %v4436_v42  ;;  %v3898_v19 = vld [vmem:[#allocation5 + $0x40] sm:$0xff]  ;;  %v3902_v41 = vld [vmem:[#allocation5 + $0x48] sm:$0xff]  ;;  %v3906_v42 = vld [vmem:[#allocation5 + $0x58] sm:$0xff] }
 0x434   :  { %4441 = vst [vmem:[#allocation34_spill] sm:$0xff] %v3898_v19  ;;  %1708 = vmatpush.msrb.mxu0 %v3898_v19  ;;  %1728 = vmatpush.msrb.mxu1 %v3902_v41  ;;  %v3929_v19 = vld [vmem:[#allocation5 + $0x10] sm:$0xff] }
 0x435   :  { %v2466_v59 = vmul.f32 -1.442695, %v1559_v38  ;;  %v2467_v4 = vmul.f32 -1.442695, %v1560_v62  ;;  %4442 = vst [vmem:[#allocation35_spill] sm:$0xff] %v3902_v41  ;;  %v3904_v38 = vld [vmem:[#allocation5 + $0x50] sm:$0xff]  ;;  %1768 = vmatpush.msra.mxu3 %v3906_v42 }
 0x436   :  { %v4443_v62 = vld [vmem:[#allocation27_spill] sm:$0xff]  ;;  %1748 = vmatpush.msra.mxu2 %v3904_v38  ;;  %1729 = vmatpush.msrb.mxu1 %v3913_v36 }
 0x437   :  { %2577 = vpow2.f32 %v2466_v59  ;;  %v3931_v41 = vld [vmem:[#allocation5 + $0x18] sm:$0xff]  ;;  %1769 = vmatpush.msra.mxu3 %v3919_v31 }
 0x438   :  { %2579 = vpow2.f32 %v2467_v4  ;;  %v3911_v4 = vld [vmem:[#allocation5 + $0x20] sm:$0xff]  ;;  %1749 = vmatpush.msra.mxu2 %v3917_v32 }
 0x439   :  { %v1556_v43 = vpop.f32.mrf.mxu3  ;;  %1709 = vmatpush.msrb.mxu0 %v3911_v4  ;;  %1770 = vmatpush.msra.mxu3 %v3931_v41 }
 0x43a   :  { %v1562_v59 = vadd.f32 %v1556_v43, %v4443_v62  ;;  %v3923_v43 = vld [vmem:[#allocation5] sm:$0xff]  ;;  %v3925_v62 = vld [vmem:[#allocation5 + $0x8] sm:$0xff]  ;;  %1750 = vmatpush.msra.mxu2 %v3929_v19 }
 0x43b   :  { %1710 = vmatpush.msrb.mxu0 %v3923_v43  ;;  %1730 = vmatpush.msrb.mxu1 %v3925_v62 }
 0x43c   :  { %v2468_v0 = vmul.f32 -1.442695, %v1562_v59  ;;  %1951 = vmatpush.msrb.mxu2 %v3748_v40  ;;  %1971 = vmatpush.msrb.mxu3 %v3752_v15 }
 0x43d   :  { %v2578_v23 = vpop.eup %2577  ;;  %1911 = vmatpush.msra.mxu0 %v3744_v5  ;;  %1931 = vmatpush.msra.mxu1 %v3746_v20  ;;  %v4444_v20 = vld [vmem:[#allocation26_spill] sm:$0xff] }
 0x43e   :  { %v2580_v30 = vpop.eup %2579  ;;  %v3933_v33 = vadd.f32 1.0, %v2578_v23  ;;  %2581 = vpow2.f32 %v2468_v0  ;;  %v1536_v0 = vpop.f32.mrf.mxu2  ;;  %1952 = vmatpush.msrb.mxu2 %v3760_v14  ;;  %1972 = vmatpush.msrb.mxu3 %v3764_v13 }
 0x43f   :  { %v3937_v59 = vadd.f32 1.0, %v2580_v30  ;;  %1912 = vmatpush.msra.mxu0 %v3756_v21  ;;  %1932 = vmatpush.msra.mxu1 %v3758_v9  ;;  %v1561_v40 = vadd.f32 %v1536_v0, %v4444_v20  ;;  %v2076_v0 = vld [vmem:[#allocation7 + $0x48] sm:$0xff]  ;;  %v2075_v20 = vld [vmem:[#allocation7 + $0x40] sm:$0xff] }
 0x440   :  { %2583 = vrcp.f32 %v3933_v33  ;;  %1953 = vmatpush.msrb.mxu2 %v3772_v26  ;;  %1973 = vmatpush.msrb.mxu3 %v3776_v27  ;;  %v1576_v27 = vand.u32 2147483647, %v3933_v33  ;;  %vm1572_vm15 = vweird.f32 %v3933_v33 }
 0x441   :  { %2585 = vrcp.f32 %v3937_v59  ;;  %1913 = vmatpush.msra.mxu0 %v3768_v54  ;;  %1933 = vmatpush.msra.mxu1 %v3770_v17  ;;  %v1578_v54 = vand.u32 2147483648, %v3933_v33  ;;  %v1597_v17 = vand.u32 2147483648, %v3937_v59  ;;  %vm1591_vm0 = vweird.f32 %v3937_v59 }
 0x442   :  { %1954 = vmatpush.msrb.mxu2 %v3784_v37  ;;  %1974 = vmatpush.msrb.mxu3 %v3788_v56  ;;  %vm1577_vm3 = vcmp.eq.f32.partialorder %v1576_v27, 8.507059e+37  ;;  %v4087_v27 = vld [vmem:[#allocation9 + $0x30] sm:$0xff] }
 0x443   :  { %1914 = vmatpush.msra.mxu0 %v3780_v29  ;;  %1934 = vmatpush.msra.mxu1 %v3782_v34  ;;  %v1595_v34 = vand.u32 2147483647, %v3937_v59 }
 0x444   :  { %v2582_v30 = vpop.eup %2581  ;;  %1955 = vmatpush.msrb.mxu2 %v3796_v47  ;;  %1975 = vmatpush.msrb.mxu3 %v3800_v45  ;;  %v1598_v45 = vor.u32 1.1754944e-38, %v1597_v17 }
 0x445   :  { %v3953_v23 = vadd.f32 1.0, %v2582_v30  ;;  %1915 = vmatpush.msra.mxu0 %v3792_v7  ;;  %1935 = vmatpush.msra.mxu1 %v3794_v12  ;;  %v1579_v7 = vor.u32 1.1754944e-38, %v1578_v54  ;;  %vm1596_vm4 = vcmp.eq.f32.partialorder %v1595_v34, 8.507059e+37  ;;  %v4069_v30 = vld [vmem:[#allocation9 + $0x50] sm:$0xff]  ;;  %v4453_v54 = vld [vmem:[#allocation29_spill] sm:$0xff]  ;;  %v2071_v34 = vld [vmem:[#allocation7 + $0x20] sm:$0xff] }
 0x446   :  { %v2584_v5 = vpop.eup %2583  ;;  %1956 = vmatpush.msrb.mxu2 %v3808_v16  ;;  %1976 = vmatpush.msrb.mxu3 %v3812_v46 }
 0x447   :  { %v2586_v15 = vpop.eup %2585  ;;  %v1568_v21 = vmul.f32 %v2584_v5, %v3933_v33  ;;  %2587 = vrcp.f32 %v3953_v23  ;;  %vm1573_vm13 = vweird.f32 %v2584_v5  ;;  %1916 = vmatpush.msra.mxu0 %v3804_v3  ;;  %1936 = vmatpush.msra.mxu1 %v3806_v28  ;;  %vm1611_vm6 = vweird.f32 %v3953_v23  ;;  %v4057_v33 = vld [vmem:[#allocation9 + $0x60] sm:$0xff] }
 0x448   :  { %v1587_v9 = vmul.f32 %v2586_v15, %v3937_v59  ;;  %2589 = vtanh.f32 %v1561_v40  ;;  %vm1592_vm14 = vweird.f32 %v2586_v15  ;;  %vm1574_vm1 = vmor %vm1572_vm15, %vm1573_vm13  ;;  %1957 = vmatpush.msrb.mxu2 %v3820_v52  ;;  %1977 = vmatpush.msrb.mxu3 %v3824_v58  ;;  %v4074_v40 = vld [vmem:[#allocation9 + $0x48] sm:$0xff] }
 0x449   :  { %v1569_v14 = vsub.f32 1.0, %v1568_v21  ;;  %1917 = vmatpush.msra.mxu0 %v3816_v35  ;;  %1937 = vmatpush.msra.mxu1 %v3818_v44  ;;  %vm1593_vm2 = vmor %vm1591_vm0, %vm1592_vm14  ;;  %v4079_v21 = vld [vmem:[#allocation9 + $0x40] sm:$0xff] }
 0x44a   :  { %v1588_v13 = vsub.f32 1.0, %v1587_v9  ;;  %1958 = vmatpush.msrb.mxu2 %v3832_v57  ;;  %1978 = vmatpush.msrb.mxu3 %v3836_v61  ;;  %v1617_v57 = vand.u32 2147483648, %v3953_v23  ;;  %v1615_v61 = vand.u32 2147483647, %v3953_v23  ;;  %v2073_v9 = vld [vmem:[#allocation7 + $0x30] sm:$0xff] }
 0x44b   :  { %v1570_v26 = vmul.f32 %v2584_v5, %v1569_v14  ;;  %1918 = vmatpush.msra.mxu0 %v3828_v51  ;;  %1938 = vmatpush.msra.mxu1 %v3830_v55  ;;  %v4081_v14 = vld [vmem:[#allocation9 + $0x38] sm:$0xff] }
 0x44c   :  { %v1589_v29 = vmul.f32 %v2586_v15, %v1588_v13  ;;  %1959 = vmatpush.msrb.mxu2 %v3844_v11  ;;  %1979 = vmatpush.msrb.mxu3 %v3848_v18  ;;  %v4446_v11 = vld [vmem:[#allocation51_spill] sm:$0xff]  ;;  %v1618_v18 = vor.u32 1.1754944e-38, %v1617_v57  ;;  %vm1616_vm8 = vcmp.eq.f32.partialorder %v1615_v61, 8.507059e+37  ;;  %v4454_v61 = vld [vmem:[#allocation28_spill] sm:$0xff] }
 0x44d   :  { %v3979_v37 = vpop.eup %2587  ;;  %v1571_v56 = vadd.f32 %v2584_v5, %v1570_v26  ;;  %1919 = vmatpush.msra.mxu0 %v3840_v2  ;;  %1939 = vmatpush.msra.mxu1 %v3842_v10  ;;  %v4445_v10 = vld [vmem:[#allocation50_spill] sm:$0xff]  ;;  %v2072_v26 = vld [vmem:[#allocation7 + $0x28] sm:$0xff] }
 0x44e   :  { %v1590_v12 = vadd.f32 %v2586_v15, %v1589_v29  ;;  %v1607_v47 = vmul.f32 %v3979_v37, %v3953_v23  ;;  %v2590_v28 = vpop.eup %2589  ;;  %1960 = vmatpush.msrb.mxu2 %v3856_v25  ;;  %1980 = vmatpush.msrb.mxu3 %v3862_v39  ;;  %vm1612_vm5 = vweird.f32 %v3979_v37  ;;  %v4449_v25 = vld [vmem:[#allocation34_spill] sm:$0xff]  ;;  %v4450_v39 = vld [vmem:[#allocation35_spill] sm:$0xff] }
 0x44f   :  { %v1575_v3 = vsel %vm1574_vm1, %v2584_v5, %v1571_v56  ;;  %1920 = vmatpush.msra.mxu0 %v3852_v50  ;;  %1940 = vmatpush.msra.mxu1 %v3854_v22  ;;  %vm1613_vm7 = vmor %vm1611_vm6, %vm1612_vm5  ;;  %v4447_v50 = vld [vmem:[#allocation52_spill] sm:$0xff]  ;;  %v4448_v22 = vld [vmem:[#allocation53_spill] sm:$0xff] }
 0x450   :  { %v1580_v16 = vsel %vm1577_vm3, %v1579_v7, %v1575_v3  ;;  %v1594_v46 = vsel %vm1593_vm2, %v2586_v15, %v1590_v12  ;;  %v1608_v35 = vsub.f32 1.0, %v1607_v47  ;;  %1961 = vmatpush.msrb.mxu2 %v3870_v53  ;;  %1981 = vmatpush.msrb.mxu3 %v3874_v6  ;;  %v2080_v6 = vld [vmem:[#allocation7 + $0x68] sm:$0xff]  ;;  %v2074_v15 = vld [vmem:[#allocation7 + $0x38] sm:$0xff]  ;;  %v4105_v3 = vld [vmem:[#allocation9 + $0x20] sm:$0xff] }
 0x451   :  { %v1599_v44 = vsel %vm1596_vm4, %v1598_v45, %v1594_v46  ;;  %v1622_v52 = vmul.f32 %v2590_v28, %v1580_v16  ;;  %1921 = vmatpush.msra.mxu0 %v3866_v63  ;;  %1941 = vmatpush.msra.mxu1 %v3868_v49  ;;  %v2070_v45 = vld [vmem:[#allocation7 + $0x18] sm:$0xff]  ;;  %v2069_v28 = vld [vmem:[#allocation7 + $0x10] sm:$0xff]  ;;  %v2068_v46 = vld [vmem:[#allocation7 + $0x8] sm:$0xff] }
 0x452   :  { %v1621_v58 = vmul.f32 %v1599_v44, %v3735_v24  ;;  %v1609_v51 = vmul.f32 %v3979_v37, %v1608_v35  ;;  %1962 = vmatpush.msrb.mxu2 %v3882_v1  ;;  %1982 = vmatpush.msrb.mxu3 %v3886_v48  ;;  %v4052_v1 = vld [vmem:[#allocation9 + $0x68] sm:$0xff]  ;;  %v2078_v48 = vld [vmem:[#allocation7 + $0x58] sm:$0xff]  ;;  %v4113_v35 = vld [vmem:[#allocation9 + $0x10] sm:$0xff] }
 0x453   :  { %1922 = vmatpush.msra.mxu0 %v3878_v8  ;;  %1942 = vmatpush.msra.mxu1 %v3880_v60  ;;  %v4047_v8 = vld [vmem:[#allocation9 + $0x70] sm:$0xff]  ;;  %v2079_v60 = vld [vmem:[#allocation7 + $0x60] sm:$0xff]  ;;  %v4111_v16 = vld [vmem:[#allocation9 + $0x18] sm:$0xff] }
 0x454   :  { %v4003_v55 = vadd.f32 %v1622_v52, %v1621_v58  ;;  %v1610_v24 = vadd.f32 %v3979_v37, %v1609_v51  ;;  %1963 = vmatpush.msrb.mxu2 %v4447_v50  ;;  %1983 = vmatpush.msrb.mxu3 %v4448_v22  ;;  %v2067_v58 = vld [vmem:[#allocation7] sm:$0xff]  ;;  %v4118_v51 = vld [vmem:[#allocation9 + $0x8] sm:$0xff] }
 0x455   :  { %1923 = vmatpush.msra.mxu0 %v4445_v10  ;;  %1943 = vmatpush.msra.mxu1 %v4446_v11 }
 0x456   :  { %2591 = vtanh.f32 %v4003_v55  ;;  %v1614_v2 = vsel %vm1613_vm7, %v3979_v37, %v1610_v24  ;;  %1964 = vmatpush.msrb.mxu2 %v3904_v38  ;;  %1984 = vmatpush.msrb.mxu3 %v3906_v42  ;;  %v2077_v38 = vld [vmem:[#allocation7 + $0x50] sm:$0xff]  ;;  %v4062_v42 = vld [vmem:[#allocation9 + $0x58] sm:$0xff]  ;;  %v4092_v37 = vld [vmem:[#allocation9 + $0x28] sm:$0xff] }
 0x457   :  { %1924 = vmatpush.msra.mxu0 %v4449_v25  ;;  %1944 = vmatpush.msra.mxu1 %v4450_v39  ;;  %v1619_v49 = vsel %vm1616_vm8, %v1618_v18, %v1614_v2  ;;  %v4131_v18 = vld [vmem:[#allocation9] sm:$0xff] }
 0x458   :  { %1965 = vmatpush.msrb.mxu2 %v3917_v32  ;;  %1985 = vmatpush.msrb.mxu3 %v3919_v31  ;;  %v2081_v32 = vld [vmem:[#allocation7 + $0x70] sm:$0xff]  ;;  %v4044_v31 = vld [vmem:[#allocation9 + $0x78] sm:$0xff] }
 0x459   :  { %1925 = vmatpush.msra.mxu0 %v3911_v4  ;;  %1945 = vmatpush.msra.mxu1 %v3913_v36  ;;  %v2082_v36 = vld [vmem:[#allocation7 + $0x78] sm:$0xff]  ;;  %v4451_v4 = vld [vmem:[#allocation14_spill] sm:$0xff] }
 0x45a   :  { %1966 = vmatpush.msrb.mxu2 %v3929_v19  ;;  %1986 = vmatpush.msrb.mxu3 %v3931_v41 }
 0x45b   :  { %1926 = vmatpush.msra.mxu0 %v3923_v43  ;;  %1946 = vmatpush.msra.mxu1 %v3925_v62  ;;  %v4452_v62 = vld [vmem:[#allocation15_spill] sm:$0xff] }
 0x45c   :  { %v2592_v63 = vpop.eup %2591 }
 0x45d   :  { %v4030_v53 = vmul.f32 %v2592_v63, %v1619_v49 }
 0x45f   :  { %1711 = vmatmul.f32.vlgmr.msrb.gmra.mxu0 %v4030_v53  ;;  %1731 = vmatmul.f32.vlgmr.msrb.gmra.mxu1 %v4030_v53 }
 0x460   :  { %1751 = vmatmul.f32.vlgmr.msra.gmra.mxu2 %v4030_v53  ;;  %1771 = vmatmul.f32.vlgmr.msra.gmra.mxu3 %v4030_v53 }
 0x461   :  { %2087 = vmatpush.msrb.mxu0 %v2082_v36  ;;  %2154 = vmatpush.msrb.mxu1 %v4044_v31 }
 0x462   :  { %2184 = vmatpush.msra.mxu2 %v4044_v31  ;;  %2214 = vmatpush.msra.mxu3 %v4044_v31 }
 0x463   :  { %2088 = vmatpush.msrb.mxu0 %v2081_v32  ;;  %2155 = vmatpush.msrb.mxu1 %v4047_v8 }
 0x464   :  { %2185 = vmatpush.msra.mxu2 %v4047_v8  ;;  %2215 = vmatpush.msra.mxu3 %v4047_v8 }
 0x465   :  { %2089 = vmatpush.msrb.mxu0 %v2080_v6  ;;  %2156 = vmatpush.msrb.mxu1 %v4052_v1 }
 0x466   :  { %2186 = vmatpush.msra.mxu2 %v4052_v1  ;;  %2216 = vmatpush.msra.mxu3 %v4052_v1 }
 0x467   :  { %2090 = vmatpush.msrb.mxu0 %v2079_v60  ;;  %2157 = vmatpush.msrb.mxu1 %v4057_v33 }
 0x468   :  { %2187 = vmatpush.msra.mxu2 %v4057_v33  ;;  %2217 = vmatpush.msra.mxu3 %v4057_v33 }
 0x469   :  { %2091 = vmatpush.msrb.mxu0 %v2078_v48  ;;  %2158 = vmatpush.msrb.mxu1 %v4062_v42 }
 0x46a   :  { %2188 = vmatpush.msra.mxu2 %v4062_v42  ;;  %2218 = vmatpush.msra.mxu3 %v4062_v42 }
 0x46b   :  { %2092 = vmatpush.msrb.mxu0 %v2077_v38  ;;  %2159 = vmatpush.msrb.mxu1 %v4069_v30 }
 0x46c   :  { %2189 = vmatpush.msra.mxu2 %v4069_v30  ;;  %2219 = vmatpush.msra.mxu3 %v4069_v30 }
 0x46d   :  { %2093 = vmatpush.msrb.mxu0 %v2076_v0  ;;  %2160 = vmatpush.msrb.mxu1 %v4074_v40 }
 0x46e   :  { %2190 = vmatpush.msra.mxu2 %v4074_v40  ;;  %2220 = vmatpush.msra.mxu3 %v4074_v40 }
 0x46f   :  { %2094 = vmatpush.msrb.mxu0 %v2075_v20  ;;  %2161 = vmatpush.msrb.mxu1 %v4079_v21 }
 0x470   :  { %2191 = vmatpush.msra.mxu2 %v4079_v21  ;;  %2221 = vmatpush.msra.mxu3 %v4079_v21 }
 0x471   :  { %2095 = vmatpush.msrb.mxu0 %v2074_v15  ;;  %2162 = vmatpush.msrb.mxu1 %v4081_v14 }
 0x472   :  { %2192 = vmatpush.msra.mxu2 %v4081_v14  ;;  %2222 = vmatpush.msra.mxu3 %v4081_v14 }
 0x473   :  { %2096 = vmatpush.msrb.mxu0 %v2073_v9  ;;  %2163 = vmatpush.msrb.mxu1 %v4087_v27 }
 0x474   :  { %2193 = vmatpush.msra.mxu2 %v4087_v27  ;;  %2223 = vmatpush.msra.mxu3 %v4087_v27 }
 0x475   :  { %2097 = vmatpush.msrb.mxu0 %v2072_v26  ;;  %2164 = vmatpush.msrb.mxu1 %v4092_v37 }
 0x476   :  { %2194 = vmatpush.msra.mxu2 %v4092_v37  ;;  %2224 = vmatpush.msra.mxu3 %v4092_v37 }
 0x477   :  { %2098 = vmatpush.msrb.mxu0 %v2071_v34  ;;  %2165 = vmatpush.msrb.mxu1 %v4105_v3 }
 0x478   :  { %2195 = vmatpush.msra.mxu2 %v4105_v3  ;;  %2225 = vmatpush.msra.mxu3 %v4105_v3 }
 0x479   :  { %2099 = vmatpush.msrb.mxu0 %v2070_v45  ;;  %2166 = vmatpush.msrb.mxu1 %v4111_v16 }
 0x47a   :  { %2196 = vmatpush.msra.mxu2 %v4111_v16  ;;  %2226 = vmatpush.msra.mxu3 %v4111_v16 }
 0x47b   :  { %2100 = vmatpush.msrb.mxu0 %v2069_v28  ;;  %2167 = vmatpush.msrb.mxu1 %v4113_v35  ;;  %v4455_v28 = vld [vmem:[#allocation32_spill] sm:$0xff] }
 0x47c   :  { %2197 = vmatpush.msra.mxu2 %v4113_v35  ;;  %2227 = vmatpush.msra.mxu3 %v4113_v35 }
 0x47d   :  { %2101 = vmatpush.msrb.mxu0 %v2068_v46  ;;  %2168 = vmatpush.msrb.mxu1 %v4118_v51  ;;  %v4456_v46 = vmov 0.0  }
 0x47e   :  { %2198 = vmatpush.msra.mxu2 %v4118_v51  ;;  %2228 = vmatpush.msra.mxu3 %v4118_v51 }
 0x47f   :  { %2102 = vmatpush.msrb.mxu0 %v2067_v58  ;;  %2169 = vmatpush.msrb.mxu1 %v4131_v18  ;;  %v4459_v58 = vld [vmem:[#allocation48_spill] sm:$0xff] }
 0x480   :  { %2199 = vmatpush.msra.mxu2 %v4131_v18  ;;  %2229 = vmatpush.msra.mxu3 %v4131_v18 }
 0x4dc   :  { %v1712_v19 = vpop.f32.mrf.mxu0  ;;  %v1732_v41 = vpop.f32.mrf.mxu1 }
 0x4dd   :  { %v1775_v43 = vadd.f32 %v1712_v19, %v4451_v4  ;;  %v1776_v59 = vadd.f32 %v1732_v41, %v4452_v62 }
 0x4df   :  { %v2469_v23 = vmul.f32 -1.442695, %v1775_v43  ;;  %v2470_v5 = vmul.f32 -1.442695, %v1776_v59 }
 0x4e1   :  { %2593 = vpow2.f32 %v2469_v23 }
 0x4e2   :  { %2595 = vpow2.f32 %v2470_v5 }
 0x4e3   :  { %v1772_v13 = vpop.f32.mrf.mxu3  ;;  %v1752_v44 = vpop.f32.mrf.mxu2 }
 0x4e4   :  { %v1778_v17 = vadd.f32 %v1772_v13, %v4453_v54  ;;  %v1777_v2 = vadd.f32 %v1752_v44, %v4454_v61  ;;  %v4457_v44 = vld [vmem:[#allocation33_spill] sm:$0xff] }
 0x4e6   :  { %v2471_v29 = vmul.f32 -1.442695, %v1778_v17 }
 0x4e7   :  { %v2594_v56 = vpop.eup %2593 }
 0x4e8   :  { %v2596_v7 = vpop.eup %2595  ;;  %v4097_v12 = vadd.f32 1.0, %v2594_v56  ;;  %2597 = vpow2.f32 %v2471_v29  ;;  %v4156_v29 = vld [vmem:[%s4303_s7] sm:$0xff] }
 0x4e9   :  { %v4101_v47 = vadd.f32 1.0, %v2596_v7  ;;  %vm2176_vm4 = vcmp.eq.s32.totalorder %v4156_v29, 1  ;;  %vm2206_vm6 = vcmp.eq.s32.totalorder %v4156_v29, 2 }
 0x4ea   :  { %2599 = vrcp.f32 %v4097_v12  ;;  %v1794_v39 = vand.u32 2147483648, %v4097_v12  ;;  %v1792_v36 = vand.u32 2147483647, %v4097_v12  ;;  %vm1788_vm11 = vweird.f32 %v4097_v12 }
 0x4eb   :  { %2601 = vrcp.f32 %v4101_v47  ;;  %v1813_v63 = vand.u32 2147483648, %v4101_v47  ;;  %v1811_v6 = vand.u32 2147483647, %v4101_v47  ;;  %vm1807_vm12 = vweird.f32 %v4101_v47 }
 0x4ec   :  { %v1795_v19 = vor.u32 1.1754944e-38, %v1794_v39  ;;  %vm1793_vm15 = vcmp.eq.f32.partialorder %v1792_v36, 8.507059e+37 }
 0x4ed   :  { %v1814_v4 = vor.u32 1.1754944e-38, %v1813_v63  ;;  %vm1812_vm0 = vcmp.eq.f32.partialorder %v1811_v6, 8.507059e+37 }
 0x4ee   :  { %v2598_v52 = vpop.eup %2597 }
 0x4ef   :  { %v4122_v24 = vadd.f32 1.0, %v2598_v52  ;;  %v4458_v52 = vld [vmem:[#allocation47_spill] sm:$0xff] }
 0x4f0   :  { %v2600_v57 = vpop.eup %2599 }
 0x4f1   :  { %v2602_v10 = vpop.eup %2601  ;;  %v1784_v11 = vmul.f32 %v2600_v57, %v4097_v12  ;;  %2603 = vrcp.f32 %v4122_v24  ;;  %vm1789_vm9 = vweird.f32 %v2600_v57  ;;  %v1833_v17 = vand.u32 2147483648, %v4122_v24 }
 0x4f2   :  { %v1803_v50 = vmul.f32 %v2602_v10, %v4101_v47  ;;  %2605 = vtanh.f32 %v1777_v2  ;;  %vm1808_vm10 = vweird.f32 %v2602_v10  ;;  %vm1790_vm13 = vmor %vm1788_vm11, %vm1789_vm9  ;;  %vm1827_vm2 = vweird.f32 %v4122_v24 }
 0x4f3   :  { %v1785_v22 = vsub.f32 1.0, %v1784_v11  ;;  %vm1809_vm14 = vmor %vm1807_vm12, %vm1808_vm10  ;;  %v1831_v26 = vand.u32 2147483647, %v4122_v24  ;;  %v1834_v7 = vor.u32 1.1754944e-38, %v1833_v17 }
 0x4f4   :  { %v1804_v25 = vsub.f32 1.0, %v1803_v50 }
 0x4f5   :  { %v1786_v49 = vmul.f32 %v2600_v57, %v1785_v22  ;;  %vm1832_vm5 = vcmp.eq.f32.partialorder %v1831_v26, 8.507059e+37 }
 0x4f6   :  { %v1805_v32 = vmul.f32 %v2602_v10, %v1804_v25 }
 0x4f7   :  { %v2604_v60 = vpop.eup %2603  ;;  %v1787_v48 = vadd.f32 %v2600_v57, %v1786_v49  ;;  %v4464_v49 = vld [vmem:[#allocation30_spill] sm:$0xff] }
 0x4f8   :  { %v1806_v41 = vadd.f32 %v2602_v10, %v1805_v32  ;;  %v1823_v38 = vmul.f32 %v2604_v60, %v4122_v24  ;;  %v2606_v62 = vpop.eup %2605  ;;  %vm1828_vm1 = vweird.f32 %v2604_v60  ;;  %v4460_v24 = vld [vmem:[#allocation49_spill] sm:$0xff] }
 0x4f9   :  { %v1791_v43 = vsel %vm1790_vm13, %v2600_v57, %v1787_v48  ;;  %vm1829_vm3 = vmor %vm1827_vm2, %vm1828_vm1 }
 0x4fa   :  { %v1796_v59 = vsel %vm1793_vm15, %v1795_v19, %v1791_v43  ;;  %v1810_v0 = vsel %vm1809_vm14, %v2602_v10, %v1806_v41  ;;  %v1824_v23 = vsub.f32 1.0, %v1823_v38 }
 0x4fb   :  { %v1815_v5 = vsel %vm1812_vm0, %v1814_v4, %v1810_v0  ;;  %v1838_v20 = vmul.f32 %v2606_v62, %v1796_v59 }
 0x4fc   :  { %v1837_v15 = vmul.f32 %v1815_v5, %v4003_v55  ;;  %v1825_v9 = vmul.f32 %v2604_v60, %v1824_v23  ;;  %v2729_v55 = vmov 0  }
 0x4fd   :  { %2493 = vset.pattern.permute.xlu0 %v2729_v55  ;;  %2494 = vset.pattern.permute.xlu1 %v2729_v55  ;;  %v2177_v56 = vsel %vm2176_vm4, 1, %v2729_v55 }
 0x4fe   :  { %v4147_v13 = vadd.f32 %v1838_v20, %v1837_v15  ;;  %v1826_v54 = vadd.f32 %v2604_v60, %v1825_v9  ;;  %2495 = vset.pattern.permute.xlu2 %v2729_v55  ;;  %2179 = vperm.xlu0 %2493, %v2177_v56  }
 0x500   :  { %2607 = vtanh.f32 %v4147_v13  ;;  %v1830_v34 = vsel %vm1829_vm3, %v2604_v60, %v1826_v54  ;;  %vm2236_vm3 = vcmp.eq.s32.totalorder %v4156_v29, 3 }
 0x501   :  { %v1835_v47 = vsel %vm1832_vm5, %v1834_v7, %v1830_v34 }
 0x506   :  { %v2608_v12 = vpop.eup %2607 }
 0x507   :  { %v4163_v45 = vmul.f32 %v2608_v12, %v1835_v47 }
 0x509   :  { %1927 = vmatmul.f32.vlgmr.msra.gmra.mxu0 %v4163_v45  ;;  %1947 = vmatmul.f32.vlgmr.msra.gmra.mxu1 %v4163_v45 }
 0x50a   :  { %1967 = vmatmul.f32.vlgmr.msrb.gmra.mxu2 %v4163_v45  ;;  %1987 = vmatmul.f32.vlgmr.msrb.gmra.mxu3 %v4163_v45 }
 0x50b   :  { %2244 = vmatpush.msra.mxu1 %v4044_v31  ;;  %2274 = vmatpush.msrb.mxu2 %v4044_v31 }
 0x50c   :  { %2304 = vmatpush.msrb.mxu3 %v4044_v31  ;;  %2334 = vmatpush.msra.mxu0 %v4044_v31 }
 0x50d   :  { %2245 = vmatpush.msra.mxu1 %v4047_v8  ;;  %2275 = vmatpush.msrb.mxu2 %v4047_v8 }
 0x50e   :  { %2305 = vmatpush.msrb.mxu3 %v4047_v8  ;;  %2335 = vmatpush.msra.mxu0 %v4047_v8 }
 0x50f   :  { %2246 = vmatpush.msra.mxu1 %v4052_v1  ;;  %2276 = vmatpush.msrb.mxu2 %v4052_v1 }
 0x510   :  { %2306 = vmatpush.msrb.mxu3 %v4052_v1  ;;  %2336 = vmatpush.msra.mxu0 %v4052_v1 }
 0x511   :  { %2103 = vmatmul.f32.vlgmr.msrb.gmra.mxu0 %v4455_v28  ;;  %2170 = vmatmul.f32.vlgmr.msrb.gmra.mxu1 %v4456_v46 }
 0x512   :  { %2247 = vmatpush.msra.mxu1 %v4057_v33  ;;  %2277 = vmatpush.msrb.mxu2 %v4057_v33 }
 0x513   :  { %2307 = vmatpush.msrb.mxu3 %v4057_v33  ;;  %2337 = vmatpush.msra.mxu0 %v4057_v33 }
 0x514   :  { %2248 = vmatpush.msra.mxu1 %v4062_v42  ;;  %2278 = vmatpush.msrb.mxu2 %v4062_v42 }
 0x515   :  { %2308 = vmatpush.msrb.mxu3 %v4062_v42  ;;  %2338 = vmatpush.msra.mxu0 %v4062_v42 }
 0x516   :  { %2249 = vmatpush.msra.mxu1 %v4069_v30  ;;  %2279 = vmatpush.msrb.mxu2 %v4069_v30 }
 0x517   :  { %2309 = vmatpush.msrb.mxu3 %v4069_v30  ;;  %2339 = vmatpush.msra.mxu0 %v4069_v30 }
 0x518   :  { %2250 = vmatpush.msra.mxu1 %v4074_v40  ;;  %2280 = vmatpush.msrb.mxu2 %v4074_v40 }
 0x519   :  { %2106 = vmatmul.f32.gmra.mxu0 %v4457_v44  ;;  %2310 = vmatpush.msrb.mxu3 %v4074_v40 }
 0x51a   :  { %2251 = vmatpush.msra.mxu1 %v4079_v21  ;;  %2281 = vmatpush.msrb.mxu2 %v4079_v21 }
 0x51b   :  { %2311 = vmatpush.msrb.mxu3 %v4079_v21  ;;  %2340 = vmatpush.msra.mxu0 %v4074_v40 }
 0x51c   :  { %2252 = vmatpush.msra.mxu1 %v4081_v14  ;;  %2282 = vmatpush.msrb.mxu2 %v4081_v14 }
 0x51d   :  { %2312 = vmatpush.msrb.mxu3 %v4081_v14  ;;  %2341 = vmatpush.msra.mxu0 %v4079_v21 }
 0x51e   :  { %2253 = vmatpush.msra.mxu1 %v4087_v27  ;;  %2283 = vmatpush.msrb.mxu2 %v4087_v27 }
 0x51f   :  { %2313 = vmatpush.msrb.mxu3 %v4087_v27  ;;  %2342 = vmatpush.msra.mxu0 %v4081_v14 }
 0x520   :  { %2254 = vmatpush.msra.mxu1 %v4092_v37  ;;  %2284 = vmatpush.msrb.mxu2 %v4092_v37 }
 0x521   :  { %2109 = vmatmul.f32.gmra.mxu0 %v4458_v52  ;;  %2314 = vmatpush.msrb.mxu3 %v4092_v37 }
 0x522   :  { %2255 = vmatpush.msra.mxu1 %v4105_v3  ;;  %2285 = vmatpush.msrb.mxu2 %v4105_v3 }
 0x523   :  { %2315 = vmatpush.msrb.mxu3 %v4105_v3  ;;  %2343 = vmatpush.msra.mxu0 %v4087_v27 }
 0x524   :  { %2256 = vmatpush.msra.mxu1 %v4111_v16  ;;  %2286 = vmatpush.msrb.mxu2 %v4111_v16 }
 0x525   :  { %2316 = vmatpush.msrb.mxu3 %v4111_v16  ;;  %2344 = vmatpush.msra.mxu0 %v4092_v37 }
 0x526   :  { %2257 = vmatpush.msra.mxu1 %v4113_v35  ;;  %2287 = vmatpush.msrb.mxu2 %v4113_v35 }
 0x527   :  { %2317 = vmatpush.msrb.mxu3 %v4113_v35  ;;  %2345 = vmatpush.msra.mxu0 %v4105_v3 }
 0x528   :  { %2258 = vmatpush.msra.mxu1 %v4118_v51  ;;  %2288 = vmatpush.msrb.mxu2 %v4118_v51 }
 0x529   :  { %2112 = vmatmul.f32.gmra.mxu0 %v4459_v58  ;;  %2318 = vmatpush.msrb.mxu3 %v4118_v51 }
 0x52a   :  { %2259 = vmatpush.msra.mxu1 %v4131_v18  ;;  %2289 = vmatpush.msrb.mxu2 %v4131_v18 }
 0x52b   :  { %2319 = vmatpush.msrb.mxu3 %v4131_v18  ;;  %2346 = vmatpush.msra.mxu0 %v4111_v16 }
 0x52c   :  { %2364 = vmatpush.msrb.mxu1 %v4044_v31 }
 0x52d   :  { %2347 = vmatpush.msra.mxu0 %v4113_v35 }
 0x52e   :  { %2365 = vmatpush.msrb.mxu1 %v4047_v8  ;;  %v4461_v8 = vld [vmem:[#allocation16_spill] sm:$0xff] }
 0x52f   :  { %2348 = vmatpush.msra.mxu0 %v4118_v51 }
 0x530   :  { %2366 = vmatpush.msrb.mxu1 %v4052_v1 }
 0x531   :  { %2115 = vmatmul.f32.gmra.mxu0 %v4460_v24 }
 0x532   :  { %2349 = vmatpush.msra.mxu0 %v4131_v18  ;;  %2367 = vmatpush.msrb.mxu1 %v4057_v33  ;;  %v4462_v33 = vld [vmem:[#allocation12_spill] sm:$0xff] }
 0x534   :  { %2368 = vmatpush.msrb.mxu1 %v4062_v42 }
 0x536   :  { %2369 = vmatpush.msrb.mxu1 %v4069_v30 }
 0x538   :  { %2370 = vmatpush.msrb.mxu1 %v4074_v40 }
 0x539   :  { %2118 = vmatmul.f32.gmra.mxu0 %v4030_v53 }
 0x53a   :  { %2371 = vmatpush.msrb.mxu1 %v4079_v21  ;;  %v4262_v21 = vld [vmem:[%s4302_s6] ss:$0 sm:$0xff] }
 0x53c   :  { %2372 = vmatpush.msrb.mxu1 %v4081_v14 }
 0x53e   :  { %2373 = vmatpush.msrb.mxu1 %v4087_v27  ;;  %v4463_v27 = vld [vmem:[#allocation31_spill] sm:$0xff] }
 0x540   :  { %2374 = vmatpush.msrb.mxu1 %v4092_v37 }
 0x541   :  { %2121 = vmatmul.f32.gmra.mxu0 %v4163_v45 }
 0x542   :  { %2375 = vmatpush.msrb.mxu1 %v4105_v3 }
 0x544   :  { %2376 = vmatpush.msrb.mxu1 %v4111_v16 }
 0x546   :  { %2377 = vmatpush.msrb.mxu1 %v4113_v35 }
 0x548   :  { %2378 = vmatpush.msrb.mxu1 %v4118_v51 }
 0x54a   :  { %2379 = vmatpush.msrb.mxu1 %v4131_v18  ;;  %v2207_v18 = vsel %vm2206_vm6, 1, %v2729_v55  ;;  %vm2266_vm6 = vcmp.eq.s32.totalorder %v4156_v29, 4 }
 0x54b   :  { %2209 = vperm.xlu0 %2493, %v2207_v18  }
 0x586   :  { %v1928_v53 = vpop.f32.mrf.mxu0  ;;  %v1948_v31 = vpop.f32.mrf.mxu1 }
 0x587   :  { %v1991_v1 = vadd.f32 %v1928_v53, %v4461_v8  ;;  %v1992_v42 = vadd.f32 %v1948_v31, %v4462_v33  ;;  %v2180_v33 = vpop.permute.xlu0 %2179 }
 0x588   :  { %vm2181_vm4 = vcmp.eq.s32.totalorder %v2180_v33, 1 }
 0x589   :  { %v2472_v30 = vmul.f32 -1.442695, %v1991_v1  ;;  %v2473_v40 = vmul.f32 -1.442695, %v1992_v42  ;;  %v2237_v1 = vsel %vm2236_vm3, 1, %v2729_v55 }
 0x58a   :  { %2239 = vperm.xlu1 %2494, %v2237_v1  }
 0x58b   :  { %2609 = vpow2.f32 %v2472_v30 }
 0x58c   :  { %2611 = vpow2.f32 %v2473_v40 }
 0x58d   :  { %v1988_v14 = vpop.f32.mrf.mxu3  ;;  %v1968_v50 = vpop.f32.mrf.mxu2 }
 0x58e   :  { %v1994_v37 = vadd.f32 %v1988_v14, %v4463_v27  ;;  %v2104_v3 = vpop.f32.mrf.mxu0  ;;  %v2171_v16 = vpop.f32.mrf.mxu1  ;;  %v1993_v36 = vadd.f32 %v1968_v50, %v4464_v49 }
 0x58f   :  { %v2105_v35 = vadd.f32 %v4262_v21, %v2104_v3 }
 0x590   :  { %v2474_v51 = vmul.f32 -1.442695, %v1994_v37 }
 0x591   :  { %v2610_v57 = vpop.eup %2609  ;;  %v2174_v61 = vadd.f32 %v2171_v16, %v2105_v35  ;;  %v2267_v16 = vsel %vm2266_vm6, 1, %v2729_v55 }
 0x592   :  { %v2612_v2 = vpop.eup %2611  ;;  %v1998_v10 = vadd.f32 1.0, %v2610_v57  ;;  %2613 = vpow2.f32 %v2474_v51  ;;  %2269 = vperm.xlu1 %2494, %v2267_v16  }
 0x593   :  { %v2017_v11 = vadd.f32 1.0, %v2612_v2  ;;  %2615 = vtanh.f32 %v2174_v61 }
 0x594   :  { %2617 = vrcp.f32 %v1998_v10  ;;  %v2010_v41 = vand.u32 2147483648, %v1998_v10  ;;  %v2008_v43 = vand.u32 2147483647, %v1998_v10  ;;  %vm2004_vm9 = vweird.f32 %v1998_v10 }
 0x595   :  { %2619 = vrcp.f32 %v2017_v11  ;;  %v2029_v38 = vand.u32 2147483648, %v2017_v11  ;;  %v2027_v59 = vand.u32 2147483647, %v2017_v11  ;;  %vm2023_vm10 = vweird.f32 %v2017_v11 }
 0x596   :  { %v2011_v5 = vor.u32 1.1754944e-38, %v2010_v41  ;;  %vm2009_vm12 = vcmp.eq.f32.partialorder %v2008_v43, 8.507059e+37 }
 0x597   :  { %v2030_v9 = vor.u32 1.1754944e-38, %v2029_v38  ;;  %vm2028_vm14 = vcmp.eq.f32.partialorder %v2027_v59, 8.507059e+37 }
 0x598   :  { %v2614_v22 = vpop.eup %2613 }
 0x599   :  { %v4268_v25 = vpop.eup %2615  ;;  %v2037_v39 = vadd.f32 1.0, %v2614_v22 }
 0x59a   :  { %v2618_v63 = vpop.eup %2617  ;;  %2200 = vmatmul.f32.vlgmr.msra.gmra.mxu2 %v4268_v25  ;;  %v2182_v37 = vsel %vm2181_vm4, %v4268_v25, 0.0 }
 0x59b   :  { %v2620_v32 = vpop.eup %2619  ;;  %v2000_v6 = vmul.f32 %v2618_v63, %v1998_v10  ;;  %2621 = vrcp.f32 %v2037_v39  ;;  %vm2005_vm7 = vweird.f32 %v2618_v63  ;;  %v2049_v44 = vand.u32 2147483648, %v2037_v39 }
 0x59c   :  { %v2019_v60 = vmul.f32 %v2620_v32, %v2017_v11  ;;  %2623 = vtanh.f32 %v1993_v36  ;;  %vm2024_vm8 = vweird.f32 %v2620_v32  ;;  %vm2006_vm11 = vmor %vm2004_vm9, %vm2005_vm7  ;;  %vm2043_vm0 = vweird.f32 %v2037_v39 }
 0x59d   :  { %v2001_v48 = vsub.f32 1.0, %v2000_v6  ;;  %vm2025_vm13 = vmor %vm2023_vm10, %vm2024_vm8  ;;  %v2047_v52 = vand.u32 2147483647, %v2037_v39  ;;  %v2050_v24 = vor.u32 1.1754944e-38, %v2049_v44  ;;  %vm2296_vm8 = vcmp.eq.s32.totalorder %v4156_v29, 5 }
 0x59e   :  { %v2020_v19 = vsub.f32 1.0, %v2019_v60  ;;  %v2297_v18 = vsel %vm2296_vm8, 1, %v2729_v55  ;;  %vm2326_vm10 = vcmp.eq.s32.totalorder %v4156_v29, 6 }
 0x59f   :  { %v2002_v4 = vmul.f32 %v2618_v63, %v2001_v48  ;;  %vm2048_vm2 = vcmp.eq.f32.partialorder %v2047_v52, 8.507059e+37  ;;  %2299 = vperm.xlu2 %2495, %v2297_v18  }
 0x5a0   :  { %v2021_v62 = vmul.f32 %v2620_v32, %v2020_v19 }
 0x5a1   :  { %v2622_v0 = vpop.eup %2621  ;;  %v2003_v23 = vadd.f32 %v2618_v63, %v2002_v4 }
 0x5a2   :  { %v2022_v20 = vadd.f32 %v2620_v32, %v2021_v62  ;;  %v2039_v15 = vmul.f32 %v2622_v0, %v2037_v39  ;;  %v2624_v17 = vpop.eup %2623  ;;  %vm2044_vm15 = vweird.f32 %v2622_v0 }
 0x5a3   :  { %v2007_v54 = vsel %vm2006_vm11, %v2618_v63, %v2003_v23  ;;  %vm2045_vm1 = vmor %vm2043_vm0, %vm2044_vm15 }
 0x5a4   :  { %v2012_v26 = vsel %vm2009_vm12, %v2011_v5, %v2007_v54  ;;  %v2026_v34 = vsel %vm2025_vm13, %v2620_v32, %v2022_v20  ;;  %v2040_v56 = vsub.f32 1.0, %v2039_v15  ;;  %v2327_v32 = vsel %vm2326_vm10, 1, %v2729_v55 }
 0x5a5   :  { %v2054_v7 = vmul.f32 %v2624_v17, %v2012_v26  ;;  %v2031_v12 = vsel %vm2028_vm14, %v2030_v9, %v2026_v34  ;;  %vm2356_vm12 = vcmp.eq.s32.totalorder %v4156_v29, 7  ;;  %vm2386_vm14 = vcmp.eq.s32.totalorder %v4156_v29, 8 }
 0x5a6   :  { %v2041_v47 = vmul.f32 %v2622_v0, %v2040_v56  ;;  %v2053_v45 = vmul.f32 %v2031_v12, %v4147_v13  ;;  %v2107_v13 = vpop.f32.mrf.mxu0  ;;  %v2357_v43 = vsel %vm2356_vm12, 1, %v2729_v55  ;;  %v2387_v9 = vsel %vm2386_vm14, 1, %v2729_v55 }
 0x5a7   :  { %v2108_v42 = vadd.f32 %v4262_v21, %v2107_v13  ;;  %2329 = vperm.xlu2 %2495, %v2327_v32   ;;  %2359 = vperm.xlu0 %2493, %v2357_v43  }
 0x5a8   :  { %v2055_v28 = vadd.f32 %v2054_v7, %v2053_v45  ;;  %v2042_v46 = vadd.f32 %v2622_v0, %v2041_v47  ;;  %2389 = vperm.xlu1 %2494, %v2387_v9  }
 0x5aa   :  { %2625 = vtanh.f32 %v2055_v28  ;;  %v2046_v58 = vsel %vm2045_vm1, %v2622_v0, %v2042_v46 }
 0x5ab   :  { %v2051_v31 = vsel %vm2048_vm2, %v2050_v24, %v2046_v58 }
 0x5ae   :  { %v2110_v35 = vpop.f32.mrf.mxu0 }
 0x5af   :  { %v2111_v51 = vadd.f32 %v4262_v21, %v2110_v35 }
 0x5b0   :  { %v2626_v53 = vpop.eup %2625 }
 0x5b1   :  { %v2057_v8 = vmul.f32 %v2626_v53, %v2051_v31 }
 0x5b3   :  { %2124 = vmatmul.f32.gmra.mxu0 %v2057_v8 }
 0x5b6   :  { %v2113_v50 = vpop.f32.mrf.mxu0 }
 0x5b7   :  { %v2114_v22 = vadd.f32 %v4262_v21, %v2113_v50 }
 0x5bd   :  { %v2210_v14 = vpop.permute.xlu0 %2209 }
 0x5be   :  { %vm2211_vm5 = vcmp.eq.s32.totalorder %v2210_v14, 1  ;;  %v2116_v6 = vpop.f32.mrf.mxu0 }
 0x5bf   :  { %v2117_v60 = vadd.f32 %v4262_v21, %v2116_v6 }
 0x5c6   :  { %v2119_v62 = vpop.f32.mrf.mxu0 }
 0x5c7   :  { %v2120_v59 = vadd.f32 %v4262_v21, %v2119_v62 }
 0x5ce   :  { %v2122_v54 = vpop.f32.mrf.mxu0 }
 0x5cf   :  { %v2123_v26 = vadd.f32 %v4262_v21, %v2122_v54 }
 0x5f9   :  { %v2300_v41 = vpop.permute.xlu2 %2299 }
 0x5fa   :  { %vm2301_vm11 = vcmp.eq.s32.totalorder %v2300_v41, 1 }
 0x5fc   :  { %v2240_v2 = vpop.permute.xlu1 %2239 }
 0x5fd   :  { %vm2241_vm7 = vcmp.eq.s32.totalorder %v2240_v2, 1 }
 0x601   :  { %v2330_v5 = vpop.permute.xlu2 %2329 }
 0x602   :  { %vm2331_vm13 = vcmp.eq.s32.totalorder %v2330_v5, 1 }
 0x604   :  { %v2270_v63 = vpop.permute.xlu1 %2269 }
 0x605   :  { %vm2271_vm9 = vcmp.eq.s32.totalorder %v2270_v63, 1 }
 0x619   :  { %v2360_v7 = vpop.permute.xlu0 %2359 }
 0x61a   :  { %vm2361_vm15 = vcmp.eq.s32.totalorder %v2360_v7, 1  ;;  %v2390_v29 = vpop.permute.xlu1 %2389 }
 0x61b   :  { %vm2391_vm0 = vcmp.eq.s32.totalorder %v2390_v29, 1 }
 0x61d   :  { %v2201_v30 = vpop.f32.mrf.mxu2 }
 0x61e   :  { %v2204_v40 = vadd.f32 %v2201_v30, %v2108_v42 }
 0x620   :  { %2627 = vtanh.f32 %v2204_v40 }
 0x626   :  { %v2628_v27 = vpop.eup %2627 }
 0x627   :  { %v2212_v3 = vsel %vm2211_vm5, %v2628_v27, %v2182_v37  ;;  %2230 = vmatmul.f32.vlgmr.msra.gmra.mxu3 %v2628_v27 }
 0x630   :  { %v2125_v17 = vpop.f32.mrf.mxu0 }
 0x631   :  { %v2126_v45 = vadd.f32 %v4262_v21, %v2125_v17 }
 0x6aa   :  { %v2231_v57 = vpop.f32.mrf.mxu3 }
 0x6ab   :  { %v2234_v61 = vadd.f32 %v2231_v57, %v2111_v51 }
 0x6ad   :  { %2629 = vtanh.f32 %v2234_v61 }
 0x6b3   :  { %v2630_v10 = vpop.eup %2629 }
 0x6b4   :  { %v2242_v11 = vsel %vm2241_vm7, %v2630_v10, %v2212_v3  ;;  %2260 = vmatmul.f32.vlgmr.msra.gmra.mxu1 %v2630_v10 }
 0x731   :  { %v2261_v25 = vpop.f32.mrf.mxu1 }
 0x732   :  { %v2264_v39 = vadd.f32 %v2261_v25, %v2114_v22 }
 0x734   :  { %2631 = vtanh.f32 %v2264_v39 }
 0x73a   :  { %v2632_v49 = vpop.eup %2631 }
 0x73b   :  { %v2272_v36 = vsel %vm2271_vm9, %v2632_v49, %v2242_v11  ;;  %2290 = vmatmul.f32.vlgmr.msrb.gmra.mxu2 %v2632_v49 }
 0x7be   :  { %v2291_v48 = vpop.f32.mrf.mxu2 }
 0x7bf   :  { %v2294_v19 = vadd.f32 %v2291_v48, %v2117_v60 }
 0x7c1   :  { %2633 = vtanh.f32 %v2294_v19 }
 0x7c7   :  { %v2634_v38 = vpop.eup %2633 }
 0x7c8   :  { %v2302_v4 = vsel %vm2301_vm11, %v2634_v38, %v2272_v36  ;;  %2320 = vmatmul.f32.vlgmr.msrb.gmra.mxu3 %v2634_v38 }
 0x84b   :  { %v2321_v0 = vpop.f32.mrf.mxu3 }
 0x84c   :  { %v2324_v23 = vadd.f32 %v2321_v0, %v2120_v59 }
 0x84e   :  { %2635 = vtanh.f32 %v2324_v23 }
 0x854   :  { %v2636_v20 = vpop.eup %2635 }
 0x855   :  { %v2332_v15 = vsel %vm2331_vm13, %v2636_v20, %v2302_v4  ;;  %2350 = vmatmul.f32.vlgmr.msra.gmra.mxu0 %v2636_v20 }
 0x8d2   :  { %v2351_v34 = vpop.f32.mrf.mxu0 }
 0x8d3   :  { %v2354_v56 = vadd.f32 %v2351_v34, %v2123_v26 }
 0x8d5   :  { %2637 = vtanh.f32 %v2354_v56 }
 0x8db   :  { %v2638_v12 = vpop.eup %2637 }
 0x8dc   :  { %v2362_v47 = vsel %vm2361_vm15, %v2638_v12, %v2332_v15  ;;  %2380 = vmatmul.f32.vlgmr.msrb.gmra.mxu1 %v2638_v12 }
 0x959   :  { %v2381_v28 = vpop.f32.mrf.mxu1 }
 0x95a   :  { %v2384_v46 = vadd.f32 %v2381_v28, %v2126_v45 }
 0x95c   :  { %2639 = vtanh.f32 %v2384_v46 }
 0x962   :  { %v2640_v55 = vpop.eup %2639 }
 0x963   :  { %v2392_v44 = vsel %vm2391_vm0, %v2640_v55, %v2362_v47 }
 0x964   :  { %v2475_v52 = vmul.f32 -1.442695, %v2392_v44 }
 0x966   :  { %2641 = vpow2.f32 %v2475_v52 }
 0x96c   :  { %v2642_v58 = vpop.eup %2641 }
 0x96d   :  { %v2396_v24 = vadd.f32 1.0, %v2642_v58 }
 0x96f   :  { %2643 = vrcp.f32 %v2396_v24  ;;  %v2408_v1 = vand.u32 2147483648, %v2396_v24  ;;  %v2406_v33 = vand.u32 2147483647, %v2396_v24  ;;  %vm2402_vm2 = vweird.f32 %v2396_v24 }
 0x971   :  { %v2409_v42 = vor.u32 1.1754944e-38, %v2408_v1  ;;  %vm2407_vm4 = vcmp.eq.f32.partialorder %v2406_v33, 8.507059e+37 }
 0x975   :  { %v2644_v53 = vpop.eup %2643 }
 0x976   :  { %v2398_v31 = vmul.f32 %v2644_v53, %v2396_v24  ;;  %vm2403_vm1 = vweird.f32 %v2644_v53 }
 0x977   :  { %vm2404_vm3 = vmor %vm2402_vm2, %vm2403_vm1 }
 0x978   :  { %v2399_v8 = vsub.f32 1.0, %v2398_v31 }
 0x97a   :  { %v2400_v13 = vmul.f32 %v2644_v53, %v2399_v8 }
 0x97c   :  { %v2401_v21 = vadd.f32 %v2644_v53, %v2400_v13 }
 0x97e   :  { %v2405_v30 = vsel %vm2404_vm3, %v2644_v53, %v2401_v21 }
 0x97f   :  { %v2410_v40 = vsel %vm2407_vm4, %v2409_v42, %v2405_v30 }
 0x980   :  { %2412 = vst [vmem:[%s4304_s8] sm:$0xff] %v2410_v40 }
 0x981   :  { %2417 = vsyncpa [#allocation6], 1 }
 0x982   :  { %2418 = vsyncpa [#allocation8], 1 }

</bundles_post_ra>
